<compile_context>
chip_gen: v5e
topology: v5e:2x2
jax: 0.10.0
libtpu: 0.0.40
codegen_flags: <defaults>
</compile_context>

<pallas_src>
import functools

import jax
import jax.numpy as jnp
from jax.experimental import pallas as pl
from jax.experimental.pallas import tpu as pltpu

VMEM_SPEC = pl.BlockSpec(memory_space=pltpu.MemorySpace.VMEM)

LEAKY_SLOPE = 0.01
BN_EPS = 1e-5


def _leaky(y, slope):
    return jnp.maximum(y, slope * y)


# ----------------------------------------------------------------------------- fused kernel
def _dqn_kernel(
    st_ref,                                         # (TB, F) time-major rows, f32
    w1_ref, b1_ref, w2_ref, b2_ref,                 # implicit-GEMM conv weights (weights in bf16)
    w0p_ref, wcfp_ref, benc_ref,                    # merged fc0 / cnn-final (zero-padded blocks)
    wih_ref, whh_ref, blstm_ref,                    # (L,U,4U), (L,U,4U), (L,1,4U); i/f/o cols pre-scaled by 0.5
    wfc_ref, bfc_ref, gamma_ref, beta_ref,          # (4,H,H), (4,1,H), (4,1,H), (4,1,H)
    wva_ref, bva_ref,                               # (H,1+A), (1,1+A)
    actions_ref, hc_ref,                            # outputs: (B,A), (2L,B,U)
    *, batch, seq_len, units, num_layers, n_fc_layers, slope, eps,
):
    # ---------------- encoder: conv1 -> conv2 -> (fc0 || cnn-final) ----------------
    st = st_ref[...]                                                    # (TB, 143) f32
    st_bf = st.astype(jnp.bfloat16)                                     # bf16 only for MXU operands
    c1 = _leaky(
        jnp.dot(st_bf, w1_ref[...], preferred_element_type=jnp.float32) + b1_ref[...],
        slope)                                                          # (TB, 576) f32
    c2 = _leaky(
        jnp.dot(c1.astype(jnp.bfloat16), w2_ref[...],
                preferred_element_type=jnp.float32) + b2_ref[...],
        slope)                                                          # (TB, 512) f32
    # block-padded weights: lanes [0,H/2) = fc0 branch, [H/2,H) = CNN branch (matches torch.cat)
    enc = _leaky(
        jnp.dot(st, w0p_ref[...], preferred_element_type=jnp.float32)
        + jnp.dot(c2, wcfp_ref[...], preferred_element_type=jnp.float32)
        + benc_ref[...],
        slope)                                                          # (TB, U) f32

    # per-lane gate affine: sigmoid lanes (i,f,o) = 0.5*tanh + 0.5 (pre-scale baked into weights),
    # g lanes = tanh.  Compile-time constant (1, 4U) vectors.
    lane = jax.lax.broadcasted_iota(jnp.int32, (1, 4 * units), 1)
    is_g = jnp.logical_and(lane >= 2 * units, lane < 3 * units)
    g_scale = jnp.where(is_g, 1.0, 0.5).astype(jnp.float32)
    g_off = jnp.where(is_g, 0.0, 0.5).astype(jnp.float32)

    # ---------------- stacked LSTM: layer-outer / time-inner, register-carried sequence ----------
    hs = None
    for layer in range(num_layers):
        wih = wih_ref[layer]                                            # (U, 4U)
        whh = whh_ref[layer]                                            # (U, 4U)
        bl = blstm_ref[layer]                                           # (1, 4U)
        if layer == 0:
            # batched input projection for all timesteps; bias hoisted out of the recurrence
            xproj = jnp.dot(enc, wih, preferred_element_type=jnp.float32) + bl     # (TB, 4U)
            xps = [xproj[t * batch:(t + 1) * batch, :] for t in range(seq_len)]
        else:
            # previous layer's hidden states are register-carried values; tiny off-critical-path dots
            xps = [jnp.dot(h_t, wih, preferred_element_type=jnp.float32) + bl for h_t in hs]
        h = jnp.zeros((batch, units), jnp.float32)
        c = jnp.zeros((batch, units), jnp.float32)
        hs = []
        for t in range(seq_len):                                        # T=8 fully unrolled
            pre = xps[t] + jnp.dot(h, whh, preferred_element_type=jnp.float32)   # (B, 4U)
            act = jnp.tanh(pre) * g_scale + g_off                       # ONE EUP pass + VPU affine
            i_g = act[:, 0:units]
            f_g = act[:, units:2 * units]
            g_g = act[:, 2 * units:3 * units]
            o_g = act[:, 3 * units:4 * units]
            c = f_g * c + i_g * g_g
            h = o_g * jnp.tanh(c)
            hs.append(h)
        hc_ref[layer] = h                                               # final hidden state
        hc_ref[num_layers + layer] = c                                  # final cell state

    # ---------------- dueling head: fc1..fc4 + (training-mode) BatchNorm1d ----------------
    x = hs[-1]                                                          # out[:, -1, :] of top layer
    for i in range(n_fc_layers):
        y = _leaky(jnp.dot(x, wfc_ref[i], preferred_element_type=jnp.float32) + bfc_ref[i], slope)
        mean = jnp.mean(y, axis=0, keepdims=True)                       # batch stats (train mode)
        var = jnp.mean((y - mean) ** 2, axis=0, keepdims=True)          # biased variance
        x = (y - mean) * jax.lax.rsqrt(var + eps) * gamma_ref[i] + beta_ref[i]
    va = jnp.dot(x, wva_ref[...], preferred_element_type=jnp.float32) + bva_ref[...]
    value = va[:, 0:1]                                                  # (B, 1)
    adv = va[:, 1:]                                                     # (B, A)
    actions_ref[...] = value + (adv - jnp.mean(adv, axis=1, keepdims=True))


# ----------------------------------------------------------------------------- forward wrapper
def dqn_forward(state, params):
    """Returns (actions, (hidden_state, cell_state)) with zero initial LSTM state."""
    b, t, f = state.shape
    num_layers, units, four_u = params["wih_t"].shape
    assert four_u == 4 * units
    assert f == params["w1_full"].shape[0]
    n_actions = params["wva"].shape[1] - 1
    n_fc = params["wfc"].shape[0]

    # 9 KB glue: time-major rows (row = t*B + b) so every per-timestep slice in the kernel is a
    # static contiguous sublane slice.  The 15/128 feature split is folded into the weights.
    st_tm = jnp.transpose(state, (1, 0, 2)).reshape(t * b, f)

    kernel = functools.partial(
        _dqn_kernel, batch=b, seq_len=t, units=units, num_layers=num_layers,
        n_fc_layers=n_fc, slope=LEAKY_SLOPE, eps=BN_EPS)

    actions, hc = pl.pallas_call(
        kernel,
        out_shape=(
            jax.ShapeDtypeStruct((b, n_actions), jnp.float32),
            jax.ShapeDtypeStruct((2 * num_layers, b, units), jnp.float32),
        ),
        in_specs=[VMEM_SPEC] * 17,
        out_specs=(VMEM_SPEC, VMEM_SPEC),
    )(
        st_tm,
        params["w1_full"], params["b1_full"], params["w2_full"], params["b2_full"],
        params["w0p"], params["wcfp"], params["b_enc"],
        params["wih_t"], params["whh_t"], params["b_lstm"],
        params["wfc"], params["bfc"], params["gamma"], params["beta"],
        params["wva"], params["bva"],
    )
    hidden_state = hc[:num_layers]
    cell_state = hc[num_layers:]
    return actions, (hidden_state, cell_state)


# ----------------------------------------------------------------------------- parameter init
def _unroll_conv(w_oihw, in_chw):
    """Fold a VALID stride-1 Conv2d into a dense (Ci*H*W, Co*Ho*Wo) matrix (implicit GEMM).

    Correct by linearity: column j of the result is the NCHW-flattened conv response of the
    j-th one-hot NCHW-flattened input.  Done once at init; never runs in the forward path.
    """
    ci, h, w = in_chw
    n_in = ci * h * w
    eye = jnp.eye(n_in, dtype=jnp.float32).reshape(n_in, ci, h, w)
    out = jax.lax.conv_general_dilated(
        eye, w_oihw.astype(jnp.float32), window_strides=(1, 1), padding="VALID",
        dimension_numbers=("NCHW", "OIHW", "NCHW"))
    return out.reshape(n_in, -1)          # rows: NCHW-flat input, cols: NCHW-flat output


def init_params(key, feature_count=143, hidden_dims=32, n_actions=4, num_layers=3, lstm_units=32):
    assert hidden_dims == lstm_units, "forward() requires hidden_dims == lstm_units"
    assert feature_count - 128 == 15, "forward() slices state[:, :, :15] and state[:, :, -128:]"
    hh = hidden_dims // 2
    n15 = feature_count - 128
    keys = iter(jax.random.split(key, 24))

    def nrm(shape, scale=0.1):
        return (scale * jax.random.normal(next(keys), shape)).astype(jnp.float32)

    p = {}
    # fc0: Linear(15 -> hh)
    w0 = nrm((n15, hh)); b0 = nrm((hh,))
    # conv1: Conv2d(2 -> 16, k=3); conv2: Conv2d(16 -> 32, k=3)   (PyTorch OIHW weights)
    wc1 = nrm((16, 2, 3, 3)); bc1 = nrm((16,))
    wc2 = nrm((32, 16, 3, 3)); bc2 = nrm((32,))
    # CNN final Linear(32*4*4 -> hh), consuming the NCHW-flattened conv2 output (torch Flatten)
    wcf = nrm((32 * 4 * 4, hh)); bcf = nrm((hh,))

    # --- implicit-GEMM conv weights (im2col baked in at init), bf16 operands, f32 accumulate ---
    w1 = _unroll_conv(wc1, (2, 8, 8))                                            # (128, 576)
    p["w1_full"] = jnp.concatenate(                                              # (143, 576) bf16
        [jnp.zeros((n15, w1.shape[1]), jnp.float32), w1], axis=0).astype(jnp.bfloat16)
    p["b1_full"] = jnp.repeat(bc1, 6 * 6)[None, :]                               # (1, 576) f32
    p["w2_full"] = _unroll_conv(wc2, (16, 6, 6)).astype(jnp.bfloat16)            # (576, 512) bf16
    p["b2_full"] = jnp.repeat(bc2, 4 * 4)[None, :]                               # (1, 512) f32
    # --- fc0 and CNN-final merged into one (TB, 2*hh) output via zero-padded block weights;
    #     the 15/128 feature split is folded in by zero rows so the kernel takes the full state ---
    w0_cols = jnp.concatenate([w0, jnp.zeros((n15, hh), jnp.float32)], axis=1)          # (15, 32)
    p["w0p"] = jnp.concatenate([w0_cols, jnp.zeros((128, hidden_dims), jnp.float32)], axis=0)  # (143, 32)
    p["wcfp"] = jnp.concatenate([jnp.zeros((32 * 16, hh), jnp.float32), wcf], axis=1)   # (512, 32)
    p["b_enc"] = jnp.concatenate([b0, bcf])[None, :]                                    # (1, 32)

    # LSTM (layer-0 input = hidden_dims == lstm_units, so all layers stack uniformly)
    wih = nrm((num_layers, 4 * lstm_units, lstm_units))
    whh = nrm((num_layers, 4 * lstm_units, lstm_units))
    bih = nrm((num_layers, 4 * lstm_units))
    bhh = nrm((num_layers, 4 * lstm_units))
    # sigmoid(x) = 0.5*tanh(x/2) + 0.5 → bake the /2 into the i, f, o gate columns so the kernel
    # does a single tanh over the whole (B, 4U) gate vreg per timestep (EUP critical path).
    col_scale = jnp.concatenate([
        jnp.full((2 * lstm_units,), 0.5, jnp.float32),   # i, f
        jnp.ones((lstm_units,), jnp.float32),            # g (true tanh gate, unscaled)
        jnp.full((lstm_units,), 0.5, jnp.float32)])      # o
    p["wih_t"] = jnp.transpose(wih, (0, 2, 1)) * col_scale              # (L, U, 4U)
    p["whh_t"] = jnp.transpose(whh, (0, 2, 1)) * col_scale              # (L, U, 4U)
    p["b_lstm"] = ((bih + bhh) * col_scale).reshape(num_layers, 1, 4 * lstm_units)

    # fc1..fc4 + batch norms
    p["wfc"] = nrm((4, hidden_dims, hidden_dims))
    p["bfc"] = nrm((4, 1, hidden_dims))
    p["gamma"] = 1.0 + nrm((4, 1, hidden_dims))
    p["beta"] = nrm((4, 1, hidden_dims))
    # dueling heads (value || advantage fused into one matmul)
    wv = nrm((hidden_dims, 1)); wa = nrm((hidden_dims, n_actions))
    bv = nrm((1,)); ba = nrm((n_actions,))
    p["wva"] = jnp.concatenate([wv, wa], axis=1)                        # (H, 1 + A)
    p["bva"] = jnp.concatenate([bv, ba])[None, :]                       # (1, 1 + A)
    return p


# TODO(synk): optimizer (AdamW), HuberLoss and BatchNorm running-stat updates are training-only
# side effects and are intentionally not part of the forward kernel.

if __name__ == "__main__":
    B, T, F = 2, 8, 143          # batch, num_observations, feature_count (15 + 128)
    key = jax.random.PRNGKey(0)
    pkey, skey = jax.random.split(key)
    params = init_params(pkey)
    state = jax.random.normal(skey, (B, T, F), dtype=jnp.float32)

    fwd = jax.jit(dqn_forward)
    actions, (hidden_state, cell_state) = fwd(state, params)
    jax.block_until_ready((actions, hidden_state, cell_state))

    assert actions.shape == (B, 4)
    assert hidden_state.shape == (3, B, 32)
    assert cell_state.shape == (3, B, 32)
    assert bool(jnp.all(jnp.isfinite(actions)))
    assert bool(jnp.all(jnp.isfinite(hidden_state)))
    assert bool(jnp.all(jnp.isfinite(cell_state)))
    print("KERNEL_OK")
</pallas_src>

<mosaic_0001>
module attributes {stable_mosaic.version = 11 : i64} {
  func.func @_dqn_kernel(%arg0: memref<16x143xf32, #tpu.memory_space<vmem>>, %arg1: memref<143x576xbf16, #tpu.memory_space<vmem>>, %arg2: memref<1x576xf32, #tpu.memory_space<vmem>>, %arg3: memref<576x512xbf16, #tpu.memory_space<vmem>>, %arg4: memref<1x512xf32, #tpu.memory_space<vmem>>, %arg5: memref<143x32xf32, #tpu.memory_space<vmem>>, %arg6: memref<512x32xf32, #tpu.memory_space<vmem>>, %arg7: memref<1x32xf32, #tpu.memory_space<vmem>>, %arg8: memref<3x32x128xf32, #tpu.memory_space<vmem>>, %arg9: memref<3x32x128xf32, #tpu.memory_space<vmem>>, %arg10: memref<3x1x128xf32, #tpu.memory_space<vmem>>, %arg11: memref<4x32x32xf32, #tpu.memory_space<vmem>>, %arg12: memref<4x1x32xf32, #tpu.memory_space<vmem>>, %arg13: memref<4x1x32xf32, #tpu.memory_space<vmem>>, %arg14: memref<4x1x32xf32, #tpu.memory_space<vmem>>, %arg15: memref<32x5xf32, #tpu.memory_space<vmem>>, %arg16: memref<1x5xf32, #tpu.memory_space<vmem>>, %arg17: memref<2x4xf32, #tpu.memory_space<vmem>>, %arg18: memref<6x2x32xf32, #tpu.memory_space<vmem>>) attributes {dimension_semantics = [], scalar_prefetch = 0 : i64, scratch_operands = 0 : i64, tpu.core_type = #tpu.core_type<tc>} {
    %c0 = arith.constant 0 : index
    %c0_0 = arith.constant 0 : index
    %0 = vector.load %arg0[%c0, %c0_0] : memref<16x143xf32, #tpu.memory_space<vmem>>, vector<16x143xf32>
    %1 = arith.truncf %0 : vector<16x143xf32> to vector<16x143xbf16>
    %c0_1 = arith.constant 0 : index
    %c0_2 = arith.constant 0 : index
    %2 = vector.load %arg1[%c0_1, %c0_2] : memref<143x576xbf16, #tpu.memory_space<vmem>>, vector<143x576xbf16>
    %cst = arith.constant dense<0.000000e+00> : vector<16x576xf32>
    %3 = tpu.matmul %1, %2, %cst {dimension_numbers = #tpu.dot_dimension_numbers<[1], [0], [0], [1], [0, 0, 1, 1], [], []>} : vector<16x143xbf16>, vector<143x576xbf16>, vector<16x576xf32> -> vector<16x576xf32>
    %c0_3 = arith.constant 0 : index
    %c0_4 = arith.constant 0 : index
    %4 = vector.load %arg2[%c0_3, %c0_4] : memref<1x576xf32, #tpu.memory_space<vmem>>, vector<1x576xf32>
    %5 = vector.broadcast %4 : vector<1x576xf32> to vector<16x576xf32>
    %6 = arith.addf %3, %5 : vector<16x576xf32>
    %cst_5 = arith.constant 0.00999999977 : f32
    %7 = vector.broadcast %cst_5 : f32 to vector<16x576xf32>
    %8 = arith.mulf %7, %6 : vector<16x576xf32>
    %9 = arith.maximumf %6, %8 : vector<16x576xf32>
    %10 = arith.truncf %9 : vector<16x576xf32> to vector<16x576xbf16>
    %c0_6 = arith.constant 0 : index
    %c0_7 = arith.constant 0 : index
    %11 = vector.load %arg3[%c0_6, %c0_7] : memref<576x512xbf16, #tpu.memory_space<vmem>>, vector<576x512xbf16>
    %cst_8 = arith.constant dense<0.000000e+00> : vector<16x512xf32>
    %12 = tpu.matmul %10, %11, %cst_8 {dimension_numbers = #tpu.dot_dimension_numbers<[1], [0], [0], [1], [0, 0, 1, 1], [], []>} : vector<16x576xbf16>, vector<576x512xbf16>, vector<16x512xf32> -> vector<16x512xf32>
    %c0_9 = arith.constant 0 : index
    %c0_10 = arith.constant 0 : index
    %13 = vector.load %arg4[%c0_9, %c0_10] : memref<1x512xf32, #tpu.memory_space<vmem>>, vector<1x512xf32>
    %14 = vector.broadcast %13 : vector<1x512xf32> to vector<16x512xf32>
    %15 = arith.addf %12, %14 : vector<16x512xf32>
    %cst_11 = arith.constant 0.00999999977 : f32
    %16 = vector.broadcast %cst_11 : f32 to vector<16x512xf32>
    %17 = arith.mulf %16, %15 : vector<16x512xf32>
    %18 = arith.maximumf %15, %17 : vector<16x512xf32>
    %c0_12 = arith.constant 0 : index
    %c0_13 = arith.constant 0 : index
    %19 = vector.load %arg5[%c0_12, %c0_13] : memref<143x32xf32, #tpu.memory_space<vmem>>, vector<143x32xf32>
    %cst_14 = arith.constant dense<0.000000e+00> : vector<16x32xf32>
    %20 = tpu.matmul %0, %19, %cst_14 {dimension_numbers = #tpu.dot_dimension_numbers<[1], [0], [0], [1], [0, 0, 1, 1], [], []>} : vector<16x143xf32>, vector<143x32xf32>, vector<16x32xf32> -> vector<16x32xf32>
    %c0_15 = arith.constant 0 : index
    %c0_16 = arith.constant 0 : index
    %21 = vector.load %arg6[%c0_15, %c0_16] : memref<512x32xf32, #tpu.memory_space<vmem>>, vector<512x32xf32>
    %cst_17 = arith.constant dense<0.000000e+00> : vector<16x32xf32>
    %22 = tpu.matmul %18, %21, %cst_17 {dimension_numbers = #tpu.dot_dimension_numbers<[1], [0], [0], [1], [0, 0, 1, 1], [], []>} : vector<16x512xf32>, vector<512x32xf32>, vector<16x32xf32> -> vector<16x32xf32>
    %23 = arith.addf %20, %22 : vector<16x32xf32>
    %c0_18 = arith.constant 0 : index
    %c0_19 = arith.constant 0 : index
    %24 = vector.load %arg7[%c0_18, %c0_19] : memref<1x32xf32, #tpu.memory_space<vmem>>, vector<1x32xf32>
    %25 = vector.broadcast %24 : vector<1x32xf32> to vector<16x32xf32>
    %26 = arith.addf %23, %25 : vector<16x32xf32>
    %cst_20 = arith.constant 0.00999999977 : f32
    %27 = vector.broadcast %cst_20 : f32 to vector<16x32xf32>
    %28 = arith.mulf %27, %26 : vector<16x32xf32>
    %29 = arith.maximumf %26, %28 : vector<16x32xf32>
    %30 = tpu.iota {dimensions = array<i32: 1>} : vector<1x128xi32>
    %c64_i32 = arith.constant 64 : i32
    %31 = vector.broadcast %c64_i32 : i32 to vector<1x128xi32>
    %32 = arith.cmpi sge, %30, %31 : vector<1x128xi32>
    %c96_i32 = arith.constant 96 : i32
    %33 = vector.broadcast %c96_i32 : i32 to vector<1x128xi32>
    %34 = arith.cmpi slt, %30, %33 : vector<1x128xi32>
    %35 = arith.andi %32, %34 : vector<1x128xi1>
    %cst_21 = arith.constant 1.000000e+00 : f32
    %cst_22 = arith.constant 5.000000e-01 : f32
    %36 = vector.broadcast %cst_21 : f32 to vector<1x128xf32>
    %37 = vector.broadcast %cst_22 : f32 to vector<1x128xf32>
    %38 = arith.select %35, %36, %37 : vector<1x128xi1>, vector<1x128xf32>
    %cst_23 = arith.constant 0.000000e+00 : f32
    %cst_24 = arith.constant 5.000000e-01 : f32
    %39 = vector.broadcast %cst_23 : f32 to vector<1x128xf32>
    %40 = vector.broadcast %cst_24 : f32 to vector<1x128xf32>
    %41 = arith.select %35, %39, %40 : vector<1x128xi1>, vector<1x128xf32>
    %c0_25 = arith.constant 0 : index
    %c0_26 = arith.constant 0 : index
    %c0_27 = arith.constant 0 : index
    %42 = vector.load %arg8[%c0_25, %c0_26, %c0_27] : memref<3x32x128xf32, #tpu.memory_space<vmem>>, vector<1x32x128xf32>
    %43 = vector.shape_cast %42 : vector<1x32x128xf32> to vector<32x128xf32>
    %c0_28 = arith.constant 0 : index
    %c0_29 = arith.constant 0 : index
    %c0_30 = arith.constant 0 : index
    %44 = vector.load %arg9[%c0_28, %c0_29, %c0_30] : memref<3x32x128xf32, #tpu.memory_space<vmem>>, vector<1x32x128xf32>
    %45 = vector.shape_cast %44 : vector<1x32x128xf32> to vector<32x128xf32>
    %c0_31 = arith.constant 0 : index
    %c0_32 = arith.constant 0 : index
    %c0_33 = arith.constant 0 : index
    %46 = vector.load %arg10[%c0_31, %c0_32, %c0_33] : memref<3x1x128xf32, #tpu.memory_space<vmem>>, vector<1x1x128xf32>
    %47 = vector.shape_cast %46 : vector<1x1x128xf32> to vector<1x128xf32>
    %cst_34 = arith.constant dense<0.000000e+00> : vector<16x128xf32>
    %48 = tpu.matmul %29, %43, %cst_34 {dimension_numbers = #tpu.dot_dimension_numbers<[1], [0], [0], [1], [0, 0, 1, 1], [], []>} : vector<16x32xf32>, vector<32x128xf32>, vector<16x128xf32> -> vector<16x128xf32>
    %49 = vector.broadcast %47 : vector<1x128xf32> to vector<16x128xf32>
    %50 = arith.addf %48, %49 : vector<16x128xf32>
    %51 = vector.extract_strided_slice %50 {offsets = [0, 0], sizes = [2, 128], strides = [1, 1]} : vector<16x128xf32> to vector<2x128xf32>
    %52 = vector.extract_strided_slice %50 {offsets = [2, 0], sizes = [2, 128], strides = [1, 1]} : vector<16x128xf32> to vector<2x128xf32>
    %53 = vector.extract_strided_slice %50 {offsets = [4, 0], sizes = [2, 128], strides = [1, 1]} : vector<16x128xf32> to vector<2x128xf32>
    %54 = vector.extract_strided_slice %50 {offsets = [6, 0], sizes = [2, 128], strides = [1, 1]} : vector<16x128xf32> to vector<2x128xf32>
    %55 = vector.extract_strided_slice %50 {offsets = [8, 0], sizes = [2, 128], strides = [1, 1]} : vector<16x128xf32> to vector<2x128xf32>
    %56 = vector.extract_strided_slice %50 {offsets = [10, 0], sizes = [2, 128], strides = [1, 1]} : vector<16x128xf32> to vector<2x128xf32>
    %57 = vector.extract_strided_slice %50 {offsets = [12, 0], sizes = [2, 128], strides = [1, 1]} : vector<16x128xf32> to vector<2x128xf32>
    %58 = vector.extract_strided_slice %50 {offsets = [14, 0], sizes = [2, 128], strides = [1, 1]} : vector<16x128xf32> to vector<2x128xf32>
    %cst_35 = arith.constant 0.000000e+00 : f32
    %59 = vector.broadcast %cst_35 : f32 to vector<2x32xf32>
    %cst_36 = arith.constant 0.000000e+00 : f32
    %60 = vector.broadcast %cst_36 : f32 to vector<2x32xf32>
    %cst_37 = arith.constant dense<0.000000e+00> : vector<2x128xf32>
    %61 = tpu.matmul %59, %45, %cst_37 {dimension_numbers = #tpu.dot_dimension_numbers<[1], [0], [0], [1], [0, 0, 1, 1], [], []>} : vector<2x32xf32>, vector<32x128xf32>, vector<2x128xf32> -> vector<2x128xf32>
    %62 = arith.addf %51, %61 : vector<2x128xf32>
    %63 = math.tanh %62 : vector<2x128xf32>
    %64 = vector.broadcast %38 : vector<1x128xf32> to vector<2x128xf32>
    %65 = arith.mulf %63, %64 : vector<2x128xf32>
    %66 = vector.broadcast %41 : vector<1x128xf32> to vector<2x128xf32>
    %67 = arith.addf %65, %66 : vector<2x128xf32>
    %68 = vector.extract_strided_slice %67 {offsets = [0, 0], sizes = [2, 32], strides = [1, 1]} : vector<2x128xf32> to vector<2x32xf32>
    %69 = vector.extract_strided_slice %67 {offsets = [0, 32], sizes = [2, 32], strides = [1, 1]} : vector<2x128xf32> to vector<2x32xf32>
    %70 = vector.extract_strided_slice %67 {offsets = [0, 64], sizes = [2, 32], strides = [1, 1]} : vector<2x128xf32> to vector<2x32xf32>
    %71 = vector.extract_strided_slice %67 {offsets = [0, 96], sizes = [2, 32], strides = [1, 1]} : vector<2x128xf32> to vector<2x32xf32>
    %72 = arith.mulf %69, %60 : vector<2x32xf32>
    %73 = arith.mulf %68, %70 : vector<2x32xf32>
    %74 = arith.addf %72, %73 : vector<2x32xf32>
    %75 = math.tanh %74 : vector<2x32xf32>
    %76 = arith.mulf %71, %75 : vector<2x32xf32>
    %cst_38 = arith.constant dense<0.000000e+00> : vector<2x128xf32>
    %77 = tpu.matmul %76, %45, %cst_38 {dimension_numbers = #tpu.dot_dimension_numbers<[1], [0], [0], [1], [0, 0, 1, 1], [], []>} : vector<2x32xf32>, vector<32x128xf32>, vector<2x128xf32> -> vector<2x128xf32>
    %78 = arith.addf %52, %77 : vector<2x128xf32>
    %79 = math.tanh %78 : vector<2x128xf32>
    %80 = vector.broadcast %38 : vector<1x128xf32> to vector<2x128xf32>
    %81 = arith.mulf %79, %80 : vector<2x128xf32>
    %82 = vector.broadcast %41 : vector<1x128xf32> to vector<2x128xf32>
    %83 = arith.addf %81, %82 : vector<2x128xf32>
    %84 = vector.extract_strided_slice %83 {offsets = [0, 0], sizes = [2, 32], strides = [1, 1]} : vector<2x128xf32> to vector<2x32xf32>
    %85 = vector.extract_strided_slice %83 {offsets = [0, 32], sizes = [2, 32], strides = [1, 1]} : vector<2x128xf32> to vector<2x32xf32>
    %86 = vector.extract_strided_slice %83 {offsets = [0, 64], sizes = [2, 32], strides = [1, 1]} : vector<2x128xf32> to vector<2x32xf32>
    %87 = vector.extract_strided_slice %83 {offsets = [0, 96], sizes = [2, 32], strides = [1, 1]} : vector<2x128xf32> to vector<2x32xf32>
    %88 = arith.mulf %85, %74 : vector<2x32xf32>
    %89 = arith.mulf %84, %86 : vector<2x32xf32>
    %90 = arith.addf %88, %89 : vector<2x32xf32>
    %91 = math.tanh %90 : vector<2x32xf32>
    %92 = arith.mulf %87, %91 : vector<2x32xf32>
    %cst_39 = arith.constant dense<0.000000e+00> : vector<2x128xf32>
    %93 = tpu.matmul %92, %45, %cst_39 {dimension_numbers = #tpu.dot_dimension_numbers<[1], [0], [0], [1], [0, 0, 1, 1], [], []>} : vector<2x32xf32>, vector<32x128xf32>, vector<2x128xf32> -> vector<2x128xf32>
    %94 = arith.addf %53, %93 : vector<2x128xf32>
    %95 = math.tanh %94 : vector<2x128xf32>
    %96 = vector.broadcast %38 : vector<1x128xf32> to vector<2x128xf32>
    %97 = arith.mulf %95, %96 : vector<2x128xf32>
    %98 = vector.broadcast %41 : vector<1x128xf32> to vector<2x128xf32>
    %99 = arith.addf %97, %98 : vector<2x128xf32>
    %100 = vector.extract_strided_slice %99 {offsets = [0, 0], sizes = [2, 32], strides = [1, 1]} : vector<2x128xf32> to vector<2x32xf32>
    %101 = vector.extract_strided_slice %99 {offsets = [0, 32], sizes = [2, 32], strides = [1, 1]} : vector<2x128xf32> to vector<2x32xf32>
    %102 = vector.extract_strided_slice %99 {offsets = [0, 64], sizes = [2, 32], strides = [1, 1]} : vector<2x128xf32> to vector<2x32xf32>
    %103 = vector.extract_strided_slice %99 {offsets = [0, 96], sizes = [2, 32], strides = [1, 1]} : vector<2x128xf32> to vector<2x32xf32>
    %104 = arith.mulf %101, %90 : vector<2x32xf32>
    %105 = arith.mulf %100, %102 : vector<2x32xf32>
    %106 = arith.addf %104, %105 : vector<2x32xf32>
    %107 = math.tanh %106 : vector<2x32xf32>
    %108 = arith.mulf %103, %107 : vector<2x32xf32>
    %cst_40 = arith.constant dense<0.000000e+00> : vector<2x128xf32>
    %109 = tpu.matmul %108, %45, %cst_40 {dimension_numbers = #tpu.dot_dimension_numbers<[1], [0], [0], [1], [0, 0, 1, 1], [], []>} : vector<2x32xf32>, vector<32x128xf32>, vector<2x128xf32> -> vector<2x128xf32>
    %110 = arith.addf %54, %109 : vector<2x128xf32>
    %111 = math.tanh %110 : vector<2x128xf32>
    %112 = vector.broadcast %38 : vector<1x128xf32> to vector<2x128xf32>
    %113 = arith.mulf %111, %112 : vector<2x128xf32>
    %114 = vector.broadcast %41 : vector<1x128xf32> to vector<2x128xf32>
    %115 = arith.addf %113, %114 : vector<2x128xf32>
    %116 = vector.extract_strided_slice %115 {offsets = [0, 0], sizes = [2, 32], strides = [1, 1]} : vector<2x128xf32> to vector<2x32xf32>
    %117 = vector.extract_strided_slice %115 {offsets = [0, 32], sizes = [2, 32], strides = [1, 1]} : vector<2x128xf32> to vector<2x32xf32>
    %118 = vector.extract_strided_slice %115 {offsets = [0, 64], sizes = [2, 32], strides = [1, 1]} : vector<2x128xf32> to vector<2x32xf32>
    %119 = vector.extract_strided_slice %115 {offsets = [0, 96], sizes = [2, 32], strides = [1, 1]} : vector<2x128xf32> to vector<2x32xf32>
    %120 = arith.mulf %117, %106 : vector<2x32xf32>
    %121 = arith.mulf %116, %118 : vector<2x32xf32>
    %122 = arith.addf %120, %121 : vector<2x32xf32>
    %123 = math.tanh %122 : vector<2x32xf32>
    %124 = arith.mulf %119, %123 : vector<2x32xf32>
    %cst_41 = arith.constant dense<0.000000e+00> : vector<2x128xf32>
    %125 = tpu.matmul %124, %45, %cst_41 {dimension_numbers = #tpu.dot_dimension_numbers<[1], [0], [0], [1], [0, 0, 1, 1], [], []>} : vector<2x32xf32>, vector<32x128xf32>, vector<2x128xf32> -> vector<2x128xf32>
    %126 = arith.addf %55, %125 : vector<2x128xf32>
    %127 = math.tanh %126 : vector<2x128xf32>
    %128 = vector.broadcast %38 : vector<1x128xf32> to vector<2x128xf32>
    %129 = arith.mulf %127, %128 : vector<2x128xf32>
    %130 = vector.broadcast %41 : vector<1x128xf32> to vector<2x128xf32>
    %131 = arith.addf %129, %130 : vector<2x128xf32>
    %132 = vector.extract_strided_slice %131 {offsets = [0, 0], sizes = [2, 32], strides = [1, 1]} : vector<2x128xf32> to vector<2x32xf32>
    %133 = vector.extract_strided_slice %131 {offsets = [0, 32], sizes = [2, 32], strides = [1, 1]} : vector<2x128xf32> to vector<2x32xf32>
    %134 = vector.extract_strided_slice %131 {offsets = [0, 64], sizes = [2, 32], strides = [1, 1]} : vector<2x128xf32> to vector<2x32xf32>
    %135 = vector.extract_strided_slice %131 {offsets = [0, 96], sizes = [2, 32], strides = [1, 1]} : vector<2x128xf32> to vector<2x32xf32>
    %136 = arith.mulf %133, %122 : vector<2x32xf32>
    %137 = arith.mulf %132, %134 : vector<2x32xf32>
    %138 = arith.addf %136, %137 : vector<2x32xf32>
    %139 = math.tanh %138 : vector<2x32xf32>
    %140 = arith.mulf %135, %139 : vector<2x32xf32>
    %cst_42 = arith.constant dense<0.000000e+00> : vector<2x128xf32>
    %141 = tpu.matmul %140, %45, %cst_42 {dimension_numbers = #tpu.dot_dimension_numbers<[1], [0], [0], [1], [0, 0, 1, 1], [], []>} : vector<2x32xf32>, vector<32x128xf32>, vector<2x128xf32> -> vector<2x128xf32>
    %142 = arith.addf %56, %141 : vector<2x128xf32>
    %143 = math.tanh %142 : vector<2x128xf32>
    %144 = vector.broadcast %38 : vector<1x128xf32> to vector<2x128xf32>
    %145 = arith.mulf %143, %144 : vector<2x128xf32>
    %146 = vector.broadcast %41 : vector<1x128xf32> to vector<2x128xf32>
    %147 = arith.addf %145, %146 : vector<2x128xf32>
    %148 = vector.extract_strided_slice %147 {offsets = [0, 0], sizes = [2, 32], strides = [1, 1]} : vector<2x128xf32> to vector<2x32xf32>
    %149 = vector.extract_strided_slice %147 {offsets = [0, 32], sizes = [2, 32], strides = [1, 1]} : vector<2x128xf32> to vector<2x32xf32>
    %150 = vector.extract_strided_slice %147 {offsets = [0, 64], sizes = [2, 32], strides = [1, 1]} : vector<2x128xf32> to vector<2x32xf32>
    %151 = vector.extract_strided_slice %147 {offsets = [0, 96], sizes = [2, 32], strides = [1, 1]} : vector<2x128xf32> to vector<2x32xf32>
    %152 = arith.mulf %149, %138 : vector<2x32xf32>
    %153 = arith.mulf %148, %150 : vector<2x32xf32>
    %154 = arith.addf %152, %153 : vector<2x32xf32>
    %155 = math.tanh %154 : vector<2x32xf32>
    %156 = arith.mulf %151, %155 : vector<2x32xf32>
    %cst_43 = arith.constant dense<0.000000e+00> : vector<2x128xf32>
    %157 = tpu.matmul %156, %45, %cst_43 {dimension_numbers = #tpu.dot_dimension_numbers<[1], [0], [0], [1], [0, 0, 1, 1], [], []>} : vector<2x32xf32>, vector<32x128xf32>, vector<2x128xf32> -> vector<2x128xf32>
    %158 = arith.addf %57, %157 : vector<2x128xf32>
    %159 = math.tanh %158 : vector<2x128xf32>
    %160 = vector.broadcast %38 : vector<1x128xf32> to vector<2x128xf32>
    %161 = arith.mulf %159, %160 : vector<2x128xf32>
    %162 = vector.broadcast %41 : vector<1x128xf32> to vector<2x128xf32>
    %163 = arith.addf %161, %162 : vector<2x128xf32>
    %164 = vector.extract_strided_slice %163 {offsets = [0, 0], sizes = [2, 32], strides = [1, 1]} : vector<2x128xf32> to vector<2x32xf32>
    %165 = vector.extract_strided_slice %163 {offsets = [0, 32], sizes = [2, 32], strides = [1, 1]} : vector<2x128xf32> to vector<2x32xf32>
    %166 = vector.extract_strided_slice %163 {offsets = [0, 64], sizes = [2, 32], strides = [1, 1]} : vector<2x128xf32> to vector<2x32xf32>
    %167 = vector.extract_strided_slice %163 {offsets = [0, 96], sizes = [2, 32], strides = [1, 1]} : vector<2x128xf32> to vector<2x32xf32>
    %168 = arith.mulf %165, %154 : vector<2x32xf32>
    %169 = arith.mulf %164, %166 : vector<2x32xf32>
    %170 = arith.addf %168, %169 : vector<2x32xf32>
    %171 = math.tanh %170 : vector<2x32xf32>
    %172 = arith.mulf %167, %171 : vector<2x32xf32>
    %cst_44 = arith.constant dense<0.000000e+00> : vector<2x128xf32>
    %173 = tpu.matmul %172, %45, %cst_44 {dimension_numbers = #tpu.dot_dimension_numbers<[1], [0], [0], [1], [0, 0, 1, 1], [], []>} : vector<2x32xf32>, vector<32x128xf32>, vector<2x128xf32> -> vector<2x128xf32>
    %174 = arith.addf %58, %173 : vector<2x128xf32>
    %175 = math.tanh %174 : vector<2x128xf32>
    %176 = vector.broadcast %38 : vector<1x128xf32> to vector<2x128xf32>
    %177 = arith.mulf %175, %176 : vector<2x128xf32>
    %178 = vector.broadcast %41 : vector<1x128xf32> to vector<2x128xf32>
    %179 = arith.addf %177, %178 : vector<2x128xf32>
    %180 = vector.extract_strided_slice %179 {offsets = [0, 0], sizes = [2, 32], strides = [1, 1]} : vector<2x128xf32> to vector<2x32xf32>
    %181 = vector.extract_strided_slice %179 {offsets = [0, 32], sizes = [2, 32], strides = [1, 1]} : vector<2x128xf32> to vector<2x32xf32>
    %182 = vector.extract_strided_slice %179 {offsets = [0, 64], sizes = [2, 32], strides = [1, 1]} : vector<2x128xf32> to vector<2x32xf32>
    %183 = vector.extract_strided_slice %179 {offsets = [0, 96], sizes = [2, 32], strides = [1, 1]} : vector<2x128xf32> to vector<2x32xf32>
    %184 = arith.mulf %181, %170 : vector<2x32xf32>
    %185 = arith.mulf %180, %182 : vector<2x32xf32>
    %186 = arith.addf %184, %185 : vector<2x32xf32>
    %187 = math.tanh %186 : vector<2x32xf32>
    %188 = arith.mulf %183, %187 : vector<2x32xf32>
    %c0_45 = arith.constant 0 : index
    %c0_46 = arith.constant 0 : index
    %c0_47 = arith.constant 0 : index
    %189 = vector.load %arg18[%c0_45, %c0_46, %c0_47] : memref<6x2x32xf32, #tpu.memory_space<vmem>>, vector<1x2x32xf32>
    %190 = vector.shape_cast %189 : vector<1x2x32xf32> to vector<2x32xf32>
    %191 = vector.shape_cast %188 : vector<2x32xf32> to vector<1x2x32xf32>
    tpu.vector_store %arg18[%c0_45, %c0_46, %c0_47], %191 {strides = array<i32>} : memref<6x2x32xf32, #tpu.memory_space<vmem>>, vector<1x2x32xf32>,
    %c3 = arith.constant 3 : index
    %c0_48 = arith.constant 0 : index
    %c0_49 = arith.constant 0 : index
    %192 = vector.load %arg18[%c3, %c0_48, %c0_49] : memref<6x2x32xf32, #tpu.memory_space<vmem>>, vector<1x2x32xf32>
    %193 = vector.shape_cast %192 : vector<1x2x32xf32> to vector<2x32xf32>
    %194 = vector.shape_cast %186 : vector<2x32xf32> to vector<1x2x32xf32>
    tpu.vector_store %arg18[%c3, %c0_48, %c0_49], %194 {strides = array<i32>} : memref<6x2x32xf32, #tpu.memory_space<vmem>>, vector<1x2x32xf32>,
    %c1 = arith.constant 1 : index
    %c0_50 = arith.constant 0 : index
    %c0_51 = arith.constant 0 : index
    %195 = vector.load %arg8[%c1, %c0_50, %c0_51] : memref<3x32x128xf32, #tpu.memory_space<vmem>>, vector<1x32x128xf32>
    %196 = vector.shape_cast %195 : vector<1x32x128xf32> to vector<32x128xf32>
    %c1_52 = arith.constant 1 : index
    %c0_53 = arith.constant 0 : index
    %c0_54 = arith.constant 0 : index
    %197 = vector.load %arg9[%c1_52, %c0_53, %c0_54] : memref<3x32x128xf32, #tpu.memory_space<vmem>>, vector<1x32x128xf32>
    %198 = vector.shape_cast %197 : vector<1x32x128xf32> to vector<32x128xf32>
    %c1_55 = arith.constant 1 : index
    %c0_56 = arith.constant 0 : index
    %c0_57 = arith.constant 0 : index
    %199 = vector.load %arg10[%c1_55, %c0_56, %c0_57] : memref<3x1x128xf32, #tpu.memory_space<vmem>>, vector<1x1x128xf32>
    %200 = vector.shape_cast %199 : vector<1x1x128xf32> to vector<1x128xf32>
    %cst_58 = arith.constant dense<0.000000e+00> : vector<2x128xf32>
    %201 = tpu.matmul %76, %196, %cst_58 {dimension_numbers = #tpu.dot_dimension_numbers<[1], [0], [0], [1], [0, 0, 1, 1], [], []>} : vector<2x32xf32>, vector<32x128xf32>, vector<2x128xf32> -> vector<2x128xf32>
    %202 = vector.broadcast %200 : vector<1x128xf32> to vector<2x128xf32>
    %203 = arith.addf %201, %202 : vector<2x128xf32>
    %cst_59 = arith.constant dense<0.000000e+00> : vector<2x128xf32>
    %204 = tpu.matmul %92, %196, %cst_59 {dimension_numbers = #tpu.dot_dimension_numbers<[1], [0], [0], [1], [0, 0, 1, 1], [], []>} : vector<2x32xf32>, vector<32x128xf32>, vector<2x128xf32> -> vector<2x128xf32>
    %205 = vector.broadcast %200 : vector<1x128xf32> to vector<2x128xf32>
    %206 = arith.addf %204, %205 : vector<2x128xf32>
    %cst_60 = arith.constant dense<0.000000e+00> : vector<2x128xf32>
    %207 = tpu.matmul %108, %196, %cst_60 {dimension_numbers = #tpu.dot_dimension_numbers<[1], [0], [0], [1], [0, 0, 1, 1], [], []>} : vector<2x32xf32>, vector<32x128xf32>, vector<2x128xf32> -> vector<2x128xf32>
    %208 = vector.broadcast %200 : vector<1x128xf32> to vector<2x128xf32>
    %209 = arith.addf %207, %208 : vector<2x128xf32>
    %cst_61 = arith.constant dense<0.000000e+00> : vector<2x128xf32>
    %210 = tpu.matmul %124, %196, %cst_61 {dimension_numbers = #tpu.dot_dimension_numbers<[1], [0], [0], [1], [0, 0, 1, 1], [], []>} : vector<2x32xf32>, vector<32x128xf32>, vector<2x128xf32> -> vector<2x128xf32>
    %211 = vector.broadcast %200 : vector<1x128xf32> to vector<2x128xf32>
    %212 = arith.addf %210, %211 : vector<2x128xf32>
    %cst_62 = arith.constant dense<0.000000e+00> : vector<2x128xf32>
    %213 = tpu.matmul %140, %196, %cst_62 {dimension_numbers = #tpu.dot_dimension_numbers<[1], [0], [0], [1], [0, 0, 1, 1], [], []>} : vector<2x32xf32>, vector<32x128xf32>, vector<2x128xf32> -> vector<2x128xf32>
    %214 = vector.broadcast %200 : vector<1x128xf32> to vector<2x128xf32>
    %215 = arith.addf %213, %214 : vector<2x128xf32>
    %cst_63 = arith.constant dense<0.000000e+00> : vector<2x128xf32>
    %216 = tpu.matmul %156, %196, %cst_63 {dimension_numbers = #tpu.dot_dimension_numbers<[1], [0], [0], [1], [0, 0, 1, 1], [], []>} : vector<2x32xf32>, vector<32x128xf32>, vector<2x128xf32> -> vector<2x128xf32>
    %217 = vector.broadcast %200 : vector<1x128xf32> to vector<2x128xf32>
    %218 = arith.addf %216, %217 : vector<2x128xf32>
    %cst_64 = arith.constant dense<0.000000e+00> : vector<2x128xf32>
    %219 = tpu.matmul %172, %196, %cst_64 {dimension_numbers = #tpu.dot_dimension_numbers<[1], [0], [0], [1], [0, 0, 1, 1], [], []>} : vector<2x32xf32>, vector<32x128xf32>, vector<2x128xf32> -> vector<2x128xf32>
    %220 = vector.broadcast %200 : vector<1x128xf32> to vector<2x128xf32>
    %221 = arith.addf %219, %220 : vector<2x128xf32>
    %cst_65 = arith.constant dense<0.000000e+00> : vector<2x128xf32>
    %222 = tpu.matmul %188, %196, %cst_65 {dimension_numbers = #tpu.dot_dimension_numbers<[1], [0], [0], [1], [0, 0, 1, 1], [], []>} : vector<2x32xf32>, vector<32x128xf32>, vector<2x128xf32> -> vector<2x128xf32>
    %223 = vector.broadcast %200 : vector<1x128xf32> to vector<2x128xf32>
    %224 = arith.addf %222, %223 : vector<2x128xf32>
    %cst_66 = arith.constant 0.000000e+00 : f32
    %225 = vector.broadcast %cst_66 : f32 to vector<2x32xf32>
    %cst_67 = arith.constant 0.000000e+00 : f32
    %226 = vector.broadcast %cst_67 : f32 to vector<2x32xf32>
    %cst_68 = arith.constant dense<0.000000e+00> : vector<2x128xf32>
    %227 = tpu.matmul %225, %198, %cst_68 {dimension_numbers = #tpu.dot_dimension_numbers<[1], [0], [0], [1], [0, 0, 1, 1], [], []>} : vector<2x32xf32>, vector<32x128xf32>, vector<2x128xf32> -> vector<2x128xf32>
    %228 = arith.addf %203, %227 : vector<2x128xf32>
    %229 = math.tanh %228 : vector<2x128xf32>
    %230 = vector.broadcast %38 : vector<1x128xf32> to vector<2x128xf32>
    %231 = arith.mulf %229, %230 : vector<2x128xf32>
    %232 = vector.broadcast %41 : vector<1x128xf32> to vector<2x128xf32>
    %233 = arith.addf %231, %232 : vector<2x128xf32>
    %234 = vector.extract_strided_slice %233 {offsets = [0, 0], sizes = [2, 32], strides = [1, 1]} : vector<2x128xf32> to vector<2x32xf32>
    %235 = vector.extract_strided_slice %233 {offsets = [0, 32], sizes = [2, 32], strides = [1, 1]} : vector<2x128xf32> to vector<2x32xf32>
    %236 = vector.extract_strided_slice %233 {offsets = [0, 64], sizes = [2, 32], strides = [1, 1]} : vector<2x128xf32> to vector<2x32xf32>
    %237 = vector.extract_strided_slice %233 {offsets = [0, 96], sizes = [2, 32], strides = [1, 1]} : vector<2x128xf32> to vector<2x32xf32>
    %238 = arith.mulf %235, %226 : vector<2x32xf32>
    %239 = arith.mulf %234, %236 : vector<2x32xf32>
    %240 = arith.addf %238, %239 : vector<2x32xf32>
    %241 = math.tanh %240 : vector<2x32xf32>
    %242 = arith.mulf %237, %241 : vector<2x32xf32>
    %cst_69 = arith.constant dense<0.000000e+00> : vector<2x128xf32>
    %243 = tpu.matmul %242, %198, %cst_69 {dimension_numbers = #tpu.dot_dimension_numbers<[1], [0], [0], [1], [0, 0, 1, 1], [], []>} : vector<2x32xf32>, vector<32x128xf32>, vector<2x128xf32> -> vector<2x128xf32>
    %244 = arith.addf %206, %243 : vector<2x128xf32>
    %245 = math.tanh %244 : vector<2x128xf32>
    %246 = vector.broadcast %38 : vector<1x128xf32> to vector<2x128xf32>
    %247 = arith.mulf %245, %246 : vector<2x128xf32>
    %248 = vector.broadcast %41 : vector<1x128xf32> to vector<2x128xf32>
    %249 = arith.addf %247, %248 : vector<2x128xf32>
    %250 = vector.extract_strided_slice %249 {offsets = [0, 0], sizes = [2, 32], strides = [1, 1]} : vector<2x128xf32> to vector<2x32xf32>
    %251 = vector.extract_strided_slice %249 {offsets = [0, 32], sizes = [2, 32], strides = [1, 1]} : vector<2x128xf32> to vector<2x32xf32>
    %252 = vector.extract_strided_slice %249 {offsets = [0, 64], sizes = [2, 32], strides = [1, 1]} : vector<2x128xf32> to vector<2x32xf32>
    %253 = vector.extract_strided_slice %249 {offsets = [0, 96], sizes = [2, 32], strides = [1, 1]} : vector<2x128xf32> to vector<2x32xf32>
    %254 = arith.mulf %251, %240 : vector<2x32xf32>
    %255 = arith.mulf %250, %252 : vector<2x32xf32>
    %256 = arith.addf %254, %255 : vector<2x32xf32>
    %257 = math.tanh %256 : vector<2x32xf32>
    %258 = arith.mulf %253, %257 : vector<2x32xf32>
    %cst_70 = arith.constant dense<0.000000e+00> : vector<2x128xf32>
    %259 = tpu.matmul %258, %198, %cst_70 {dimension_numbers = #tpu.dot_dimension_numbers<[1], [0], [0], [1], [0, 0, 1, 1], [], []>} : vector<2x32xf32>, vector<32x128xf32>, vector<2x128xf32> -> vector<2x128xf32>
    %260 = arith.addf %209, %259 : vector<2x128xf32>
    %261 = math.tanh %260 : vector<2x128xf32>
    %262 = vector.broadcast %38 : vector<1x128xf32> to vector<2x128xf32>
    %263 = arith.mulf %261, %262 : vector<2x128xf32>
    %264 = vector.broadcast %41 : vector<1x128xf32> to vector<2x128xf32>
    %265 = arith.addf %263, %264 : vector<2x128xf32>
    %266 = vector.extract_strided_slice %265 {offsets = [0, 0], sizes = [2, 32], strides = [1, 1]} : vector<2x128xf32> to vector<2x32xf32>
    %267 = vector.extract_strided_slice %265 {offsets = [0, 32], sizes = [2, 32], strides = [1, 1]} : vector<2x128xf32> to vector<2x32xf32>
    %268 = vector.extract_strided_slice %265 {offsets = [0, 64], sizes = [2, 32], strides = [1, 1]} : vector<2x128xf32> to vector<2x32xf32>
    %269 = vector.extract_strided_slice %265 {offsets = [0, 96], sizes = [2, 32], strides = [1, 1]} : vector<2x128xf32> to vector<2x32xf32>
    %270 = arith.mulf %267, %256 : vector<2x32xf32>
    %271 = arith.mulf %266, %268 : vector<2x32xf32>
    %272 = arith.addf %270, %271 : vector<2x32xf32>
    %273 = math.tanh %272 : vector<2x32xf32>
    %274 = arith.mulf %269, %273 : vector<2x32xf32>
    %cst_71 = arith.constant dense<0.000000e+00> : vector<2x128xf32>
    %275 = tpu.matmul %274, %198, %cst_71 {dimension_numbers = #tpu.dot_dimension_numbers<[1], [0], [0], [1], [0, 0, 1, 1], [], []>} : vector<2x32xf32>, vector<32x128xf32>, vector<2x128xf32> -> vector<2x128xf32>
    %276 = arith.addf %212, %275 : vector<2x128xf32>
    %277 = math.tanh %276 : vector<2x128xf32>
    %278 = vector.broadcast %38 : vector<1x128xf32> to vector<2x128xf32>
    %279 = arith.mulf %277, %278 : vector<2x128xf32>
    %280 = vector.broadcast %41 : vector<1x128xf32> to vector<2x128xf32>
    %281 = arith.addf %279, %280 : vector<2x128xf32>
    %282 = vector.extract_strided_slice %281 {offsets = [0, 0], sizes = [2, 32], strides = [1, 1]} : vector<2x128xf32> to vector<2x32xf32>
    %283 = vector.extract_strided_slice %281 {offsets = [0, 32], sizes = [2, 32], strides = [1, 1]} : vector<2x128xf32> to vector<2x32xf32>
    %284 = vector.extract_strided_slice %281 {offsets = [0, 64], sizes = [2, 32], strides = [1, 1]} : vector<2x128xf32> to vector<2x32xf32>
    %285 = vector.extract_strided_slice %281 {offsets = [0, 96], sizes = [2, 32], strides = [1, 1]} : vector<2x128xf32> to vector<2x32xf32>
    %286 = arith.mulf %283, %272 : vector<2x32xf32>
    %287 = arith.mulf %282, %284 : vector<2x32xf32>
    %288 = arith.addf %286, %287 : vector<2x32xf32>
    %289 = math.tanh %288 : vector<2x32xf32>
    %290 = arith.mulf %285, %289 : vector<2x32xf32>
    %cst_72 = arith.constant dense<0.000000e+00> : vector<2x128xf32>
    %291 = tpu.matmul %290, %198, %cst_72 {dimension_numbers = #tpu.dot_dimension_numbers<[1], [0], [0], [1], [0, 0, 1, 1], [], []>} : vector<2x32xf32>, vector<32x128xf32>, vector<2x128xf32> -> vector<2x128xf32>
    %292 = arith.addf %215, %291 : vector<2x128xf32>
    %293 = math.tanh %292 : vector<2x128xf32>
    %294 = vector.broadcast %38 : vector<1x128xf32> to vector<2x128xf32>
    %295 = arith.mulf %293, %294 : vector<2x128xf32>
    %296 = vector.broadcast %41 : vector<1x128xf32> to vector<2x128xf32>
    %297 = arith.addf %295, %296 : vector<2x128xf32>
    %298 = vector.extract_strided_slice %297 {offsets = [0, 0], sizes = [2, 32], strides = [1, 1]} : vector<2x128xf32> to vector<2x32xf32>
    %299 = vector.extract_strided_slice %297 {offsets = [0, 32], sizes = [2, 32], strides = [1, 1]} : vector<2x128xf32> to vector<2x32xf32>
    %300 = vector.extract_strided_slice %297 {offsets = [0, 64], sizes = [2, 32], strides = [1, 1]} : vector<2x128xf32> to vector<2x32xf32>
    %301 = vector.extract_strided_slice %297 {offsets = [0, 96], sizes = [2, 32], strides = [1, 1]} : vector<2x128xf32> to vector<2x32xf32>
    %302 = arith.mulf %299, %288 : vector<2x32xf32>
    %303 = arith.mulf %298, %300 : vector<2x32xf32>
    %304 = arith.addf %302, %303 : vector<2x32xf32>
    %305 = math.tanh %304 : vector<2x32xf32>
    %306 = arith.mulf %301, %305 : vector<2x32xf32>
    %cst_73 = arith.constant dense<0.000000e+00> : vector<2x128xf32>
    %307 = tpu.matmul %306, %198, %cst_73 {dimension_numbers = #tpu.dot_dimension_numbers<[1], [0], [0], [1], [0, 0, 1, 1], [], []>} : vector<2x32xf32>, vector<32x128xf32>, vector<2x128xf32> -> vector<2x128xf32>
    %308 = arith.addf %218, %307 : vector<2x128xf32>
    %309 = math.tanh %308 : vector<2x128xf32>
    %310 = vector.broadcast %38 : vector<1x128xf32> to vector<2x128xf32>
    %311 = arith.mulf %309, %310 : vector<2x128xf32>
    %312 = vector.broadcast %41 : vector<1x128xf32> to vector<2x128xf32>
    %313 = arith.addf %311, %312 : vector<2x128xf32>
    %314 = vector.extract_strided_slice %313 {offsets = [0, 0], sizes = [2, 32], strides = [1, 1]} : vector<2x128xf32> to vector<2x32xf32>
    %315 = vector.extract_strided_slice %313 {offsets = [0, 32], sizes = [2, 32], strides = [1, 1]} : vector<2x128xf32> to vector<2x32xf32>
    %316 = vector.extract_strided_slice %313 {offsets = [0, 64], sizes = [2, 32], strides = [1, 1]} : vector<2x128xf32> to vector<2x32xf32>
    %317 = vector.extract_strided_slice %313 {offsets = [0, 96], sizes = [2, 32], strides = [1, 1]} : vector<2x128xf32> to vector<2x32xf32>
    %318 = arith.mulf %315, %304 : vector<2x32xf32>
    %319 = arith.mulf %314, %316 : vector<2x32xf32>
    %320 = arith.addf %318, %319 : vector<2x32xf32>
    %321 = math.tanh %320 : vector<2x32xf32>
    %322 = arith.mulf %317, %321 : vector<2x32xf32>
    %cst_74 = arith.constant dense<0.000000e+00> : vector<2x128xf32>
    %323 = tpu.matmul %322, %198, %cst_74 {dimension_numbers = #tpu.dot_dimension_numbers<[1], [0], [0], [1], [0, 0, 1, 1], [], []>} : vector<2x32xf32>, vector<32x128xf32>, vector<2x128xf32> -> vector<2x128xf32>
    %324 = arith.addf %221, %323 : vector<2x128xf32>
    %325 = math.tanh %324 : vector<2x128xf32>
    %326 = vector.broadcast %38 : vector<1x128xf32> to vector<2x128xf32>
    %327 = arith.mulf %325, %326 : vector<2x128xf32>
    %328 = vector.broadcast %41 : vector<1x128xf32> to vector<2x128xf32>
    %329 = arith.addf %327, %328 : vector<2x128xf32>
    %330 = vector.extract_strided_slice %329 {offsets = [0, 0], sizes = [2, 32], strides = [1, 1]} : vector<2x128xf32> to vector<2x32xf32>
    %331 = vector.extract_strided_slice %329 {offsets = [0, 32], sizes = [2, 32], strides = [1, 1]} : vector<2x128xf32> to vector<2x32xf32>
    %332 = vector.extract_strided_slice %329 {offsets = [0, 64], sizes = [2, 32], strides = [1, 1]} : vector<2x128xf32> to vector<2x32xf32>
    %333 = vector.extract_strided_slice %329 {offsets = [0, 96], sizes = [2, 32], strides = [1, 1]} : vector<2x128xf32> to vector<2x32xf32>
    %334 = arith.mulf %331, %320 : vector<2x32xf32>
    %335 = arith.mulf %330, %332 : vector<2x32xf32>
    %336 = arith.addf %334, %335 : vector<2x32xf32>
    %337 = math.tanh %336 : vector<2x32xf32>
    %338 = arith.mulf %333, %337 : vector<2x32xf32>
    %cst_75 = arith.constant dense<0.000000e+00> : vector<2x128xf32>
    %339 = tpu.matmul %338, %198, %cst_75 {dimension_numbers = #tpu.dot_dimension_numbers<[1], [0], [0], [1], [0, 0, 1, 1], [], []>} : vector<2x32xf32>, vector<32x128xf32>, vector<2x128xf32> -> vector<2x128xf32>
    %340 = arith.addf %224, %339 : vector<2x128xf32>
    %341 = math.tanh %340 : vector<2x128xf32>
    %342 = vector.broadcast %38 : vector<1x128xf32> to vector<2x128xf32>
    %343 = arith.mulf %341, %342 : vector<2x128xf32>
    %344 = vector.broadcast %41 : vector<1x128xf32> to vector<2x128xf32>
    %345 = arith.addf %343, %344 : vector<2x128xf32>
    %346 = vector.extract_strided_slice %345 {offsets = [0, 0], sizes = [2, 32], strides = [1, 1]} : vector<2x128xf32> to vector<2x32xf32>
    %347 = vector.extract_strided_slice %345 {offsets = [0, 32], sizes = [2, 32], strides = [1, 1]} : vector<2x128xf32> to vector<2x32xf32>
    %348 = vector.extract_strided_slice %345 {offsets = [0, 64], sizes = [2, 32], strides = [1, 1]} : vector<2x128xf32> to vector<2x32xf32>
    %349 = vector.extract_strided_slice %345 {offsets = [0, 96], sizes = [2, 32], strides = [1, 1]} : vector<2x128xf32> to vector<2x32xf32>
    %350 = arith.mulf %347, %336 : vector<2x32xf32>
    %351 = arith.mulf %346, %348 : vector<2x32xf32>
    %352 = arith.addf %350, %351 : vector<2x32xf32>
    %353 = math.tanh %352 : vector<2x32xf32>
    %354 = arith.mulf %349, %353 : vector<2x32xf32>
    %c1_76 = arith.constant 1 : index
    %c0_77 = arith.constant 0 : index
    %c0_78 = arith.constant 0 : index
    %355 = vector.load %arg18[%c1_76, %c0_77, %c0_78] : memref<6x2x32xf32, #tpu.memory_space<vmem>>, vector<1x2x32xf32>
    %356 = vector.shape_cast %355 : vector<1x2x32xf32> to vector<2x32xf32>
    %357 = vector.shape_cast %354 : vector<2x32xf32> to vector<1x2x32xf32>
    tpu.vector_store %arg18[%c1_76, %c0_77, %c0_78], %357 {strides = array<i32>} : memref<6x2x32xf32, #tpu.memory_space<vmem>>, vector<1x2x32xf32>,
    %c4 = arith.constant 4 : index
    %c0_79 = arith.constant 0 : index
    %c0_80 = arith.constant 0 : index
    %358 = vector.load %arg18[%c4, %c0_79, %c0_80] : memref<6x2x32xf32, #tpu.memory_space<vmem>>, vector<1x2x32xf32>
    %359 = vector.shape_cast %358 : vector<1x2x32xf32> to vector<2x32xf32>
    %360 = vector.shape_cast %352 : vector<2x32xf32> to vector<1x2x32xf32>
    tpu.vector_store %arg18[%c4, %c0_79, %c0_80], %360 {strides = array<i32>} : memref<6x2x32xf32, #tpu.memory_space<vmem>>, vector<1x2x32xf32>,
    %c2 = arith.constant 2 : index
    %c0_81 = arith.constant 0 : index
    %c0_82 = arith.constant 0 : index
    %361 = vector.load %arg8[%c2, %c0_81, %c0_82] : memref<3x32x128xf32, #tpu.memory_space<vmem>>, vector<1x32x128xf32>
    %362 = vector.shape_cast %361 : vector<1x32x128xf32> to vector<32x128xf32>
    %c2_83 = arith.constant 2 : index
    %c0_84 = arith.constant 0 : index
    %c0_85 = arith.constant 0 : index
    %363 = vector.load %arg9[%c2_83, %c0_84, %c0_85] : memref<3x32x128xf32, #tpu.memory_space<vmem>>, vector<1x32x128xf32>
    %364 = vector.shape_cast %363 : vector<1x32x128xf32> to vector<32x128xf32>
    %c2_86 = arith.constant 2 : index
    %c0_87 = arith.constant 0 : index
    %c0_88 = arith.constant 0 : index
    %365 = vector.load %arg10[%c2_86, %c0_87, %c0_88] : memref<3x1x128xf32, #tpu.memory_space<vmem>>, vector<1x1x128xf32>
    %366 = vector.shape_cast %365 : vector<1x1x128xf32> to vector<1x128xf32>
    %cst_89 = arith.constant dense<0.000000e+00> : vector<2x128xf32>
    %367 = tpu.matmul %242, %362, %cst_89 {dimension_numbers = #tpu.dot_dimension_numbers<[1], [0], [0], [1], [0, 0, 1, 1], [], []>} : vector<2x32xf32>, vector<32x128xf32>, vector<2x128xf32> -> vector<2x128xf32>
    %368 = vector.broadcast %366 : vector<1x128xf32> to vector<2x128xf32>
    %369 = arith.addf %367, %368 : vector<2x128xf32>
    %cst_90 = arith.constant dense<0.000000e+00> : vector<2x128xf32>
    %370 = tpu.matmul %258, %362, %cst_90 {dimension_numbers = #tpu.dot_dimension_numbers<[1], [0], [0], [1], [0, 0, 1, 1], [], []>} : vector<2x32xf32>, vector<32x128xf32>, vector<2x128xf32> -> vector<2x128xf32>
    %371 = vector.broadcast %366 : vector<1x128xf32> to vector<2x128xf32>
    %372 = arith.addf %370, %371 : vector<2x128xf32>
    %cst_91 = arith.constant dense<0.000000e+00> : vector<2x128xf32>
    %373 = tpu.matmul %274, %362, %cst_91 {dimension_numbers = #tpu.dot_dimension_numbers<[1], [0], [0], [1], [0, 0, 1, 1], [], []>} : vector<2x32xf32>, vector<32x128xf32>, vector<2x128xf32> -> vector<2x128xf32>
    %374 = vector.broadcast %366 : vector<1x128xf32> to vector<2x128xf32>
    %375 = arith.addf %373, %374 : vector<2x128xf32>
    %cst_92 = arith.constant dense<0.000000e+00> : vector<2x128xf32>
    %376 = tpu.matmul %290, %362, %cst_92 {dimension_numbers = #tpu.dot_dimension_numbers<[1], [0], [0], [1], [0, 0, 1, 1], [], []>} : vector<2x32xf32>, vector<32x128xf32>, vector<2x128xf32> -> vector<2x128xf32>
    %377 = vector.broadcast %366 : vector<1x128xf32> to vector<2x128xf32>
    %378 = arith.addf %376, %377 : vector<2x128xf32>
    %cst_93 = arith.constant dense<0.000000e+00> : vector<2x128xf32>
    %379 = tpu.matmul %306, %362, %cst_93 {dimension_numbers = #tpu.dot_dimension_numbers<[1], [0], [0], [1], [0, 0, 1, 1], [], []>} : vector<2x32xf32>, vector<32x128xf32>, vector<2x128xf32> -> vector<2x128xf32>
    %380 = vector.broadcast %366 : vector<1x128xf32> to vector<2x128xf32>
    %381 = arith.addf %379, %380 : vector<2x128xf32>
    %cst_94 = arith.constant dense<0.000000e+00> : vector<2x128xf32>
    %382 = tpu.matmul %322, %362, %cst_94 {dimension_numbers = #tpu.dot_dimension_numbers<[1], [0], [0], [1], [0, 0, 1, 1], [], []>} : vector<2x32xf32>, vector<32x128xf32>, vector<2x128xf32> -> vector<2x128xf32>
    %383 = vector.broadcast %366 : vector<1x128xf32> to vector<2x128xf32>
    %384 = arith.addf %382, %383 : vector<2x128xf32>
    %cst_95 = arith.constant dense<0.000000e+00> : vector<2x128xf32>
    %385 = tpu.matmul %338, %362, %cst_95 {dimension_numbers = #tpu.dot_dimension_numbers<[1], [0], [0], [1], [0, 0, 1, 1], [], []>} : vector<2x32xf32>, vector<32x128xf32>, vector<2x128xf32> -> vector<2x128xf32>
    %386 = vector.broadcast %366 : vector<1x128xf32> to vector<2x128xf32>
    %387 = arith.addf %385, %386 : vector<2x128xf32>
    %cst_96 = arith.constant dense<0.000000e+00> : vector<2x128xf32>
    %388 = tpu.matmul %354, %362, %cst_96 {dimension_numbers = #tpu.dot_dimension_numbers<[1], [0], [0], [1], [0, 0, 1, 1], [], []>} : vector<2x32xf32>, vector<32x128xf32>, vector<2x128xf32> -> vector<2x128xf32>
    %389 = vector.broadcast %366 : vector<1x128xf32> to vector<2x128xf32>
    %390 = arith.addf %388, %389 : vector<2x128xf32>
    %cst_97 = arith.constant 0.000000e+00 : f32
    %391 = vector.broadcast %cst_97 : f32 to vector<2x32xf32>
    %cst_98 = arith.constant 0.000000e+00 : f32
    %392 = vector.broadcast %cst_98 : f32 to vector<2x32xf32>
    %cst_99 = arith.constant dense<0.000000e+00> : vector<2x128xf32>
    %393 = tpu.matmul %391, %364, %cst_99 {dimension_numbers = #tpu.dot_dimension_numbers<[1], [0], [0], [1], [0, 0, 1, 1], [], []>} : vector<2x32xf32>, vector<32x128xf32>, vector<2x128xf32> -> vector<2x128xf32>
    %394 = arith.addf %369, %393 : vector<2x128xf32>
    %395 = math.tanh %394 : vector<2x128xf32>
    %396 = vector.broadcast %38 : vector<1x128xf32> to vector<2x128xf32>
    %397 = arith.mulf %395, %396 : vector<2x128xf32>
    %398 = vector.broadcast %41 : vector<1x128xf32> to vector<2x128xf32>
    %399 = arith.addf %397, %398 : vector<2x128xf32>
    %400 = vector.extract_strided_slice %399 {offsets = [0, 0], sizes = [2, 32], strides = [1, 1]} : vector<2x128xf32> to vector<2x32xf32>
    %401 = vector.extract_strided_slice %399 {offsets = [0, 32], sizes = [2, 32], strides = [1, 1]} : vector<2x128xf32> to vector<2x32xf32>
    %402 = vector.extract_strided_slice %399 {offsets = [0, 64], sizes = [2, 32], strides = [1, 1]} : vector<2x128xf32> to vector<2x32xf32>
    %403 = vector.extract_strided_slice %399 {offsets = [0, 96], sizes = [2, 32], strides = [1, 1]} : vector<2x128xf32> to vector<2x32xf32>
    %404 = arith.mulf %401, %392 : vector<2x32xf32>
    %405 = arith.mulf %400, %402 : vector<2x32xf32>
    %406 = arith.addf %404, %405 : vector<2x32xf32>
    %407 = math.tanh %406 : vector<2x32xf32>
    %408 = arith.mulf %403, %407 : vector<2x32xf32>
    %cst_100 = arith.constant dense<0.000000e+00> : vector<2x128xf32>
    %409 = tpu.matmul %408, %364, %cst_100 {dimension_numbers = #tpu.dot_dimension_numbers<[1], [0], [0], [1], [0, 0, 1, 1], [], []>} : vector<2x32xf32>, vector<32x128xf32>, vector<2x128xf32> -> vector<2x128xf32>
    %410 = arith.addf %372, %409 : vector<2x128xf32>
    %411 = math.tanh %410 : vector<2x128xf32>
    %412 = vector.broadcast %38 : vector<1x128xf32> to vector<2x128xf32>
    %413 = arith.mulf %411, %412 : vector<2x128xf32>
    %414 = vector.broadcast %41 : vector<1x128xf32> to vector<2x128xf32>
    %415 = arith.addf %413, %414 : vector<2x128xf32>
    %416 = vector.extract_strided_slice %415 {offsets = [0, 0], sizes = [2, 32], strides = [1, 1]} : vector<2x128xf32> to vector<2x32xf32>
    %417 = vector.extract_strided_slice %415 {offsets = [0, 32], sizes = [2, 32], strides = [1, 1]} : vector<2x128xf32> to vector<2x32xf32>
    %418 = vector.extract_strided_slice %415 {offsets = [0, 64], sizes = [2, 32], strides = [1, 1]} : vector<2x128xf32> to vector<2x32xf32>
    %419 = vector.extract_strided_slice %415 {offsets = [0, 96], sizes = [2, 32], strides = [1, 1]} : vector<2x128xf32> to vector<2x32xf32>
    %420 = arith.mulf %417, %406 : vector<2x32xf32>
    %421 = arith.mulf %416, %418 : vector<2x32xf32>
    %422 = arith.addf %420, %421 : vector<2x32xf32>
    %423 = math.tanh %422 : vector<2x32xf32>
    %424 = arith.mulf %419, %423 : vector<2x32xf32>
    %cst_101 = arith.constant dense<0.000000e+00> : vector<2x128xf32>
    %425 = tpu.matmul %424, %364, %cst_101 {dimension_numbers = #tpu.dot_dimension_numbers<[1], [0], [0], [1], [0, 0, 1, 1], [], []>} : vector<2x32xf32>, vector<32x128xf32>, vector<2x128xf32> -> vector<2x128xf32>
    %426 = arith.addf %375, %425 : vector<2x128xf32>
    %427 = math.tanh %426 : vector<2x128xf32>
    %428 = vector.broadcast %38 : vector<1x128xf32> to vector<2x128xf32>
    %429 = arith.mulf %427, %428 : vector<2x128xf32>
    %430 = vector.broadcast %41 : vector<1x128xf32> to vector<2x128xf32>
    %431 = arith.addf %429, %430 : vector<2x128xf32>
    %432 = vector.extract_strided_slice %431 {offsets = [0, 0], sizes = [2, 32], strides = [1, 1]} : vector<2x128xf32> to vector<2x32xf32>
    %433 = vector.extract_strided_slice %431 {offsets = [0, 32], sizes = [2, 32], strides = [1, 1]} : vector<2x128xf32> to vector<2x32xf32>
    %434 = vector.extract_strided_slice %431 {offsets = [0, 64], sizes = [2, 32], strides = [1, 1]} : vector<2x128xf32> to vector<2x32xf32>
    %435 = vector.extract_strided_slice %431 {offsets = [0, 96], sizes = [2, 32], strides = [1, 1]} : vector<2x128xf32> to vector<2x32xf32>
    %436 = arith.mulf %433, %422 : vector<2x32xf32>
    %437 = arith.mulf %432, %434 : vector<2x32xf32>
    %438 = arith.addf %436, %437 : vector<2x32xf32>
    %439 = math.tanh %438 : vector<2x32xf32>
    %440 = arith.mulf %435, %439 : vector<2x32xf32>
    %cst_102 = arith.constant dense<0.000000e+00> : vector<2x128xf32>
    %441 = tpu.matmul %440, %364, %cst_102 {dimension_numbers = #tpu.dot_dimension_numbers<[1], [0], [0], [1], [0, 0, 1, 1], [], []>} : vector<2x32xf32>, vector<32x128xf32>, vector<2x128xf32> -> vector<2x128xf32>
    %442 = arith.addf %378, %441 : vector<2x128xf32>
    %443 = math.tanh %442 : vector<2x128xf32>
    %444 = vector.broadcast %38 : vector<1x128xf32> to vector<2x128xf32>
    %445 = arith.mulf %443, %444 : vector<2x128xf32>
    %446 = vector.broadcast %41 : vector<1x128xf32> to vector<2x128xf32>
    %447 = arith.addf %445, %446 : vector<2x128xf32>
    %448 = vector.extract_strided_slice %447 {offsets = [0, 0], sizes = [2, 32], strides = [1, 1]} : vector<2x128xf32> to vector<2x32xf32>
    %449 = vector.extract_strided_slice %447 {offsets = [0, 32], sizes = [2, 32], strides = [1, 1]} : vector<2x128xf32> to vector<2x32xf32>
    %450 = vector.extract_strided_slice %447 {offsets = [0, 64], sizes = [2, 32], strides = [1, 1]} : vector<2x128xf32> to vector<2x32xf32>
    %451 = vector.extract_strided_slice %447 {offsets = [0, 96], sizes = [2, 32], strides = [1, 1]} : vector<2x128xf32> to vector<2x32xf32>
    %452 = arith.mulf %449, %438 : vector<2x32xf32>
    %453 = arith.mulf %448, %450 : vector<2x32xf32>
    %454 = arith.addf %452, %453 : vector<2x32xf32>
    %455 = math.tanh %454 : vector<2x32xf32>
    %456 = arith.mulf %451, %455 : vector<2x32xf32>
    %cst_103 = arith.constant dense<0.000000e+00> : vector<2x128xf32>
    %457 = tpu.matmul %456, %364, %cst_103 {dimension_numbers = #tpu.dot_dimension_numbers<[1], [0], [0], [1], [0, 0, 1, 1], [], []>} : vector<2x32xf32>, vector<32x128xf32>, vector<2x128xf32> -> vector<2x128xf32>
    %458 = arith.addf %381, %457 : vector<2x128xf32>
    %459 = math.tanh %458 : vector<2x128xf32>
    %460 = vector.broadcast %38 : vector<1x128xf32> to vector<2x128xf32>
    %461 = arith.mulf %459, %460 : vector<2x128xf32>
    %462 = vector.broadcast %41 : vector<1x128xf32> to vector<2x128xf32>
    %463 = arith.addf %461, %462 : vector<2x128xf32>
    %464 = vector.extract_strided_slice %463 {offsets = [0, 0], sizes = [2, 32], strides = [1, 1]} : vector<2x128xf32> to vector<2x32xf32>
    %465 = vector.extract_strided_slice %463 {offsets = [0, 32], sizes = [2, 32], strides = [1, 1]} : vector<2x128xf32> to vector<2x32xf32>
    %466 = vector.extract_strided_slice %463 {offsets = [0, 64], sizes = [2, 32], strides = [1, 1]} : vector<2x128xf32> to vector<2x32xf32>
    %467 = vector.extract_strided_slice %463 {offsets = [0, 96], sizes = [2, 32], strides = [1, 1]} : vector<2x128xf32> to vector<2x32xf32>
    %468 = arith.mulf %465, %454 : vector<2x32xf32>
    %469 = arith.mulf %464, %466 : vector<2x32xf32>
    %470 = arith.addf %468, %469 : vector<2x32xf32>
    %471 = math.tanh %470 : vector<2x32xf32>
    %472 = arith.mulf %467, %471 : vector<2x32xf32>
    %cst_104 = arith.constant dense<0.000000e+00> : vector<2x128xf32>
    %473 = tpu.matmul %472, %364, %cst_104 {dimension_numbers = #tpu.dot_dimension_numbers<[1], [0], [0], [1], [0, 0, 1, 1], [], []>} : vector<2x32xf32>, vector<32x128xf32>, vector<2x128xf32> -> vector<2x128xf32>
    %474 = arith.addf %384, %473 : vector<2x128xf32>
    %475 = math.tanh %474 : vector<2x128xf32>
    %476 = vector.broadcast %38 : vector<1x128xf32> to vector<2x128xf32>
    %477 = arith.mulf %475, %476 : vector<2x128xf32>
    %478 = vector.broadcast %41 : vector<1x128xf32> to vector<2x128xf32>
    %479 = arith.addf %477, %478 : vector<2x128xf32>
    %480 = vector.extract_strided_slice %479 {offsets = [0, 0], sizes = [2, 32], strides = [1, 1]} : vector<2x128xf32> to vector<2x32xf32>
    %481 = vector.extract_strided_slice %479 {offsets = [0, 32], sizes = [2, 32], strides = [1, 1]} : vector<2x128xf32> to vector<2x32xf32>
    %482 = vector.extract_strided_slice %479 {offsets = [0, 64], sizes = [2, 32], strides = [1, 1]} : vector<2x128xf32> to vector<2x32xf32>
    %483 = vector.extract_strided_slice %479 {offsets = [0, 96], sizes = [2, 32], strides = [1, 1]} : vector<2x128xf32> to vector<2x32xf32>
    %484 = arith.mulf %481, %470 : vector<2x32xf32>
    %485 = arith.mulf %480, %482 : vector<2x32xf32>
    %486 = arith.addf %484, %485 : vector<2x32xf32>
    %487 = math.tanh %486 : vector<2x32xf32>
    %488 = arith.mulf %483, %487 : vector<2x32xf32>
    %cst_105 = arith.constant dense<0.000000e+00> : vector<2x128xf32>
    %489 = tpu.matmul %488, %364, %cst_105 {dimension_numbers = #tpu.dot_dimension_numbers<[1], [0], [0], [1], [0, 0, 1, 1], [], []>} : vector<2x32xf32>, vector<32x128xf32>, vector<2x128xf32> -> vector<2x128xf32>
    %490 = arith.addf %387, %489 : vector<2x128xf32>
    %491 = math.tanh %490 : vector<2x128xf32>
    %492 = vector.broadcast %38 : vector<1x128xf32> to vector<2x128xf32>
    %493 = arith.mulf %491, %492 : vector<2x128xf32>
    %494 = vector.broadcast %41 : vector<1x128xf32> to vector<2x128xf32>
    %495 = arith.addf %493, %494 : vector<2x128xf32>
    %496 = vector.extract_strided_slice %495 {offsets = [0, 0], sizes = [2, 32], strides = [1, 1]} : vector<2x128xf32> to vector<2x32xf32>
    %497 = vector.extract_strided_slice %495 {offsets = [0, 32], sizes = [2, 32], strides = [1, 1]} : vector<2x128xf32> to vector<2x32xf32>
    %498 = vector.extract_strided_slice %495 {offsets = [0, 64], sizes = [2, 32], strides = [1, 1]} : vector<2x128xf32> to vector<2x32xf32>
    %499 = vector.extract_strided_slice %495 {offsets = [0, 96], sizes = [2, 32], strides = [1, 1]} : vector<2x128xf32> to vector<2x32xf32>
    %500 = arith.mulf %497, %486 : vector<2x32xf32>
    %501 = arith.mulf %496, %498 : vector<2x32xf32>
    %502 = arith.addf %500, %501 : vector<2x32xf32>
    %503 = math.tanh %502 : vector<2x32xf32>
    %504 = arith.mulf %499, %503 : vector<2x32xf32>
    %cst_106 = arith.constant dense<0.000000e+00> : vector<2x128xf32>
    %505 = tpu.matmul %504, %364, %cst_106 {dimension_numbers = #tpu.dot_dimension_numbers<[1], [0], [0], [1], [0, 0, 1, 1], [], []>} : vector<2x32xf32>, vector<32x128xf32>, vector<2x128xf32> -> vector<2x128xf32>
    %506 = arith.addf %390, %505 : vector<2x128xf32>
    %507 = math.tanh %506 : vector<2x128xf32>
    %508 = vector.broadcast %38 : vector<1x128xf32> to vector<2x128xf32>
    %509 = arith.mulf %507, %508 : vector<2x128xf32>
    %510 = vector.broadcast %41 : vector<1x128xf32> to vector<2x128xf32>
    %511 = arith.addf %509, %510 : vector<2x128xf32>
    %512 = vector.extract_strided_slice %511 {offsets = [0, 0], sizes = [2, 32], strides = [1, 1]} : vector<2x128xf32> to vector<2x32xf32>
    %513 = vector.extract_strided_slice %511 {offsets = [0, 32], sizes = [2, 32], strides = [1, 1]} : vector<2x128xf32> to vector<2x32xf32>
    %514 = vector.extract_strided_slice %511 {offsets = [0, 64], sizes = [2, 32], strides = [1, 1]} : vector<2x128xf32> to vector<2x32xf32>
    %515 = vector.extract_strided_slice %511 {offsets = [0, 96], sizes = [2, 32], strides = [1, 1]} : vector<2x128xf32> to vector<2x32xf32>
    %516 = arith.mulf %513, %502 : vector<2x32xf32>
    %517 = arith.mulf %512, %514 : vector<2x32xf32>
    %518 = arith.addf %516, %517 : vector<2x32xf32>
    %519 = math.tanh %518 : vector<2x32xf32>
    %520 = arith.mulf %515, %519 : vector<2x32xf32>
    %c2_107 = arith.constant 2 : index
    %c0_108 = arith.constant 0 : index
    %c0_109 = arith.constant 0 : index
    %521 = vector.load %arg18[%c2_107, %c0_108, %c0_109] : memref<6x2x32xf32, #tpu.memory_space<vmem>>, vector<1x2x32xf32>
    %522 = vector.shape_cast %521 : vector<1x2x32xf32> to vector<2x32xf32>
    %523 = vector.shape_cast %520 : vector<2x32xf32> to vector<1x2x32xf32>
    tpu.vector_store %arg18[%c2_107, %c0_108, %c0_109], %523 {strides = array<i32>} : memref<6x2x32xf32, #tpu.memory_space<vmem>>, vector<1x2x32xf32>,
    %c5 = arith.constant 5 : index
    %c0_110 = arith.constant 0 : index
    %c0_111 = arith.constant 0 : index
    %524 = vector.load %arg18[%c5, %c0_110, %c0_111] : memref<6x2x32xf32, #tpu.memory_space<vmem>>, vector<1x2x32xf32>
    %525 = vector.shape_cast %524 : vector<1x2x32xf32> to vector<2x32xf32>
    %526 = vector.shape_cast %518 : vector<2x32xf32> to vector<1x2x32xf32>
    tpu.vector_store %arg18[%c5, %c0_110, %c0_111], %526 {strides = array<i32>} : memref<6x2x32xf32, #tpu.memory_space<vmem>>, vector<1x2x32xf32>,
    %c0_112 = arith.constant 0 : index
    %c0_113 = arith.constant 0 : index
    %c0_114 = arith.constant 0 : index
    %527 = vector.load %arg11[%c0_112, %c0_113, %c0_114] : memref<4x32x32xf32, #tpu.memory_space<vmem>>, vector<1x32x32xf32>
    %528 = vector.shape_cast %527 : vector<1x32x32xf32> to vector<32x32xf32>
    %cst_115 = arith.constant dense<0.000000e+00> : vector<2x32xf32>
    %529 = tpu.matmul %520, %528, %cst_115 {dimension_numbers = #tpu.dot_dimension_numbers<[1], [0], [0], [1], [0, 0, 1, 1], [], []>} : vector<2x32xf32>, vector<32x32xf32>, vector<2x32xf32> -> vector<2x32xf32>
    %c0_116 = arith.constant 0 : index
    %c0_117 = arith.constant 0 : index
    %c0_118 = arith.constant 0 : index
    %530 = vector.load %arg12[%c0_116, %c0_117, %c0_118] : memref<4x1x32xf32, #tpu.memory_space<vmem>>, vector<1x1x32xf32>
    %531 = vector.shape_cast %530 : vector<1x1x32xf32> to vector<1x32xf32>
    %532 = vector.broadcast %531 : vector<1x32xf32> to vector<2x32xf32>
    %533 = arith.addf %529, %532 : vector<2x32xf32>
    %cst_119 = arith.constant 0.00999999977 : f32
    %534 = vector.broadcast %cst_119 : f32 to vector<2x32xf32>
    %535 = arith.mulf %534, %533 : vector<2x32xf32>
    %536 = arith.maximumf %533, %535 : vector<2x32xf32>
    %cst_120 = arith.constant dense<0.000000e+00> : vector<32xf32>
    %537 = vector.multi_reduction <add>, %536, %cst_120 [0] : vector<2x32xf32> to vector<32xf32>
    %538 = vector.shape_cast %537 : vector<32xf32> to vector<1x32xf32>
    %cst_121 = arith.constant 2.000000e+00 : f32
    %539 = vector.broadcast %cst_121 : f32 to vector<1x32xf32>
    %540 = arith.divf %538, %539 : vector<1x32xf32>
    %541 = vector.broadcast %540 : vector<1x32xf32> to vector<2x32xf32>
    %542 = arith.subf %536, %541 : vector<2x32xf32>
    %543 = arith.mulf %542, %542 : vector<2x32xf32>
    %cst_122 = arith.constant dense<0.000000e+00> : vector<32xf32>
    %544 = vector.multi_reduction <add>, %543, %cst_122 [0] : vector<2x32xf32> to vector<32xf32>
    %545 = vector.shape_cast %544 : vector<32xf32> to vector<1x32xf32>
    %cst_123 = arith.constant 2.000000e+00 : f32
    %546 = vector.broadcast %cst_123 : f32 to vector<1x32xf32>
    %547 = arith.divf %545, %546 : vector<1x32xf32>
    %548 = vector.broadcast %540 : vector<1x32xf32> to vector<2x32xf32>
    %549 = arith.subf %536, %548 : vector<2x32xf32>
    %cst_124 = arith.constant 9.99999974E-6 : f32
    %550 = vector.broadcast %cst_124 : f32 to vector<1x32xf32>
    %551 = arith.addf %547, %550 : vector<1x32xf32>
    %552 = math.rsqrt %551 : vector<1x32xf32>
    %553 = vector.broadcast %552 : vector<1x32xf32> to vector<2x32xf32>
    %554 = arith.mulf %549, %553 : vector<2x32xf32>
    %c0_125 = arith.constant 0 : index
    %c0_126 = arith.constant 0 : index
    %c0_127 = arith.constant 0 : index
    %555 = vector.load %arg13[%c0_125, %c0_126, %c0_127] : memref<4x1x32xf32, #tpu.memory_space<vmem>>, vector<1x1x32xf32>
    %556 = vector.shape_cast %555 : vector<1x1x32xf32> to vector<1x32xf32>
    %557 = vector.broadcast %556 : vector<1x32xf32> to vector<2x32xf32>
    %558 = arith.mulf %554, %557 : vector<2x32xf32>
    %c0_128 = arith.constant 0 : index
    %c0_129 = arith.constant 0 : index
    %c0_130 = arith.constant 0 : index
    %559 = vector.load %arg14[%c0_128, %c0_129, %c0_130] : memref<4x1x32xf32, #tpu.memory_space<vmem>>, vector<1x1x32xf32>
    %560 = vector.shape_cast %559 : vector<1x1x32xf32> to vector<1x32xf32>
    %561 = vector.broadcast %560 : vector<1x32xf32> to vector<2x32xf32>
    %562 = arith.addf %558, %561 : vector<2x32xf32>
    %c1_131 = arith.constant 1 : index
    %c0_132 = arith.constant 0 : index
    %c0_133 = arith.constant 0 : index
    %563 = vector.load %arg11[%c1_131, %c0_132, %c0_133] : memref<4x32x32xf32, #tpu.memory_space<vmem>>, vector<1x32x32xf32>
    %564 = vector.shape_cast %563 : vector<1x32x32xf32> to vector<32x32xf32>
    %cst_134 = arith.constant dense<0.000000e+00> : vector<2x32xf32>
    %565 = tpu.matmul %562, %564, %cst_134 {dimension_numbers = #tpu.dot_dimension_numbers<[1], [0], [0], [1], [0, 0, 1, 1], [], []>} : vector<2x32xf32>, vector<32x32xf32>, vector<2x32xf32> -> vector<2x32xf32>
    %c1_135 = arith.constant 1 : index
    %c0_136 = arith.constant 0 : index
    %c0_137 = arith.constant 0 : index
    %566 = vector.load %arg12[%c1_135, %c0_136, %c0_137] : memref<4x1x32xf32, #tpu.memory_space<vmem>>, vector<1x1x32xf32>
    %567 = vector.shape_cast %566 : vector<1x1x32xf32> to vector<1x32xf32>
    %568 = vector.broadcast %567 : vector<1x32xf32> to vector<2x32xf32>
    %569 = arith.addf %565, %568 : vector<2x32xf32>
    %cst_138 = arith.constant 0.00999999977 : f32
    %570 = vector.broadcast %cst_138 : f32 to vector<2x32xf32>
    %571 = arith.mulf %570, %569 : vector<2x32xf32>
    %572 = arith.maximumf %569, %571 : vector<2x32xf32>
    %cst_139 = arith.constant dense<0.000000e+00> : vector<32xf32>
    %573 = vector.multi_reduction <add>, %572, %cst_139 [0] : vector<2x32xf32> to vector<32xf32>
    %574 = vector.shape_cast %573 : vector<32xf32> to vector<1x32xf32>
    %cst_140 = arith.constant 2.000000e+00 : f32
    %575 = vector.broadcast %cst_140 : f32 to vector<1x32xf32>
    %576 = arith.divf %574, %575 : vector<1x32xf32>
    %577 = vector.broadcast %576 : vector<1x32xf32> to vector<2x32xf32>
    %578 = arith.subf %572, %577 : vector<2x32xf32>
    %579 = arith.mulf %578, %578 : vector<2x32xf32>
    %cst_141 = arith.constant dense<0.000000e+00> : vector<32xf32>
    %580 = vector.multi_reduction <add>, %579, %cst_141 [0] : vector<2x32xf32> to vector<32xf32>
    %581 = vector.shape_cast %580 : vector<32xf32> to vector<1x32xf32>
    %cst_142 = arith.constant 2.000000e+00 : f32
    %582 = vector.broadcast %cst_142 : f32 to vector<1x32xf32>
    %583 = arith.divf %581, %582 : vector<1x32xf32>
    %584 = vector.broadcast %576 : vector<1x32xf32> to vector<2x32xf32>
    %585 = arith.subf %572, %584 : vector<2x32xf32>
    %cst_143 = arith.constant 9.99999974E-6 : f32
    %586 = vector.broadcast %cst_143 : f32 to vector<1x32xf32>
    %587 = arith.addf %583, %586 : vector<1x32xf32>
    %588 = math.rsqrt %587 : vector<1x32xf32>
    %589 = vector.broadcast %588 : vector<1x32xf32> to vector<2x32xf32>
    %590 = arith.mulf %585, %589 : vector<2x32xf32>
    %c1_144 = arith.constant 1 : index
    %c0_145 = arith.constant 0 : index
    %c0_146 = arith.constant 0 : index
    %591 = vector.load %arg13[%c1_144, %c0_145, %c0_146] : memref<4x1x32xf32, #tpu.memory_space<vmem>>, vector<1x1x32xf32>
    %592 = vector.shape_cast %591 : vector<1x1x32xf32> to vector<1x32xf32>
    %593 = vector.broadcast %592 : vector<1x32xf32> to vector<2x32xf32>
    %594 = arith.mulf %590, %593 : vector<2x32xf32>
    %c1_147 = arith.constant 1 : index
    %c0_148 = arith.constant 0 : index
    %c0_149 = arith.constant 0 : index
    %595 = vector.load %arg14[%c1_147, %c0_148, %c0_149] : memref<4x1x32xf32, #tpu.memory_space<vmem>>, vector<1x1x32xf32>
    %596 = vector.shape_cast %595 : vector<1x1x32xf32> to vector<1x32xf32>
    %597 = vector.broadcast %596 : vector<1x32xf32> to vector<2x32xf32>
    %598 = arith.addf %594, %597 : vector<2x32xf32>
    %c2_150 = arith.constant 2 : index
    %c0_151 = arith.constant 0 : index
    %c0_152 = arith.constant 0 : index
    %599 = vector.load %arg11[%c2_150, %c0_151, %c0_152] : memref<4x32x32xf32, #tpu.memory_space<vmem>>, vector<1x32x32xf32>
    %600 = vector.shape_cast %599 : vector<1x32x32xf32> to vector<32x32xf32>
    %cst_153 = arith.constant dense<0.000000e+00> : vector<2x32xf32>
    %601 = tpu.matmul %598, %600, %cst_153 {dimension_numbers = #tpu.dot_dimension_numbers<[1], [0], [0], [1], [0, 0, 1, 1], [], []>} : vector<2x32xf32>, vector<32x32xf32>, vector<2x32xf32> -> vector<2x32xf32>
    %c2_154 = arith.constant 2 : index
    %c0_155 = arith.constant 0 : index
    %c0_156 = arith.constant 0 : index
    %602 = vector.load %arg12[%c2_154, %c0_155, %c0_156] : memref<4x1x32xf32, #tpu.memory_space<vmem>>, vector<1x1x32xf32>
    %603 = vector.shape_cast %602 : vector<1x1x32xf32> to vector<1x32xf32>
    %604 = vector.broadcast %603 : vector<1x32xf32> to vector<2x32xf32>
    %605 = arith.addf %601, %604 : vector<2x32xf32>
    %cst_157 = arith.constant 0.00999999977 : f32
    %606 = vector.broadcast %cst_157 : f32 to vector<2x32xf32>
    %607 = arith.mulf %606, %605 : vector<2x32xf32>
    %608 = arith.maximumf %605, %607 : vector<2x32xf32>
    %cst_158 = arith.constant dense<0.000000e+00> : vector<32xf32>
    %609 = vector.multi_reduction <add>, %608, %cst_158 [0] : vector<2x32xf32> to vector<32xf32>
    %610 = vector.shape_cast %609 : vector<32xf32> to vector<1x32xf32>
    %cst_159 = arith.constant 2.000000e+00 : f32
    %611 = vector.broadcast %cst_159 : f32 to vector<1x32xf32>
    %612 = arith.divf %610, %611 : vector<1x32xf32>
    %613 = vector.broadcast %612 : vector<1x32xf32> to vector<2x32xf32>
    %614 = arith.subf %608, %613 : vector<2x32xf32>
    %615 = arith.mulf %614, %614 : vector<2x32xf32>
    %cst_160 = arith.constant dense<0.000000e+00> : vector<32xf32>
    %616 = vector.multi_reduction <add>, %615, %cst_160 [0] : vector<2x32xf32> to vector<32xf32>
    %617 = vector.shape_cast %616 : vector<32xf32> to vector<1x32xf32>
    %cst_161 = arith.constant 2.000000e+00 : f32
    %618 = vector.broadcast %cst_161 : f32 to vector<1x32xf32>
    %619 = arith.divf %617, %618 : vector<1x32xf32>
    %620 = vector.broadcast %612 : vector<1x32xf32> to vector<2x32xf32>
    %621 = arith.subf %608, %620 : vector<2x32xf32>
    %cst_162 = arith.constant 9.99999974E-6 : f32
    %622 = vector.broadcast %cst_162 : f32 to vector<1x32xf32>
    %623 = arith.addf %619, %622 : vector<1x32xf32>
    %624 = math.rsqrt %623 : vector<1x32xf32>
    %625 = vector.broadcast %624 : vector<1x32xf32> to vector<2x32xf32>
    %626 = arith.mulf %621, %625 : vector<2x32xf32>
    %c2_163 = arith.constant 2 : index
    %c0_164 = arith.constant 0 : index
    %c0_165 = arith.constant 0 : index
    %627 = vector.load %arg13[%c2_163, %c0_164, %c0_165] : memref<4x1x32xf32, #tpu.memory_space<vmem>>, vector<1x1x32xf32>
    %628 = vector.shape_cast %627 : vector<1x1x32xf32> to vector<1x32xf32>
    %629 = vector.broadcast %628 : vector<1x32xf32> to vector<2x32xf32>
    %630 = arith.mulf %626, %629 : vector<2x32xf32>
    %c2_166 = arith.constant 2 : index
    %c0_167 = arith.constant 0 : index
    %c0_168 = arith.constant 0 : index
    %631 = vector.load %arg14[%c2_166, %c0_167, %c0_168] : memref<4x1x32xf32, #tpu.memory_space<vmem>>, vector<1x1x32xf32>
    %632 = vector.shape_cast %631 : vector<1x1x32xf32> to vector<1x32xf32>
    %633 = vector.broadcast %632 : vector<1x32xf32> to vector<2x32xf32>
    %634 = arith.addf %630, %633 : vector<2x32xf32>
    %c3_169 = arith.constant 3 : index
    %c0_170 = arith.constant 0 : index
    %c0_171 = arith.constant 0 : index
    %635 = vector.load %arg11[%c3_169, %c0_170, %c0_171] : memref<4x32x32xf32, #tpu.memory_space<vmem>>, vector<1x32x32xf32>
    %636 = vector.shape_cast %635 : vector<1x32x32xf32> to vector<32x32xf32>
    %cst_172 = arith.constant dense<0.000000e+00> : vector<2x32xf32>
    %637 = tpu.matmul %634, %636, %cst_172 {dimension_numbers = #tpu.dot_dimension_numbers<[1], [0], [0], [1], [0, 0, 1, 1], [], []>} : vector<2x32xf32>, vector<32x32xf32>, vector<2x32xf32> -> vector<2x32xf32>
    %c3_173 = arith.constant 3 : index
    %c0_174 = arith.constant 0 : index
    %c0_175 = arith.constant 0 : index
    %638 = vector.load %arg12[%c3_173, %c0_174, %c0_175] : memref<4x1x32xf32, #tpu.memory_space<vmem>>, vector<1x1x32xf32>
    %639 = vector.shape_cast %638 : vector<1x1x32xf32> to vector<1x32xf32>
    %640 = vector.broadcast %639 : vector<1x32xf32> to vector<2x32xf32>
    %641 = arith.addf %637, %640 : vector<2x32xf32>
    %cst_176 = arith.constant 0.00999999977 : f32
    %642 = vector.broadcast %cst_176 : f32 to vector<2x32xf32>
    %643 = arith.mulf %642, %641 : vector<2x32xf32>
    %644 = arith.maximumf %641, %643 : vector<2x32xf32>
    %cst_177 = arith.constant dense<0.000000e+00> : vector<32xf32>
    %645 = vector.multi_reduction <add>, %644, %cst_177 [0] : vector<2x32xf32> to vector<32xf32>
    %646 = vector.shape_cast %645 : vector<32xf32> to vector<1x32xf32>
    %cst_178 = arith.constant 2.000000e+00 : f32
    %647 = vector.broadcast %cst_178 : f32 to vector<1x32xf32>
    %648 = arith.divf %646, %647 : vector<1x32xf32>
    %649 = vector.broadcast %648 : vector<1x32xf32> to vector<2x32xf32>
    %650 = arith.subf %644, %649 : vector<2x32xf32>
    %651 = arith.mulf %650, %650 : vector<2x32xf32>
    %cst_179 = arith.constant dense<0.000000e+00> : vector<32xf32>
    %652 = vector.multi_reduction <add>, %651, %cst_179 [0] : vector<2x32xf32> to vector<32xf32>
    %653 = vector.shape_cast %652 : vector<32xf32> to vector<1x32xf32>
    %cst_180 = arith.constant 2.000000e+00 : f32
    %654 = vector.broadcast %cst_180 : f32 to vector<1x32xf32>
    %655 = arith.divf %653, %654 : vector<1x32xf32>
    %656 = vector.broadcast %648 : vector<1x32xf32> to vector<2x32xf32>
    %657 = arith.subf %644, %656 : vector<2x32xf32>
    %cst_181 = arith.constant 9.99999974E-6 : f32
    %658 = vector.broadcast %cst_181 : f32 to vector<1x32xf32>
    %659 = arith.addf %655, %658 : vector<1x32xf32>
    %660 = math.rsqrt %659 : vector<1x32xf32>
    %661 = vector.broadcast %660 : vector<1x32xf32> to vector<2x32xf32>
    %662 = arith.mulf %657, %661 : vector<2x32xf32>
    %c3_182 = arith.constant 3 : index
    %c0_183 = arith.constant 0 : index
    %c0_184 = arith.constant 0 : index
    %663 = vector.load %arg13[%c3_182, %c0_183, %c0_184] : memref<4x1x32xf32, #tpu.memory_space<vmem>>, vector<1x1x32xf32>
    %664 = vector.shape_cast %663 : vector<1x1x32xf32> to vector<1x32xf32>
    %665 = vector.broadcast %664 : vector<1x32xf32> to vector<2x32xf32>
    %666 = arith.mulf %662, %665 : vector<2x32xf32>
    %c3_185 = arith.constant 3 : index
    %c0_186 = arith.constant 0 : index
    %c0_187 = arith.constant 0 : index
    %667 = vector.load %arg14[%c3_185, %c0_186, %c0_187] : memref<4x1x32xf32, #tpu.memory_space<vmem>>, vector<1x1x32xf32>
    %668 = vector.shape_cast %667 : vector<1x1x32xf32> to vector<1x32xf32>
    %669 = vector.broadcast %668 : vector<1x32xf32> to vector<2x32xf32>
    %670 = arith.addf %666, %669 : vector<2x32xf32>
    %c0_188 = arith.constant 0 : index
    %c0_189 = arith.constant 0 : index
    %671 = vector.load %arg15[%c0_188, %c0_189] : memref<32x5xf32, #tpu.memory_space<vmem>>, vector<32x5xf32>
    %cst_190 = arith.constant dense<0.000000e+00> : vector<2x5xf32>
    %672 = tpu.matmul %670, %671, %cst_190 {dimension_numbers = #tpu.dot_dimension_numbers<[1], [0], [0], [1], [0, 0, 1, 1], [], []>} : vector<2x32xf32>, vector<32x5xf32>, vector<2x5xf32> -> vector<2x5xf32>
    %c0_191 = arith.constant 0 : index
    %c0_192 = arith.constant 0 : index
    %673 = vector.load %arg16[%c0_191, %c0_192] : memref<1x5xf32, #tpu.memory_space<vmem>>, vector<1x5xf32>
    %674 = vector.broadcast %673 : vector<1x5xf32> to vector<2x5xf32>
    %675 = arith.addf %672, %674 : vector<2x5xf32>
    %676 = vector.extract_strided_slice %675 {offsets = [0, 0], sizes = [2, 1], strides = [1, 1]} : vector<2x5xf32> to vector<2x1xf32>
    %677 = vector.extract_strided_slice %675 {offsets = [0, 1], sizes = [2, 4], strides = [1, 1]} : vector<2x5xf32> to vector<2x4xf32>
    %cst_193 = arith.constant dense<0.000000e+00> : vector<2xf32>
    %678 = vector.multi_reduction <add>, %677, %cst_193 [1] : vector<2x4xf32> to vector<2xf32>
    %679 = vector.shape_cast %678 : vector<2xf32> to vector<2x1xf32>
    %cst_194 = arith.constant 4.000000e+00 : f32
    %680 = vector.broadcast %cst_194 : f32 to vector<2x1xf32>
    %681 = arith.divf %679, %680 : vector<2x1xf32>
    %682 = vector.broadcast %681 : vector<2x1xf32> to vector<2x4xf32>
    %683 = arith.subf %677, %682 : vector<2x4xf32>
    %684 = vector.broadcast %676 : vector<2x1xf32> to vector<2x4xf32>
    %685 = arith.addf %684, %683 : vector<2x4xf32>
    %c0_195 = arith.constant 0 : index
    %c0_196 = arith.constant 0 : index
    %686 = vector.load %arg17[%c0_195, %c0_196] : memref<2x4xf32, #tpu.memory_space<vmem>>, vector<2x4xf32>
    tpu.vector_store %arg17[%c0_195, %c0_196], %685 {strides = array<i32>} : memref<2x4xf32, #tpu.memory_space<vmem>>, vector<2x4xf32>,
    return
  }
}

</mosaic_0001>

<bundles_post_ra>
// kernel: dqn_forward.1
= control target key start
LH: loop header
LB: loop body
LE: loop exit
PB: predicated region body
PF: predicated region fallthrough
CT: control target
= control target key end

     0   :  { %s6657_s0 = inlined_call_operand.vmem [shape: f32[16,143], index: 0, kind: input, shape index: {}]   ;;  %s6658_s1 = inlined_call_operand.vmem [shape: bf16[143,576], index: 1, kind: input, shape index: {}]   ;;  %s6659_s2 = inlined_call_operand.vmem [shape: f32[1,576], index: 2, kind: input, shape index: {}]   ;;  %s6660_s3 = inlined_call_operand.hbm [shape: bf16[576,512], index: 3, kind: input, shape index: {}]   ;;  %s6661_s4 = inlined_call_operand.vmem [shape: f32[1,512], index: 4, kind: input, shape index: {}]   ;;  %s6662_s5 = inlined_call_operand.vmem [shape: f32[143,32], index: 5, kind: input, shape index: {}]   ;;  %s6663_s6 = inlined_call_operand.vmem [shape: f32[512,32], index: 6, kind: input, shape index: {}]   ;;  %s6664_s7 = inlined_call_operand.vmem [shape: f32[1,32], index: 7, kind: input, shape index: {}]   ;;  %s6665_s8 = inlined_call_operand.vmem [shape: f32[3,32,128], index: 8, kind: input, shape index: {}]   ;;  %s6666_s9 = inlined_call_operand.vmem [shape: f32[3,32,128], index: 9, kind: input, shape index: {}]   ;;  %s6667_s10 = inlined_call_operand.vmem [shape: f32[3,1,128], index: 10, kind: input, shape index: {}]   ;;  %s6668_s11 = inlined_call_operand.vmem [shape: f32[4,32,32], index: 11, kind: input, shape index: {}]   ;;  %s6669_s12 = inlined_call_operand.vmem [shape: f32[4,1,32], index: 12, kind: input, shape index: {}]   ;;  %s6670_s13 = inlined_call_operand.vmem [shape: f32[4,1,32], index: 13, kind: input, shape index: {}]   ;;  %s6671_s14 = inlined_call_operand.vmem [shape: f32[4,1,32], index: 14, kind: input, shape index: {}]   ;;  %s6672_s15 = inlined_call_operand.vmem [shape: f32[32,5], index: 15, kind: input, shape index: {}]   ;;  %s6673_s16 = inlined_call_operand.vmem [shape: f32[1,5], index: 16, kind: input, shape index: {}]   ;;  %s6674_s17 = inlined_call_operand.hbm [shape: f32[2,4], index: 17, kind: output, shape index: {0}]   ;;  %s6675_s18 = inlined_call_operand.vmem [shape: f32[6,2,32], index: 18, kind: output, shape index: {1}]  }
   0x1   :  { %6678 = sst [smem:[#allocation8_spill]] %s6657_s0 }
   0x2   :  { %6679 = sst [smem:[#allocation9_spill]] %s6658_s1 }
   0x3   :  { %6680 = sst [smem:[#allocation10_spill]] %s6659_s2 }
   0x4   :  { %24 = vsyncpa [#allocation3], 0 }
   0x5   :  { %25 = vsyncpa [#allocation4], 0  ;;  %s36_s29 = sshll.u32 %s6660_s3, 4  ;;  %s5188_s30 = smov [#allocation2]   ;;  %s37_s29 = int_to_ptr.hbm [resolvable:$true] %s36_s29 }
   0x6   :  { %s38_s0 = sshll.u32 %s5188_s30, 4  ;;  %s5189_s19 = smov 256   ;;  %s39_s0 = int_to_ptr.vmem [resolvable:$true] %s38_s0 }
   0x7   :  { %s5190_s1 = smov 16  }
   0x8   :  { %44 = dma.hbm_to_vmem [thread:$0]  %s37_s29, 18432, %s39_s0, [#allocation3], %s5189_s19, %s5189_s19, %s5190_s1  }
   0x9   :  { %5184 = dma.done.wait [#allocation3], 18432  }
   0xa   :  { %5185 = vsyncadd [#allocation3], 4294948864  ;;  %vm381_vm0 = vcmask 1046528   ;;  %vm382_vm1 = vcmask 1047552   ;;  %v5191_v0 = vmov 65535   ;;  %s6681_s22 = sld [smem:[#allocation9_spill]] }
   0xb   :  { %v383_v1 = vsel %vm381_vm0, 4294967295, %v5191_v0  ;;  %s6682_s20 = sld [smem:[#allocation8_spill]]  ;;  %vm377_vm2 = vcmask 121856   ;;  %vm1439_vm3 = vcmask 523264   ;;  %vm1997_vm4 = vcmask 261120   ;;  %s5201_s28 = smov [#allocation5]  }
   0xc   :  { %v5301_v2 = vsel %vm382_vm1, %v383_v1, 0  ;;  %s6683_s25 = sld [smem:[#allocation10_spill]]  ;;  %vm2997_vm8 = vcmask 254976   ;;  %s3930_s29 = sshll.u32 %s5201_s28, 4  ;;  %s3931_s29 = int_to_ptr.vmem [resolvable:$true] %s3930_s29 }
   0xd   :  { %s3932_s0 = sshll.u32 %s6674_s17, 4  ;;  %s3933_s0 = int_to_ptr.hbm [resolvable:$true] %s3932_s0 }
  0x10   :  { %v4088_v3 = vld [vmem:[%s6681_s22 + $0x118] sm:$0xf]  ;;  %v4839_v4 = vld [vmem:[%s6681_s22 + $0x128] sm:$0xf0]  ;;  %v4837_v5 = vld [vmem:[%s6681_s22 + $0x11c] sm:$0xf] }
  0x11   :  { %v4089_v6 = vor.u32 %v4839_v4, %v4088_v3  ;;  %v4090_v7 = vld [vmem:[%s6681_s22 + $0x12c] sm:$0xf0]  ;;  %v4108_v8 = vld [vmem:[%s6681_s22 + $0x140] sm:$0xf]  ;;  %v4844_v9 = vld [vmem:[%s6681_s22 + $0x150] sm:$0xf0] }
  0x12   :  { %v4093_v10 = vor.u32 %v4837_v5, %v4090_v7  ;;  %v4109_v11 = vor.u32 %v4844_v9, %v4108_v8  ;;  %v4096_v12 = vld [vmem:[%s6681_s22 + $0x120] sm:$0xf]  ;;  %v4840_v13 = vld [vmem:[%s6681_s22 + $0x130] sm:$0xf0]  ;;  %v4068_v14 = vld [vmem:[%s6681_s22 + $0xf0] sm:$0xf] }
  0x13   :  { %400 = vmatpush.bf16.msra.mxu0 %v4089_v6  ;;  %v4097_v15 = vor.u32 %v4840_v13, %v4096_v12  ;;  %v4834_v16 = vld [vmem:[%s6681_s22 + $0x100] sm:$0xf0]  ;;  %v4832_v17 = vld [vmem:[%s6681_s22 + $0xf4] sm:$0xf]  ;;  %v4070_v18 = vld [vmem:[%s6681_s22 + $0x104] sm:$0xf0] }
  0x14   :  { %428 = vmatpush.bf16.msra.mxu2 %v4093_v10  ;;  %v386_v19 = vand.u32 %v4109_v11, %v5301_v2  ;;  %v4069_v20 = vor.u32 %v4834_v16, %v4068_v14  ;;  %v4073_v21 = vor.u32 %v4832_v17, %v4070_v18  ;;  %v4842_v22 = vld [vmem:[%s6681_s22 + $0x144] sm:$0xf]  ;;  %v4110_v23 = vld [vmem:[%s6681_s22 + $0x154] sm:$0xf0]  ;;  %v77_v24 = vld [vmem:[%s6682_s20 + $0x8] sm:$0xff] }
  0x15   :  { %v4113_v25 = vor.u32 %v4842_v22, %v4110_v23  ;;  %v79_v26 = vld [vmem:[%s6682_s20 + $0x18] sm:$0xff]  ;;  %v4835_v28 = vld [vmem:[%s6681_s22 + $0x108] sm:$0xf0]  ;;  %v4116_v30 = vld [vmem:[%s6681_s22 + $0x148] sm:$0xf] }
  0x16   :  { %v4076_v27 = vld [vmem:[%s6681_s22 + $0xf8] sm:$0xf]  ;;  %421 = vmatpush.bf16.msra.mxu1 %v386_v19  ;;  %v5358_v29 = vpack.c.bf16 %v79_v26, %v77_v24  ;;  %v4845_v31 = vld [vmem:[%s6681_s22 + $0x158] sm:$0xf0]  ;;  %v4048_v32 = vld [vmem:[%s6681_s22 + $0xc8] sm:$0xf] }
  0x17   :  { %401 = vmatpush.bf16.msra.mxu0 %v4069_v20  ;;  %v389_v33 = vand.u32 %v4113_v25, %v5301_v2  ;;  %v4077_v34 = vor.u32 %v4835_v28, %v4076_v27  ;;  %v4117_v35 = vor.u32 %v4845_v31, %v4116_v30  ;;  %v4829_v36 = vld [vmem:[%s6681_s22 + $0xd8] sm:$0xf0]  ;;  %v4827_v37 = vld [vmem:[%s6681_s22 + $0xcc] sm:$0xf]  ;;  %v4050_v38 = vld [vmem:[%s6681_s22 + $0xdc] sm:$0xf0] }
  0x18   :  { %429 = vmatpush.bf16.msra.mxu2 %v4073_v21  ;;  %v4049_v39 = vor.u32 %v4829_v36, %v4048_v32  ;;  %v4838_v40 = vld [vmem:[%s6681_s22 + $0x124] sm:$0xf]  ;;  %v4098_v41 = vld [vmem:[%s6681_s22 + $0x134] sm:$0xf0]  ;;  %v4056_v42 = vld [vmem:[%s6681_s22 + $0xd0] sm:$0xf]  ;;  %v4053_v44 = vor.u32 %v4827_v37, %v4050_v38 }
  0x19   :  { %449 = vmatpush.bf16.msra.mxu3 %v389_v33  ;;  %v392_v43 = vand.u32 %v4117_v35, %v5301_v2  ;;  %v4101_v45 = vor.u32 %v4838_v40, %v4098_v41  ;;  %v4830_v46 = vld [vmem:[%s6681_s22 + $0xe0] sm:$0xf0]  ;;  %v4028_v47 = vld [vmem:[%s6681_s22 + $0xa0] sm:$0xf]  ;;  %v4824_v48 = vld [vmem:[%s6681_s22 + $0xb0] sm:$0xf0]  ;;  %4126 = vmatmul.msk.bf16.vlgmr.msra.gmra.mxu1 %vm377_vm2, %v5358_v29 }
  0x1a   :  { %456 = vmatpush.bf16.msrb.mxu1 %v4097_v15  ;;  %v4822_v49 = vld [vmem:[%s6681_s22 + $0xa4] sm:$0xf]  ;;  %v4030_v50 = vld [vmem:[%s6681_s22 + $0xb4] sm:$0xf0]  ;;  %v4833_v51 = vld [vmem:[%s6681_s22 + $0xfc] sm:$0xf]  ;;  %v4057_v52 = vor.u32 %v4830_v46, %v4056_v42  ;;  %v4029_v54 = vor.u32 %v4824_v48, %v4028_v47 }
  0x1b   :  { %v4078_v53 = vld [vmem:[%s6681_s22 + $0x10c] sm:$0xf0]  ;;  %402 = vmatpush.bf16.msra.mxu0 %v4049_v39  ;;  %v4036_v55 = vld [vmem:[%s6681_s22 + $0xa8] sm:$0xf]  ;;  %v4825_v56 = vld [vmem:[%s6681_s22 + $0xb8] sm:$0xf0]  ;;  %v4033_v57 = vor.u32 %v4822_v49, %v4030_v50 }
  0x1c   :  { %4127 = vmatmul.msk.bf16.vlgmr.msra.gmra.mxu3 %vm377_vm2, %v5358_v29  ;;  %430 = vmatpush.bf16.msra.mxu2 %v4053_v44  ;;  %v4081_v58 = vor.u32 %v4833_v51, %v4078_v53  ;;  %v4008_v59 = vld [vmem:[%s6681_s22 + $0x78] sm:$0xf]  ;;  %v4819_v60 = vld [vmem:[%s6681_s22 + $0x88] sm:$0xf0]  ;;  %v4817_v61 = vld [vmem:[%s6681_s22 + $0x7c] sm:$0xf]  ;;  %v4037_v1 = vor.u32 %v4825_v56, %v4036_v55 }
  0x1d   :  { %477 = vmatpush.bf16.msrb.mxu3 %v392_v43  ;;  %v4010_v62 = vld [vmem:[%s6681_s22 + $0x8c] sm:$0xf0]  ;;  %v4828_v63 = vld [vmem:[%s6681_s22 + $0xd4] sm:$0xf]  ;;  %v4058_v0 = vld [vmem:[%s6681_s22 + $0xe4] sm:$0xf0]  ;;  %v4009_v3 = vor.u32 %v4819_v60, %v4008_v59 }
  0x1e   :  { %457 = vmatpush.bf16.msrb.mxu1 %v4077_v34  ;;  %v4016_v4 = vld [vmem:[%s6681_s22 + $0x80] sm:$0xf]  ;;  %v4820_v5 = vld [vmem:[%s6681_s22 + $0x90] sm:$0xf0]  ;;  %v4013_v6 = vor.u32 %v4817_v61, %v4010_v62  ;;  %v4061_v7 = vor.u32 %v4828_v63, %v4058_v0  ;;  %v3988_v8 = vld [vmem:[%s6681_s22 + $0x50] sm:$0xf] }
  0x1f   :  { %403 = vmatpush.bf16.msra.mxu0 %v4029_v54  ;;  %v4814_v9 = vld [vmem:[%s6681_s22 + $0x60] sm:$0xf0]  ;;  %v4812_v10 = vld [vmem:[%s6681_s22 + $0x54] sm:$0xf]  ;;  %v3990_v11 = vld [vmem:[%s6681_s22 + $0x64] sm:$0xf0]  ;;  %v4017_v14 = vor.u32 %v4820_v5, %v4016_v4 }
  0x20   :  { %431 = vmatpush.bf16.msra.mxu2 %v4033_v57  ;;  %v4823_v12 = vld [vmem:[%s6681_s22 + $0xac] sm:$0xf]  ;;  %v4038_v13 = vld [vmem:[%s6681_s22 + $0xbc] sm:$0xf0]  ;;  %v3989_v15 = vor.u32 %v4814_v9, %v3988_v8  ;;  %v3996_v16 = vld [vmem:[%s6681_s22 + $0x58] sm:$0xf]  ;;  %v3993_v18 = vor.u32 %v4812_v10, %v3990_v11 }
  0x21   :  { %484 = vmatpush.bf16.msra.mxu3 %v4101_v45  ;;  %v4815_v17 = vld [vmem:[%s6681_s22 + $0x68] sm:$0xf0]  ;;  %v4041_v19 = vor.u32 %v4823_v12, %v4038_v13  ;;  %v3968_v20 = vld [vmem:[%s6681_s22 + $0x28] sm:$0xf]  ;;  %v4809_v21 = vld [vmem:[%s6681_s22 + $0x38] sm:$0xf0] }
  0x22   :  { %458 = vmatpush.bf16.msrb.mxu1 %v4057_v52  ;;  %v4807_v22 = vld [vmem:[%s6681_s22 + $0x2c] sm:$0xf]  ;;  %v3970_v23 = vld [vmem:[%s6681_s22 + $0x3c] sm:$0xf0]  ;;  %v4818_v24 = vld [vmem:[%s6681_s22 + $0x84] sm:$0xf]  ;;  %v3997_v26 = vor.u32 %v4815_v17, %v3996_v16  ;;  %v3969_v28 = vor.u32 %v4809_v21, %v3968_v20 }
  0x23   :  { %404 = vmatpush.bf16.msra.mxu0 %v4009_v3  ;;  %v4018_v25 = vld [vmem:[%s6681_s22 + $0x94] sm:$0xf0]  ;;  %v3976_v27 = vld [vmem:[%s6681_s22 + $0x30] sm:$0xf]  ;;  %v4810_v30 = vld [vmem:[%s6681_s22 + $0x40] sm:$0xf0]  ;;  %v3973_v33 = vor.u32 %v4807_v22, %v3970_v23 }
  0x24   :  { %432 = vmatpush.bf16.msra.mxu2 %v4013_v6  ;;  %v3948_v31 = vld [vmem:[%s6681_s22] sm:$0xf]  ;;  %v4804_v32 = vld [vmem:[%s6681_s22 + $0x10] sm:$0xf0]  ;;  %v4021_v34 = vor.u32 %v4818_v24, %v4018_v25  ;;  %v4802_v35 = vld [vmem:[%s6681_s22 + $0x4] sm:$0xf]  ;;  %v3977_v41 = vor.u32 %v4810_v30, %v3976_v27 }
  0x25   :  { %485 = vmatpush.bf16.msra.mxu3 %v4081_v58  ;;  %v3950_v36 = vld [vmem:[%s6681_s22 + $0x14] sm:$0xf0]  ;;  %v4813_v37 = vld [vmem:[%s6681_s22 + $0x5c] sm:$0xf]  ;;  %v3998_v38 = vld [vmem:[%s6681_s22 + $0x6c] sm:$0xf0]  ;;  %v3949_v45 = vor.u32 %v4804_v32, %v3948_v31 }
  0x26   :  { %459 = vmatpush.bf16.msrb.mxu1 %v4037_v1  ;;  %v4104_v39 = vld [vmem:[%s6681_s22 + $0x128] sm:$0xf]  ;;  %v4841_v40 = vld [vmem:[%s6681_s22 + $0x138] sm:$0xf0]  ;;  %v76_v42 = vld [vmem:[%s6682_s20] sm:$0xff]  ;;  %v3953_v50 = vor.u32 %v4802_v35, %v3950_v36  ;;  %v4001_v51 = vor.u32 %v4813_v37, %v3998_v38 }
  0x27   :  { %405 = vmatpush.bf16.msra.mxu0 %v3989_v15  ;;  %v4843_v43 = vld [vmem:[%s6681_s22 + $0x14c] sm:$0xf]  ;;  %v4118_v44 = vld [vmem:[%s6681_s22 + $0x15c] sm:$0xf0]  ;;  %v78_v46 = vld [vmem:[%s6682_s20 + $0x10] sm:$0xff]  ;;  %v4105_v54 = vor.u32 %v4841_v40, %v4104_v39 }
  0x28   :  { %433 = vmatpush.bf16.msra.mxu2 %v3993_v18  ;;  %v3956_v47 = vld [vmem:[%s6681_s22 + $0x8] sm:$0xf]  ;;  %v4805_v48 = vld [vmem:[%s6681_s22 + $0x18] sm:$0xf0]  ;;  %v4121_v49 = vor.u32 %v4843_v43, %v4118_v44  ;;  %v4808_v52 = vld [vmem:[%s6681_s22 + $0x34] sm:$0xf]  ;;  %v5552_v59 = vpack.c.bf16 %v78_v46, %v76_v42 }
  0x29   :  { %486 = vmatpush.bf16.msra.mxu3 %v4061_v7  ;;  %v3978_v53 = vld [vmem:[%s6681_s22 + $0x44] sm:$0xf0]  ;;  %v4084_v55 = vld [vmem:[%s6681_s22 + $0x100] sm:$0xf]  ;;  %v4836_v56 = vld [vmem:[%s6681_s22 + $0x110] sm:$0xf0]  ;;  %v3957_v60 = vor.u32 %v4805_v48, %v3956_v47 }
  0x2a   :  { %460 = vmatpush.bf16.msrb.mxu1 %v4017_v14  ;;  %v395_v57 = vand.u32 %v4121_v49, %v5301_v2  ;;  %v4124_v58 = vld [vmem:[%s6681_s22 + $0x150] sm:$0xf]  ;;  %v4846_v61 = vld [vmem:[%s6681_s22 + $0x160] sm:$0xf0]  ;;  %v3981_v63 = vor.u32 %v4808_v52, %v3978_v53  ;;  %v4803_v0 = vld [vmem:[%s6681_s22 + $0xc] sm:$0xf]  ;;  %v4085_v3 = vor.u32 %v4836_v56, %v4084_v55 }
  0x2b   :  { %406 = vmatpush.bf16.msra.mxu0 %v3969_v28  ;;  %v4125_v62 = vor.u32 %v4846_v61, %v4124_v58  ;;  %v3958_v1 = vld [vmem:[%s6681_s22 + $0x1c] sm:$0xf0]  ;;  %v4064_v4 = vld [vmem:[%s6681_s22 + $0xd8] sm:$0xf]  ;;  %v4909_v7 = vld [vmem:[#allocation2 + $0x1ec] sm:$0xf0] }
  0x2c   :  { %4128 = vmatmul.msk.bf16.vlgmr.msrb.gmra.mxu3 %vm377_vm2, %v5358_v29  ;;  %434 = vmatpush.bf16.msra.mxu2 %v3973_v33  ;;  %v4373_v6 = vld [vmem:[#allocation2 + $0x1e0] sm:$0xf]  ;;  %v4831_v8 = vld [vmem:[%s6681_s22 + $0xe8] sm:$0xf0]  ;;  %v4941_v10 = vld [vmem:[#allocation2 + $0x2ec] sm:$0xf0]  ;;  %v3961_v14 = vor.u32 %v4803_v0, %v3958_v1 }
  0x2d   :  { %487 = vmatpush.bf16.msra.mxu3 %v4041_v19  ;;  %v398_v5 = vand.u32 %v4125_v62, %v5301_v2  ;;  %v4501_v9 = vld [vmem:[#allocation2 + $0x2e0] sm:$0xf]  ;;  %v4374_v11 = vor.u32 %v4909_v7, %v4373_v6  ;;  %v4905_v13 = vld [vmem:[#allocation2 + $0x1cc] sm:$0xf0]  ;;  %v4065_v15 = vor.u32 %v4831_v8, %v4064_v4  ;;  %v4826_v16 = vld [vmem:[%s6681_s22 + $0xc0] sm:$0xf0] }
  0x2e   :  { %461 = vmatpush.bf16.msrb.mxu1 %v3997_v26  ;;  %v4357_v12 = vld [vmem:[#allocation2 + $0x1c0] sm:$0xf]  ;;  %v4044_v2 = vld [vmem:[%s6681_s22 + $0xb0] sm:$0xf]  ;;  %v4502_v17 = vor.u32 %v4941_v10, %v4501_v9  ;;  %v4024_v23 = vld [vmem:[%s6681_s22 + $0x88] sm:$0xf] }
  0x2f   :  { %407 = vmatpush.bf16.msra.mxu0 %v3949_v45  ;;  %v4485_v18 = vld [vmem:[#allocation2 + $0x2c0] sm:$0xf]  ;;  %v4937_v19 = vld [vmem:[#allocation2 + $0x2cc] sm:$0xf0]  ;;  %v4358_v20 = vor.u32 %v4905_v13, %v4357_v12  ;;  %v4821_v24 = vld [vmem:[%s6681_s22 + $0x98] sm:$0xf0]  ;;  %v4045_v26 = vor.u32 %v4826_v16, %v4044_v2 }
  0x30   :  { %435 = vmatpush.bf16.msra.mxu2 %v3953_v50  ;;  %v4341_v21 = vld [vmem:[#allocation2 + $0x1a0] sm:$0xf]  ;;  %v4901_v22 = vld [vmem:[#allocation2 + $0x1ac] sm:$0xf0]  ;;  %v4486_v27 = vor.u32 %v4937_v19, %v4485_v18  ;;  %v4025_v31 = vor.u32 %v4821_v24, %v4024_v23  ;;  %v3984_v38 = vld [vmem:[%s6681_s22 + $0x38] sm:$0xf] }
  0x31   :  { %488 = vmatpush.bf16.msra.mxu3 %v4021_v34  ;;  %v4469_v25 = vld [vmem:[#allocation2 + $0x2a0] sm:$0xf]  ;;  %v4933_v28 = vld [vmem:[#allocation2 + $0x2ac] sm:$0xf0]  ;;  %v4342_v30 = vor.u32 %v4901_v22, %v4341_v21  ;;  %v4816_v34 = vld [vmem:[%s6681_s22 + $0x70] sm:$0xf0] }
  0x32   :  { %462 = vmatpush.bf16.msrb.mxu1 %v3977_v41  ;;  %408 = vmatmul.bf16.vlgmr.msra.gmra.mxu0 %v5552_v59  ;;  %v4470_v32 = vor.u32 %v4933_v28, %v4469_v25  ;;  %v4004_v33 = vld [vmem:[%s6681_s22 + $0x60] sm:$0xf]  ;;  %v4929_v36 = vld [vmem:[#allocation2 + $0x28c] sm:$0xf0]  ;;  %v4811_v39 = vld [vmem:[%s6681_s22 + $0x48] sm:$0xf0] }
  0x33   :  { %505 = vmatpush.bf16.msrb.mxu0 %v395_v57  ;;  %436 = vmatmul.bf16.vlgmr.msra.gmra.mxu2 %v5552_v59  ;;  %v4453_v35 = vld [vmem:[#allocation2 + $0x280] sm:$0xf]  ;;  %v4005_v37 = vor.u32 %v4816_v34, %v4004_v33  ;;  %v4925_v42 = vld [vmem:[#allocation2 + $0x26c] sm:$0xf0]  ;;  %v3985_v43 = vor.u32 %v4811_v39, %v3984_v38  ;;  %v4806_v45 = vld [vmem:[%s6681_s22 + $0x20] sm:$0xf0] }
  0x34   :  { %512 = vmatpush.bf16.msrb.mxu2 %v4105_v54  ;;  %v4454_v40 = vor.u32 %v4929_v36, %v4453_v35  ;;  %v4437_v41 = vld [vmem:[#allocation2 + $0x260] sm:$0xf]  ;;  %v3964_v44 = vld [vmem:[%s6681_s22 + $0x10] sm:$0xf]  ;;  %v4907_v25 = vld [vmem:[#allocation2 + $0x1e4] sm:$0xf] }
  0x35   :  { %489 = vmatpush.bf16.msra.mxu3 %v4001_v51  ;;  %v4438_v46 = vor.u32 %v4925_v42, %v4437_v41  ;;  %v4629_v47 = vld [vmem:[#allocation2 + $0x3e0] sm:$0xf]  ;;  %v4973_v48 = vld [vmem:[#allocation2 + $0x3ec] sm:$0xf0]  ;;  %v3965_v49 = vor.u32 %v4806_v45, %v3964_v44  ;;  %v4359_v39 = vld [vmem:[#allocation2 + $0x1d0] sm:$0xf0] }
  0x36   :  { %463 = vmatpush.bf16.msrb.mxu1 %v3957_v60  ;;  %v4630_v50 = vor.u32 %v4973_v48, %v4629_v47  ;;  %v4613_v51 = vld [vmem:[#allocation2 + $0x3c0] sm:$0xf]  ;;  %v4969_v52 = vld [vmem:[#allocation2 + $0x3cc] sm:$0xf0] }
  0x37   :  { %v4325_v53 = vld [vmem:[#allocation2 + $0x180] sm:$0xf]  ;;  %v4897_v54 = vld [vmem:[#allocation2 + $0x18c] sm:$0xf0] }
  0x38   :  { %513 = vmatpush.bf16.msrb.mxu2 %v4085_v3  ;;  %v4326_v55 = vor.u32 %v4897_v54, %v4325_v53  ;;  %v4245_v56 = vld [vmem:[#allocation2 + $0xe0] sm:$0xf]  ;;  %v4877_v57 = vld [vmem:[#allocation2 + $0xec] sm:$0xf0]  ;;  %v4343_v53 = vld [vmem:[#allocation2 + $0x1b0] sm:$0xf0] }
  0x39   :  { %490 = vmatpush.bf16.msra.mxu3 %v3981_v63  ;;  %464 = vmatmul.bf16.vlgmr.msrb.gmra.mxu1 %v5552_v59  ;;  %v4597_v58 = vld [vmem:[#allocation2 + $0x3a0] sm:$0xf]  ;;  %v4246_v60 = vor.u32 %v4877_v57, %v4245_v56  ;;  %v4965_v61 = vld [vmem:[#allocation2 + $0x3ac] sm:$0xf0] }
  0x3a   :  { %533 = vmatpush.bf16.msra.mxu1 %v398_v5  ;;  %v4421_v62 = vld [vmem:[#allocation2 + $0x240] sm:$0xf]  ;;  %v4921_v63 = vld [vmem:[#allocation2 + $0x24c] sm:$0xf0]  ;;  %v4598_v0 = vor.u32 %v4965_v61, %v4597_v58  ;;  %v4871_v61 = vld [vmem:[#allocation2 + $0xc4] sm:$0xf] }
  0x3b   :  { %v4422_v1 = vor.u32 %v4921_v63, %v4421_v62  ;;  %v4309_v3 = vld [vmem:[#allocation2 + $0x160] sm:$0xf]  ;;  %v4893_v4 = vld [vmem:[#allocation2 + $0x16c] sm:$0xf0]  ;;  %1443 = vmatpush.bf16.msra.mxu0 %v4246_v60  ;;  %v4231_v62 = vld [vmem:[#allocation2 + $0xd0] sm:$0xf0] }
  0x3c   :  { %514 = vmatpush.bf16.msrb.mxu2 %v4065_v15  ;;  %v4229_v5 = vld [vmem:[#allocation2 + $0xc0] sm:$0xf]  ;;  %v4310_v6 = vor.u32 %v4893_v4, %v4309_v3  ;;  %v4961_v8 = vld [vmem:[#allocation2 + $0x38c] sm:$0xf0]  ;;  %v4631_v3 = vld [vmem:[#allocation2 + $0x3f0] sm:$0xf0] }
  0x3d   :  { %491 = vmatpush.bf16.msra.mxu3 %v3961_v14  ;;  %v4581_v7 = vld [vmem:[#allocation2 + $0x380] sm:$0xf]  ;;  %v4917_v12 = vld [vmem:[#allocation2 + $0x22c] sm:$0xf0]  ;;  %v4895_v4 = vld [vmem:[#allocation2 + $0x184] sm:$0xf] }
  0x3e   :  { %1457 = vmatpush.bf16.msrb.mxu1 %v4374_v11  ;;  %v4582_v10 = vor.u32 %v4961_v8, %v4581_v7  ;;  %v4405_v11 = vld [vmem:[#allocation2 + $0x220] sm:$0xf]  ;;  %v4889_v2 = vld [vmem:[#allocation2 + $0x14c] sm:$0xf0] }
  0x3f   :  { %v4406_v13 = vor.u32 %v4917_v12, %v4405_v11  ;;  %v4293_v14 = vld [vmem:[#allocation2 + $0x140] sm:$0xf]  ;;  %v4913_v22 = vld [vmem:[#allocation2 + $0x20c] sm:$0xf0]  ;;  %v4215_v11 = vld [vmem:[#allocation2 + $0xb0] sm:$0xf0] }
  0x40   :  { %492 = vmatmul.bf16.vlgmr.msra.gmra.mxu3 %v5552_v59  ;;  %515 = vmatpush.bf16.msrb.mxu2 %v4045_v26  ;;  %v4294_v15 = vor.u32 %v4889_v2, %v4293_v14  ;;  %v4213_v16 = vld [vmem:[#allocation2 + $0xa0] sm:$0xf]  ;;  %v4375_v26 = vld [vmem:[#allocation2 + $0x1f0] sm:$0xf0]  ;;  %v4953_v36 = vld [vmem:[#allocation2 + $0x34c] sm:$0xf0] }
  0x41   :  { %1471 = vmatpush.bf16.msrb.mxu3 %v4502_v17  ;;  %v4869_v17 = vld [vmem:[#allocation2 + $0xac] sm:$0xf0]  ;;  %v4565_v18 = vld [vmem:[#allocation2 + $0x360] sm:$0xf]  ;;  %v4378_v28 = vor.u32 %v4907_v25, %v4375_v26  ;;  %v4967_v12 = vld [vmem:[#allocation2 + $0x3c4] sm:$0xf] }
  0x42   :  { %1458 = vmatpush.bf16.msrb.mxu1 %v4358_v20  ;;  %4129 = vmatmul.msk.bf16.vlgmr.msrb.gmra.mxu0 %vm377_vm2, %v5358_v29  ;;  %v4214_v19 = vor.u32 %v4869_v17, %v4213_v16  ;;  %v4957_v20 = vld [vmem:[#allocation2 + $0x36c] sm:$0xf0]  ;;  %v4389_v21 = vld [vmem:[#allocation2 + $0x200] sm:$0xf]  ;;  %v4615_v14 = vld [vmem:[#allocation2 + $0x3d0] sm:$0xf0] }
  0x43   :  { %v4566_v23 = vor.u32 %v4957_v20, %v4565_v18  ;;  %v4390_v24 = vor.u32 %v4913_v22, %v4389_v21  ;;  %v4549_v35 = vld [vmem:[#allocation2 + $0x340] sm:$0xf]  ;;  %v4881_v42 = vld [vmem:[#allocation2 + $0x10c] sm:$0xf0]  ;;  %v4891_v2 = vld [vmem:[#allocation2 + $0x164] sm:$0xf] }
  0x44   :  { %516 = vmatpush.bf16.msrb.mxu2 %v4025_v31  ;;  %v4197_v31 = vld [vmem:[#allocation2 + $0x80] sm:$0xf]  ;;  %v4550_v38 = vor.u32 %v4953_v36, %v4549_v35  ;;  %v4861_v45 = vld [vmem:[#allocation2 + $0x6c] sm:$0xf0]  ;;  %v4311_v16 = vld [vmem:[#allocation2 + $0x170] sm:$0xf0] }
  0x45   :  { %1472 = vmatpush.bf16.msrb.mxu3 %v4486_v27  ;;  %v4277_v27 = vld [vmem:[#allocation2 + $0x120] sm:$0xf]  ;;  %v4949_v48 = vld [vmem:[#allocation2 + $0x32c] sm:$0xf0]  ;;  %v4314_v17 = vor.u32 %v4891_v2, %v4311_v16  ;;  %v4863_v20 = vld [vmem:[#allocation2 + $0x84] sm:$0xf] }
  0x46   :  { %1459 = vmatpush.bf16.msrb.mxu1 %v4342_v30  ;;  %v4885_v30 = vld [vmem:[#allocation2 + $0x12c] sm:$0xf0]  ;;  %v4261_v41 = vld [vmem:[#allocation2 + $0x100] sm:$0xf]  ;;  %v4199_v22 = vld [vmem:[#allocation2 + $0x90] sm:$0xf0] }
  0x47   :  { %v4278_v33 = vor.u32 %v4885_v30, %v4277_v27  ;;  %v4181_v44 = vld [vmem:[#allocation2 + $0x60] sm:$0xf]  ;;  %v4857_v56 = vld [vmem:[#allocation2 + $0x4c] sm:$0xf0]  ;;  %v4202_v25 = vor.u32 %v4863_v20, %v4199_v22  ;;  %v4963_v27 = vld [vmem:[#allocation2 + $0x3a4] sm:$0xf] }
  0x48   :  { %517 = vmatpush.bf16.msrb.mxu2 %v4005_v37  ;;  %v4903_v37 = vld [vmem:[#allocation2 + $0x1c4] sm:$0xf]  ;;  %v4182_v47 = vor.u32 %v4861_v45, %v4181_v44  ;;  %v4517_v57 = vld [vmem:[#allocation2 + $0x300] sm:$0xf]  ;;  %v4945_v60 = vld [vmem:[#allocation2 + $0x30c] sm:$0xf0] }
  0x49   :  { %1473 = vmatpush.bf16.msrb.mxu3 %v4470_v32  ;;  %4130 = vmatmul.msk.bf16.vlgmr.msra.gmra.mxu1 %vm377_vm2, %v5358_v29  ;;  %v4614_v29 = vor.u32 %v4969_v52, %v4613_v51  ;;  %v4865_v32 = vld [vmem:[#allocation2 + $0x8c] sm:$0xf0]  ;;  %v4518_v63 = vor.u32 %v4945_v60, %v4517_v57  ;;  %v4149_v7 = vld [vmem:[#allocation2 + $0x20] sm:$0xf]  ;;  %v4887_v30 = vld [vmem:[#allocation2 + $0x144] sm:$0xf] }
  0x4a   :  { %1460 = vmatpush.bf16.msrb.mxu1 %v4326_v55  ;;  %v4198_v34 = vor.u32 %v4865_v32, %v4197_v31  ;;  %v4165_v55 = vld [vmem:[#allocation2 + $0x40] sm:$0xf]  ;;  %v4853_v8 = vld [vmem:[#allocation2 + $0x2c] sm:$0xf0]  ;;  %v4295_v32 = vld [vmem:[#allocation2 + $0x150] sm:$0xf0] }
  0x4b   :  { %v4166_v58 = vor.u32 %v4857_v56, %v4165_v55  ;;  %v4133_v18 = vld [vmem:[#allocation2] sm:$0xf]  ;;  %v4183_v35 = vld [vmem:[#allocation2 + $0x70] sm:$0xf0]  ;;  %v4883_v44 = vld [vmem:[#allocation2 + $0x124] sm:$0xf] }
  0x4c   :  { %518 = vmatpush.bf16.msrb.mxu2 %v3985_v43  ;;  %v4262_v43 = vor.u32 %v4881_v42, %v4261_v41  ;;  %v4279_v45 = vld [vmem:[#allocation2 + $0x130] sm:$0xf0]  ;;  %v4879_v55 = vld [vmem:[#allocation2 + $0x104] sm:$0xf] }
  0x4d   :  { %1474 = vmatpush.bf16.msrb.mxu3 %v4454_v40  ;;  %v4362_v40 = vor.u32 %v4903_v37, %v4359_v39  ;;  %v4677_v37 = vld [vmem:[#allocation2 + $0x440] sm:$0xf]  ;;  %v4959_v39 = vld [vmem:[#allocation2 + $0x384] sm:$0xf]  ;;  %v4263_v56 = vld [vmem:[#allocation2 + $0x110] sm:$0xf0] }
  0x4e   :  { %1461 = vmatpush.bf16.msrb.mxu1 %v4310_v6  ;;  %v4327_v6 = vld [vmem:[#allocation2 + $0x190] sm:$0xf0]  ;;  %v4851_v60 = vld [vmem:[#allocation2 + $0x24] sm:$0xf] }
  0x4f   :  { %v4519_v2 = vld [vmem:[#allocation2 + $0x310] sm:$0xf0] }
  0x50   :  { %519 = vmatpush.bf16.msrb.mxu2 %v3965_v49  ;;  %v4875_v49 = vld [vmem:[#allocation2 + $0xe4] sm:$0xf] }
  0x51   :  { %1475 = vmatpush.bf16.msrb.mxu3 %v4438_v46  ;;  %v4533_v46 = vld [vmem:[#allocation2 + $0x320] sm:$0xf] }
  0x52   :  { %1462 = vmatpush.bf16.msrb.mxu1 %v4294_v15  ;;  %v4534_v51 = vor.u32 %v4949_v48, %v4533_v46  ;;  %v4618_v15 = vor.u32 %v4967_v12, %v4615_v14  ;;  %v4855_v48 = vld [vmem:[#allocation2 + $0x44] sm:$0xf] }
  0x53   :  { %520 = vmatmul.bf16.vlgmr.msrb.gmra.mxu2 %v5552_v59  ;;  %v4873_v59 = vld [vmem:[#allocation2 + $0xcc] sm:$0xf0]  ;;  %v4943_v14 = vld [vmem:[#allocation2 + $0x304] sm:$0xf] }
  0x54   :  { %1485 = vmatpush.bf16.msra.mxu2 %v4630_v50  ;;  %v4230_v9 = vor.u32 %v4873_v59, %v4229_v5  ;;  %v4247_v50 = vld [vmem:[#allocation2 + $0xf0] sm:$0xf0]  ;;  %v4330_v59 = vor.u32 %v4895_v4, %v4327_v6  ;;  %v4951_v4 = vld [vmem:[#allocation2 + $0x344] sm:$0xf] }
  0x55   :  { %1476 = vmatpush.bf16.msrb.mxu3 %v4422_v1  ;;  %v4250_v52 = vor.u32 %v4875_v49, %v4247_v50  ;;  %v4971_v1 = vld [vmem:[#allocation2 + $0x3e4] sm:$0xf]  ;;  %v4167_v49 = vld [vmem:[#allocation2 + $0x50] sm:$0xf0] }
  0x56   :  { %1444 = vmatpush.bf16.msra.mxu0 %v4230_v9  ;;  %1463 = vmatpush.bf16.msrb.mxu1 %v4278_v33  ;;  %v4634_v5 = vor.u32 %v4971_v1, %v4631_v3  ;;  %v4867_v9 = vld [vmem:[#allocation2 + $0xa4] sm:$0xf]  ;;  %v4298_v33 = vor.u32 %v4887_v30, %v4295_v32  ;;  %v4170_v50 = vor.u32 %v4855_v48, %v4167_v49 }
  0x58   :  { %1486 = vmatpush.bf16.msra.mxu2 %v4614_v29  ;;  %v4899_v29 = vld [vmem:[#allocation2 + $0x1a4] sm:$0xf] }
  0x59   :  { %1477 = vmatpush.bf16.msrb.mxu3 %v4406_v13  ;;  %v4346_v54 = vor.u32 %v4899_v29, %v4343_v53  ;;  %v4218_v13 = vor.u32 %v4867_v9, %v4215_v11  ;;  %v4955_v29 = vld [vmem:[#allocation2 + $0x364] sm:$0xf]  ;;  %v4535_v11 = vld [vmem:[#allocation2 + $0x330] sm:$0xf0] }
  0x5a   :  { %1445 = vmatpush.bf16.msra.mxu0 %v4214_v19  ;;  %1464 = vmatpush.bf16.msrb.mxu1 %v4262_v43  ;;  %v4849_v19 = vld [vmem:[#allocation2 + $0xc] sm:$0xf0]  ;;  %v4583_v43 = vld [vmem:[#allocation2 + $0x390] sm:$0xf0] }
  0x5b   :  { %v4134_v21 = vor.u32 %v4849_v19, %v4133_v18  ;;  %v4586_v46 = vor.u32 %v4959_v39, %v4583_v43  ;;  %v4503_v39 = vld [vmem:[#allocation2 + $0x2f0] sm:$0xf0] }
  0x5c   :  { %1487 = vmatpush.bf16.msra.mxu2 %v4598_v0  ;;  %v4234_v0 = vor.u32 %v4871_v61, %v4231_v62  ;;  %v4151_v61 = vld [vmem:[#allocation2 + $0x30] sm:$0xf0] }
  0x5d   :  { %1478 = vmatpush.bf16.msrb.mxu3 %v4390_v24  ;;  %v4989_v24 = vld [vmem:[#allocation2 + $0x46c] sm:$0xf0]  ;;  %v4154_v62 = vor.u32 %v4851_v60, %v4151_v61 }
  0x5e   :  { %1446 = vmatpush.bf16.msra.mxu0 %v4198_v34  ;;  %1513 = vmatpush.bf16.msra.mxu1 %v4250_v52  ;;  %v4859_v34 = vld [vmem:[#allocation2 + $0x64] sm:$0xf]  ;;  %v4981_v52 = vld [vmem:[#allocation2 + $0x42c] sm:$0xf0] }
  0x5f   :  { %v4186_v36 = vor.u32 %v4859_v34, %v4183_v35 }
  0x60   :  { %1488 = vmatpush.bf16.msra.mxu2 %v4582_v10  ;;  %v4150_v10 = vor.u32 %v4853_v8, %v4149_v7  ;;  %v4847_v7 = vld [vmem:[#allocation2 + $0x4] sm:$0xf]  ;;  %v4135_v8 = vld [vmem:[#allocation2 + $0x10] sm:$0xf0] }
  0x61   :  { %1527 = vmatpush.bf16.msra.mxu3 %v4378_v28  ;;  %v4599_v28 = vld [vmem:[#allocation2 + $0x3b0] sm:$0xf0]  ;;  %v4138_v9 = vor.u32 %v4847_v7, %v4135_v8  ;;  %v4931_v7 = vld [vmem:[#allocation2 + $0x2a4] sm:$0xf] }
  0x62   :  { %1447 = vmatpush.bf16.msra.mxu0 %v4182_v47  ;;  %1514 = vmatpush.bf16.msra.mxu1 %v4234_v0  ;;  %v4602_v31 = vor.u32 %v4963_v27, %v4599_v28  ;;  %v4282_v47 = vor.u32 %v4883_v44, %v4279_v45  ;;  %v4977_v0 = vld [vmem:[#allocation2 + $0x40c] sm:$0xf0]  ;;  %v4471_v8 = vld [vmem:[#allocation2 + $0x2b0] sm:$0xf0] }
  0x64   :  { %1489 = vmatpush.bf16.msra.mxu2 %v4566_v23  ;;  %v4693_v23 = vld [vmem:[#allocation2 + $0x460] sm:$0xf] }
  0x65   :  { %1528 = vmatpush.bf16.msra.mxu3 %v4362_v40  ;;  %v4694_v26 = vor.u32 %v4989_v24, %v4693_v23 }
  0x66   :  { %1448 = vmatpush.bf16.msra.mxu0 %v4166_v58  ;;  %1515 = vmatpush.bf16.msra.mxu1 %v4218_v13  ;;  %v4266_v58 = vor.u32 %v4879_v55, %v4263_v56  ;;  %v5618_v13 = vld [vmem:[%s6683_s25] sm:$0x1f] }
  0x67   :  { %v138_v16 = vperm.slane %v5618_v13, 0  ;;  %v140_v19 = vperm.slane %v5618_v13, 2  ;;  %v139_v23 = vperm.slane %v5618_v13, 1  ;;  %v141_v35 = vperm.slane %v5618_v13, 3  ;;  %v4935_v56 = vld [vmem:[#allocation2 + $0x2c4] sm:$0xf] }
  0x68   :  { %1490 = vmatpush.bf16.msra.mxu2 %v4550_v38  ;;  %v4985_v38 = vld [vmem:[#allocation2 + $0x44c] sm:$0xf0] }
  0x69   :  { %1529 = vmatpush.bf16.msra.mxu3 %v4346_v54  ;;  %v4678_v42 = vor.u32 %v4985_v38, %v4677_v37  ;;  %v4567_v54 = vld [vmem:[#allocation2 + $0x370] sm:$0xf0]  ;;  %v4939_v38 = vld [vmem:[#allocation2 + $0x2e4] sm:$0xf] }
  0x6a   :  { %1449 = vmatpush.bf16.msra.mxu0 %v4150_v10  ;;  %1516 = vmatpush.bf16.msra.mxu1 %v4202_v25  ;;  %v4570_v57 = vor.u32 %v4955_v29, %v4567_v54  ;;  %v4947_v10 = vld [vmem:[#allocation2 + $0x324] sm:$0xf]  ;;  %v4506_v48 = vor.u32 %v4939_v38, %v4503_v39  ;;  %v4878_v54 = vld [vmem:[#allocation2 + $0xf4] sm:$0xf0]  ;;  %v4439_v38 = vld [vmem:[#allocation2 + $0x270] sm:$0xf0] }
  0x6b   :  { %v4538_v12 = vor.u32 %v4947_v10, %v4535_v11 }
  0x6c   :  { %1491 = vmatpush.bf16.msra.mxu2 %v4534_v51  ;;  %v4661_v51 = vld [vmem:[#allocation2 + $0x420] sm:$0xf] }
  0x6d   :  { %1530 = vmatpush.bf16.msra.mxu3 %v4330_v59  ;;  %v4662_v53 = vor.u32 %v4981_v52, %v4661_v51 }
  0x6e   :  { %1450 = vmatpush.bf16.msra.mxu0 %v4134_v21  ;;  %1517 = vmatpush.bf16.msra.mxu1 %v4186_v36 }
  0x70   :  { %1492 = vmatpush.bf16.msra.mxu2 %v4518_v63  ;;  %v4645_v63 = vld [vmem:[#allocation2 + $0x400] sm:$0xf] }
  0x71   :  { %1531 = vmatpush.bf16.msra.mxu3 %v4314_v17  ;;  %v4646_v3 = vor.u32 %v4977_v0, %v4645_v63  ;;  %v4522_v17 = vor.u32 %v4943_v14, %v4519_v2  ;;  %v4874_v63 = vld [vmem:[#allocation2 + $0xd4] sm:$0xf0]  ;;  %v4221_v14 = vld [vmem:[#allocation2 + $0xa8] sm:$0xf] }
  0x72   :  { %1503 = vmatpush.bf16.msrb.mxu0 %v4694_v26  ;;  %1518 = vmatpush.bf16.msra.mxu1 %v4170_v50  ;;  %v4870_v2 = vld [vmem:[#allocation2 + $0xb4] sm:$0xf0] }
  0x74   :  { %1555 = vmatpush.bf16.msrb.mxu2 %v4634_v5  ;;  %v4551_v5 = vld [vmem:[#allocation2 + $0x350] sm:$0xf0] }
  0x75   :  { %1532 = vmatpush.bf16.msra.mxu3 %v4298_v33  ;;  %v4554_v6 = vor.u32 %v4951_v4, %v4551_v5  ;;  %v4987_v5 = vld [vmem:[#allocation2 + $0x464] sm:$0xf] }
  0x76   :  { %1504 = vmatpush.bf16.msrb.mxu0 %v4678_v42  ;;  %1519 = vmatpush.bf16.msra.mxu1 %v4154_v62  ;;  %v4237_v62 = vld [vmem:[#allocation2 + $0xc8] sm:$0xf] }
  0x77   :  { %v4238_v11 = vor.u32 %v4874_v63, %v4237_v62  ;;  %v4637_v62 = vld [vmem:[#allocation2 + $0x3e8] sm:$0xf]  ;;  %v4974_v63 = vld [vmem:[#allocation2 + $0x3f4] sm:$0xf0] }
  0x78   :  { %1556 = vmatpush.bf16.msrb.mxu2 %v4618_v15 }
  0x79   :  { %1533 = vmatpush.bf16.msra.mxu3 %v4282_v47 }
  0x7a   :  { %1505 = vmatpush.bf16.msrb.mxu0 %v4662_v53  ;;  %1520 = vmatpush.bf16.msra.mxu1 %v4138_v9  ;;  %v4253_v53 = vld [vmem:[#allocation2 + $0xe8] sm:$0xf] }
  0x7b   :  { %v4254_v61 = vor.u32 %v4878_v54, %v4253_v53  ;;  %v142_v53 = vperm.slane %v5618_v13, 4 }
  0x7c   :  { %1557 = vmatpush.bf16.msrb.mxu2 %v4602_v31 }
  0x7d   :  { %1534 = vmatpush.bf16.msra.mxu3 %v4266_v58 }
  0x7e   :  { %1506 = vmatpush.bf16.msrb.mxu0 %v4646_v3 }
  0x80   :  { %1558 = vmatpush.bf16.msrb.mxu2 %v4586_v46 }
  0x84   :  { %1559 = vmatpush.bf16.msrb.mxu2 %v4570_v57  ;;  %v4487_v57 = vld [vmem:[#allocation2 + $0x2d0] sm:$0xf0] }
  0x88   :  { %1560 = vmatpush.bf16.msrb.mxu2 %v4554_v6  ;;  %v4695_v6 = vld [vmem:[#allocation2 + $0x470] sm:$0xf0] }
  0x8c   :  { %1561 = vmatpush.bf16.msrb.mxu2 %v4538_v12  ;;  %v4698_v12 = vor.u32 %v4987_v5, %v4695_v6  ;;  %v4858_v5 = vld [vmem:[#allocation2 + $0x54] sm:$0xf0]  ;;  %v4915_v6 = vld [vmem:[#allocation2 + $0x224] sm:$0xf] }
  0x90   :  { %1562 = vmatpush.bf16.msrb.mxu2 %v4522_v17 }
  0x96   :  { %v5611_v41 = vpop.f32.mrf.mxu1 }
  0x9e   :  { %v425_v59 = vpop.f32.mrf.mxu1 }
  0x9f   :  { %v5609_v40 = vpop.f32.mrf.mxu3 }
  0xa7   :  { %v5613_v1 = vpop.f32.mrf.mxu3 }
  0xaf   :  { %v479_v15 = vpop.f32.mrf.mxu3  ;;  %v409_v18 = vpop.f32.mrf.mxu0 }
  0xb0   :  { %v410_v20 = vadd.f32 %v409_v18, %v138_v16 }
  0xb2   :  { %v424_v24 = vadd.f32 %v5611_v41, %v410_v20  ;;  %v4679_v20 = vld [vmem:[#allocation2 + $0x450] sm:$0xf0] }
  0xb4   :  { %v540_v32 = vmul.f32 0.01, %v424_v24 }
  0xb6   :  { %v465_v21 = vpop.f32.mrf.mxu1  ;;  %v437_v25 = vpop.f32.mrf.mxu2  ;;  %v550_v41 = vmax.f32 %v424_v24, %v540_v32 }
  0xb7   :  { %v466_v22 = vadd.f32 %v465_v21, %v140_v19  ;;  %v481_v26 = vpop.f32.mrf.mxu3  ;;  %v411_v28 = vpop.f32.mrf.mxu0  ;;  %v438_v31 = vadd.f32 %v437_v25, %v139_v23  ;;  %v4474_v21 = vor.u32 %v4931_v7, %v4471_v8  ;;  %v4222_v25 = vor.u32 %v4870_v2, %v4221_v14  ;;  %v4157_v14 = vld [vmem:[#allocation2 + $0x28] sm:$0xf] }
  0xb8   :  { %v412_v30 = vadd.f32 %v411_v28, %v138_v16  ;;  %v4942_v28 = vld [vmem:[#allocation2 + $0x2f4] sm:$0xf0]  ;;  %v4638_v8 = vor.u32 %v4974_v63, %v4637_v62 }
  0xb9   :  { %v480_v27 = vadd.f32 %v479_v15, %v466_v22  ;;  %v452_v43 = vadd.f32 %v5609_v40, %v438_v31  ;;  %v4927_v22 = vld [vmem:[#allocation2 + $0x284] sm:$0xf] }
  0xba   :  { %v426_v33 = vadd.f32 %v425_v59, %v412_v30  ;;  %v4490_v59 = vor.u32 %v4935_v56, %v4487_v57  ;;  %v4205_v30 = vld [vmem:[#allocation2 + $0x88] sm:$0xf] }
  0xbb   :  { %v542_v36 = vmul.f32 0.01, %v480_v27  ;;  %v541_v58 = vmul.f32 0.01, %v452_v43  ;;  %v4477_v57 = vld [vmem:[#allocation2 + $0x2a8] sm:$0xf] }
  0xbc   :  { %v545_v42 = vmul.f32 0.01, %v426_v33 }
  0xbd   :  { %v552_v49 = vmax.f32 %v480_v27, %v542_v36  ;;  %v551_v9 = vmax.f32 %v452_v43, %v541_v58  ;;  %v4509_v27 = vld [vmem:[#allocation2 + $0x2e8] sm:$0xf]  ;;  %v4663_v36 = vld [vmem:[#allocation2 + $0x430] sm:$0xf0]  ;;  %v4934_v58 = vld [vmem:[#allocation2 + $0x2b4] sm:$0xf0] }
  0xbe   :  { %v467_v34 = vpop.f32.mrf.mxu1  ;;  %v555_v45 = vmax.f32 %v426_v33, %v545_v42  ;;  %v439_v46 = vpop.f32.mrf.mxu2  ;;  %v4866_v33 = vld [vmem:[#allocation2 + $0x94] sm:$0xf0]  ;;  %v4510_v42 = vor.u32 %v4942_v28, %v4509_v27  ;;  %v4478_v13 = vor.u32 %v4934_v58, %v4477_v57  ;;  %v4413_v57 = vld [vmem:[#allocation2 + $0x228] sm:$0xf] }
  0xbf   :  { %v468_v37 = vadd.f32 %v467_v34, %v140_v19  ;;  %v440_v51 = vadd.f32 %v439_v46, %v139_v23  ;;  %v507_v29 = vpop.f32.mrf.mxu0  ;;  %v4983_v19 = vld [vmem:[#allocation2 + $0x444] sm:$0xf]  ;;  %v4455_v23 = vld [vmem:[#allocation2 + $0x290] sm:$0xf0]  ;;  %v4206_v43 = vor.u32 %v4866_v33, %v4205_v30  ;;  %v4966_v27 = vld [vmem:[#allocation2 + $0x3b4] sm:$0xf0] }
  0xc0   :  { %v5626_v55 = vpack.c.bf16 %v555_v45, %v550_v41  ;;  %v4979_v34 = vld [vmem:[#allocation2 + $0x424] sm:$0xf]  ;;  %v4938_v41 = vld [vmem:[#allocation2 + $0x2d4] sm:$0xf0] }
  0xc1   :  { %v482_v44 = vadd.f32 %v481_v26, %v468_v37  ;;  %v454_v40 = vadd.f32 %v5613_v1, %v440_v51  ;;  %v4682_v26 = vor.u32 %v4983_v19, %v4679_v20  ;;  %v4923_v37 = vld [vmem:[#allocation2 + $0x264] sm:$0xf]  ;;  %v4666_v46 = vor.u32 %v4979_v34, %v4663_v36  ;;  %v4647_v51 = vld [vmem:[#allocation2 + $0x410] sm:$0xf0]  ;;  %v4701_v34 = vld [vmem:[#allocation2 + $0x468] sm:$0xf] }
  0xc2   :  { %1451 = vmatmul.bf16.vlgmr.msra.gmra.mxu0 %v5626_v55  ;;  %v4918_v58 = vld [vmem:[#allocation2 + $0x234] sm:$0xf0] }
  0xc3   :  { %v493_v47 = vpop.f32.mrf.mxu3  ;;  %v547_v50 = vmul.f32 0.01, %v482_v44  ;;  %v546_v0 = vmul.f32 0.01, %v454_v40  ;;  %1541 = vmatpush.bf16.msra.mxu0 %v4506_v48  ;;  %v4862_v48 = vld [vmem:[#allocation2 + $0x74] sm:$0xf0] }
  0xc4   :  { %v494_v52 = vadd.f32 %v493_v47, %v141_v35  ;;  %v4189_v47 = vld [vmem:[#allocation2 + $0x68] sm:$0xf] }
  0xc5   :  { %v557_v60 = vmax.f32 %v482_v44, %v547_v50  ;;  %v556_v10 = vmax.f32 %v454_v40, %v546_v0  ;;  %v4493_v44 = vld [vmem:[#allocation2 + $0x2c8] sm:$0xf]  ;;  %v4442_v50 = vor.u32 %v4923_v37, %v4439_v38  ;;  %v4190_v56 = vor.u32 %v4862_v48, %v4189_v47 }
  0xc6   :  { %v508_v3 = vadd.f32 %v507_v29, %v494_v52  ;;  %v4919_v52 = vld [vmem:[#allocation2 + $0x244] sm:$0xf]  ;;  %v4423_v29 = vld [vmem:[#allocation2 + $0x250] sm:$0xf0]  ;;  %v4494_v54 = vor.u32 %v4938_v41, %v4493_v44  ;;  %v4173_v0 = vld [vmem:[#allocation2 + $0x48] sm:$0xf] }
  0xc7   :  { %v5630_v4 = vpack.c.bf16 %v557_v60, %v552_v49  ;;  %v509_v17 = vpop.f32.mrf.mxu0  ;;  %v5633_v18 = vpack.c.bf16 %v556_v10, %v551_v9  ;;  %1542 = vmatpush.bf16.msra.mxu0 %v4490_v59  ;;  %v4975_v49 = vld [vmem:[#allocation2 + $0x404] sm:$0xf]  ;;  %v535_v60 = vpop.f32.mrf.mxu1  ;;  %v4407_v59 = vld [vmem:[#allocation2 + $0x230] sm:$0xf0]  ;;  %v4461_v9 = vld [vmem:[#allocation2 + $0x288] sm:$0xf] }
  0xc8   :  { %v543_v15 = vmul.f32 0.01, %v508_v3  ;;  %v4930_v10 = vld [vmem:[#allocation2 + $0x294] sm:$0xf0]  ;;  %v4410_v2 = vor.u32 %v4915_v6, %v4407_v59  ;;  %v4589_v41 = vld [vmem:[#allocation2 + $0x388] sm:$0xf]  ;;  %v4414_v59 = vor.u32 %v4918_v58, %v4413_v57 }
  0xc9   :  { %1479 = vmatmul.bf16.vlgmr.msrb.gmra.mxu3 %v5630_v4  ;;  %1465 = vmatmul.bf16.vlgmr.msrb.gmra.mxu1 %v5633_v18  ;;  %v4462_v20 = vor.u32 %v4930_v10, %v4461_v9  ;;  %v4982_v6 = vld [vmem:[#allocation2 + $0x434] sm:$0xf0]  ;;  %v4557_v9 = vld [vmem:[#allocation2 + $0x348] sm:$0xf] }
  0xca   :  { %1583 = vmatpush.bf16.msrb.mxu3 %v4254_v61  ;;  %1573 = vmatpush.bf16.msrb.mxu1 %v4698_v12  ;;  %v553_v31 = vmax.f32 %v508_v3, %v543_v15  ;;  %v4650_v61 = vor.u32 %v4975_v49, %v4647_v51  ;;  %v4426_v3 = vor.u32 %v4919_v52, %v4423_v29  ;;  %v4970_v12 = vld [vmem:[#allocation2 + $0x3d4] sm:$0xf0]  ;;  %v4381_v49 = vld [vmem:[#allocation2 + $0x1e8] sm:$0xf] }
  0xcb   :  { %v495_v1 = vpop.f32.mrf.mxu3  ;;  %1543 = vmatpush.bf16.msra.mxu0 %v4474_v21  ;;  %v4854_v15 = vld [vmem:[#allocation2 + $0x34] sm:$0xf0]  ;;  %v4685_v52 = vld [vmem:[#allocation2 + $0x448] sm:$0xf] }
  0xcc   :  { %v496_v16 = vadd.f32 %v495_v1, %v141_v35  ;;  %v4458_v35 = vor.u32 %v4927_v22, %v4455_v23  ;;  %v4174_v1 = vor.u32 %v4858_v5, %v4173_v0  ;;  %v4445_v22 = vld [vmem:[#allocation2 + $0x268] sm:$0xf]  ;;  %v4910_v51 = vld [vmem:[#allocation2 + $0x1f4] sm:$0xf0] }
  0xcd   :  { %v4986_v29 = vld [vmem:[#allocation2 + $0x454] sm:$0xf0]  ;;  %v4382_v62 = vor.u32 %v4910_v51, %v4381_v49  ;;  %v4365_v0 = vld [vmem:[#allocation2 + $0x1c8] sm:$0xf]  ;;  %v4964_v51 = vld [vmem:[#allocation2 + $0x3ac] sm:$0xf] }
  0xce   :  { %v510_v24 = vadd.f32 %v509_v17, %v496_v16  ;;  %1584 = vmatpush.bf16.msrb.mxu3 %v4238_v11  ;;  %1574 = vmatpush.bf16.msrb.mxu1 %v4682_v26  ;;  %v4621_v11 = vld [vmem:[#allocation2 + $0x3c8] sm:$0xf]  ;;  %v4911_v16 = vld [vmem:[#allocation2 + $0x204] sm:$0xf]  ;;  %v4391_v17 = vld [vmem:[#allocation2 + $0x210] sm:$0xf0]  ;;  %v4686_v63 = vor.u32 %v4986_v29, %v4685_v52 }
  0xcf   :  { %1544 = vmatpush.bf16.msra.mxu0 %v4458_v35  ;;  %v4622_v21 = vor.u32 %v4970_v12, %v4621_v11  ;;  %v4605_v26 = vld [vmem:[#allocation2 + $0x3a8] sm:$0xf]  ;;  %v4394_v28 = vor.u32 %v4911_v16, %v4391_v17  ;;  %v537_v33 = vpop.f32.mrf.mxu1  ;;  %v4990_v35 = vld [vmem:[#allocation2 + $0x474] sm:$0xf0]  ;;  %v4607_v52 = vld [vmem:[#allocation2 + $0x3b8] sm:$0xf0] }
  0xd0   :  { %v548_v32 = vmul.f32 0.01, %v510_v24  ;;  %v4702_v48 = vor.u32 %v4990_v35, %v4701_v34  ;;  %v4669_v5 = vld [vmem:[#allocation2 + $0x428] sm:$0xf]  ;;  %v4954_v10 = vld [vmem:[#allocation2 + $0x354] sm:$0xf0]  ;;  %v4610_v58 = vor.u32 %v4964_v51, %v4607_v52 }
  0xd1   :  { %v4670_v11 = vor.u32 %v4982_v6, %v4669_v5  ;;  %v4349_v12 = vld [vmem:[#allocation2 + $0x1a8] sm:$0xf]  ;;  %v4978_v17 = vld [vmem:[#allocation2 + $0x414] sm:$0xf0]  ;;  %v4968_v35 = vld [vmem:[#allocation2 + $0x3cc] sm:$0xf] }
  0xd2   :  { %v558_v39 = vmax.f32 %v510_v24, %v548_v32  ;;  %1585 = vmatpush.bf16.msrb.mxu3 %v4222_v25  ;;  %1575 = vmatpush.bf16.msrb.mxu1 %v4666_v46  ;;  %v4158_v24 = vor.u32 %v4854_v15, %v4157_v14  ;;  %v4926_v25 = vld [vmem:[#allocation2 + $0x274] sm:$0xf0]  ;;  %v4908_v14 = vld [vmem:[#allocation2 + $0x1ec] sm:$0xf]  ;;  %v4653_v16 = vld [vmem:[#allocation2 + $0x408] sm:$0xf] }
  0xd3   :  { %1545 = vmatpush.bf16.msra.mxu0 %v4442_v50  ;;  %v4850_v32 = vld [vmem:[#allocation2 + $0x14] sm:$0xf0]  ;;  %v4446_v38 = vor.u32 %v4926_v25, %v4445_v22  ;;  %v4639_v22 = vld [vmem:[#allocation2 + $0x3f8] sm:$0xf0] }
  0xd4   :  { %v5636_v45 = vpack.c.bf16 %v558_v39, %v553_v31  ;;  %v4141_v31 = vld [vmem:[#allocation2 + $0x8] sm:$0xf]  ;;  %v4606_v39 = vor.u32 %v4966_v27, %v4605_v26  ;;  %v4962_v46 = vld [vmem:[#allocation2 + $0x394] sm:$0xf0]  ;;  %v4654_v27 = vor.u32 %v4978_v17, %v4653_v16  ;;  %v4431_v52 = vld [vmem:[#allocation2 + $0x258] sm:$0xf0] }
  0xd5   :  { %v4142_v44 = vor.u32 %v4850_v32, %v4141_v31  ;;  %v4902_v15 = vld [vmem:[#allocation2 + $0x1b4] sm:$0xf0]  ;;  %v4333_v32 = vld [vmem:[#allocation2 + $0x188] sm:$0xf] }
  0xd6   :  { %1493 = vmatmul.bf16.vlgmr.msra.gmra.mxu2 %v5636_v45  ;;  %1586 = vmatpush.bf16.msrb.mxu3 %v4206_v43  ;;  %v521_v40 = vpop.f32.mrf.mxu2  ;;  %v4922_v43 = vld [vmem:[#allocation2 + $0x254] sm:$0xf0]  ;;  %v4350_v26 = vor.u32 %v4902_v15, %v4349_v12  ;;  %v4956_v12 = vld [vmem:[#allocation2 + $0x36c] sm:$0xf]  ;;  %v4269_v16 = vld [vmem:[#allocation2 + $0x108] sm:$0xf] }
  0xd7   :  { %1611 = vmatpush.bf16.msra.mxu2 %v4510_v42  ;;  %v522_v7 = vadd.f32 %v521_v40, %v142_v53  ;;  %1576 = vmatpush.bf16.msrb.mxu1 %v4650_v61  ;;  %v4429_v42 = vld [vmem:[#allocation2 + $0x248] sm:$0xf]  ;;  %v4958_v40 = vld [vmem:[#allocation2 + $0x374] sm:$0xf0] }
  0xd8   :  { %1546 = vmatpush.bf16.msra.mxu0 %v4426_v3  ;;  %v4430_v50 = vor.u32 %v4922_v43, %v4429_v42  ;;  %v4906_v3 = vld [vmem:[#allocation2 + $0x1d4] sm:$0xf0]  ;;  %v4317_v43 = vld [vmem:[#allocation2 + $0x168] sm:$0xf] }
  0xd9   :  { %1535 = vmatmul.bf16.vlgmr.msra.gmra.mxu3 %v5633_v18  ;;  %1521 = vmatmul.bf16.vlgmr.msra.gmra.mxu1 %v5626_v55  ;;  %v536_v19 = vadd.f32 %v535_v60, %v522_v7  ;;  %v4573_v60 = vld [vmem:[#allocation2 + $0x368] sm:$0xf]  ;;  %v4950_v25 = vld [vmem:[#allocation2 + $0x334] sm:$0xf0] }
  0xda   :  { %1587 = vmatpush.bf16.msrb.mxu3 %v4190_v56  ;;  %v4590_v56 = vor.u32 %v4962_v46, %v4589_v41  ;;  %v4574_v7 = vor.u32 %v4958_v40, %v4573_v60  ;;  %v4900_v46 = vld [vmem:[#allocation2 + $0x1ac] sm:$0xf]  ;;  %v4335_v40 = vld [vmem:[#allocation2 + $0x198] sm:$0xf0]  ;;  %v4882_v17 = vld [vmem:[#allocation2 + $0x114] sm:$0xf0] }
  0xdb   :  { %1612 = vmatpush.bf16.msra.mxu2 %v4494_v54  ;;  %1625 = vmatpush.bf16.msra.mxu1 %v4638_v8  ;;  %v544_v36 = vmul.f32 0.01, %v536_v19  ;;  %v4914_v8 = vld [vmem:[#allocation2 + $0x214] sm:$0xf0]  ;;  %v4896_v60 = vld [vmem:[#allocation2 + $0x18c] sm:$0xf] }
  0xdc   :  { %1547 = vmatpush.bf16.msra.mxu0 %v4410_v2  ;;  %v4383_v2 = vld [vmem:[#allocation2 + $0x1f8] sm:$0xf0]  ;;  %v4338_v6 = vor.u32 %v4896_v60, %v4335_v40  ;;  %v4916_v40 = vld [vmem:[#allocation2 + $0x22c] sm:$0xf] }
  0xde   :  { %1588 = vmatpush.bf16.msrb.mxu3 %v4174_v1  ;;  %v523_v23 = vpop.f32.mrf.mxu2  ;;  %v4366_v1 = vor.u32 %v4906_v3, %v4365_v0  ;;  %v4960_v0 = vld [vmem:[#allocation2 + $0x38c] sm:$0xf]  ;;  %v4591_v3 = vld [vmem:[#allocation2 + $0x398] sm:$0xf0] }
  0xdf   :  { %1613 = vmatpush.bf16.msra.mxu2 %v4478_v13  ;;  %v524_v30 = vadd.f32 %v523_v23, %v142_v53  ;;  %1626 = vmatpush.bf16.msra.mxu1 %v4622_v21  ;;  %v554_v53 = vmax.f32 %v536_v19, %v544_v36  ;;  %v4397_v13 = vld [vmem:[#allocation2 + $0x208] sm:$0xf]  ;;  %v4972_v21 = vld [vmem:[#allocation2 + $0x3ec] sm:$0xf]  ;;  %v4386_v23 = vor.u32 %v4908_v14, %v4383_v2  ;;  %v4623_v36 = vld [vmem:[#allocation2 + $0x3d8] sm:$0xf0] }
  0xe0   :  { %1548 = vmatpush.bf16.msra.mxu0 %v4394_v28  ;;  %v4398_v19 = vor.u32 %v4914_v8, %v4397_v13  ;;  %v4904_v28 = vld [vmem:[#allocation2 + $0x1cc] sm:$0xf]  ;;  %v4642_v31 = vor.u32 %v4972_v21, %v4639_v22  ;;  %v4626_v41 = vor.u32 %v4968_v35, %v4623_v36  ;;  %v4594_v8 = vor.u32 %v4960_v0, %v4591_v3  ;;  %v4575_v14 = vld [vmem:[#allocation2 + $0x378] sm:$0xf0] }
  0xe1   :  { %v538_v37 = vadd.f32 %v537_v33, %v524_v30  ;;  %v4367_v30 = vld [vmem:[#allocation2 + $0x1d8] sm:$0xf0]  ;;  %v4898_v33 = vld [vmem:[#allocation2 + $0x194] sm:$0xf0]  ;;  %v4888_v21 = vld [vmem:[#allocation2 + $0x14c] sm:$0xf] }
  0xe2   :  { %1589 = vmatpush.bf16.msrb.mxu3 %v4158_v24  ;;  %v4541_v24 = vld [vmem:[#allocation2 + $0x328] sm:$0xf]  ;;  %v4334_v42 = vor.u32 %v4898_v33, %v4333_v32  ;;  %v4303_v22 = vld [vmem:[#allocation2 + $0x158] sm:$0xf0]  ;;  %v4924_v36 = vld [vmem:[#allocation2 + $0x26c] sm:$0xf] }
  0xe3   :  { %1614 = vmatpush.bf16.msra.mxu2 %v4462_v20  ;;  %v549_v47 = vmul.f32 0.01, %v538_v37  ;;  %1627 = vmatpush.bf16.msra.mxu1 %v4606_v39  ;;  %v4558_v20 = vor.u32 %v4954_v10, %v4557_v9  ;;  %v4542_v34 = vor.u32 %v4950_v25, %v4541_v24  ;;  %v4946_v39 = vld [vmem:[#allocation2 + $0x314] sm:$0xf0]  ;;  %v4892_v9 = vld [vmem:[#allocation2 + $0x16c] sm:$0xf] }
  0xe4   :  { %v4319_v10 = vld [vmem:[#allocation2 + $0x178] sm:$0xf0]  ;;  %v4876_v25 = vld [vmem:[#allocation2 + $0xec] sm:$0xf] }
  0xe5   :  { %v559_v54 = vmax.f32 %v538_v37, %v549_v47  ;;  %v4370_v37 = vor.u32 %v4904_v28, %v4367_v30  ;;  %v4351_v47 = vld [vmem:[#allocation2 + $0x1b8] sm:$0xf0]  ;;  %v4322_v15 = vor.u32 %v4892_v9, %v4319_v10  ;;  %v4270_v30 = vor.u32 %v4882_v17, %v4269_v16  ;;  %v4864_v0 = vld [vmem:[#allocation2 + $0x8c] sm:$0xf] }
  0xe6   :  { %1563 = vmatmul.bf16.vlgmr.msrb.gmra.mxu2 %v5636_v45  ;;  %1590 = vmatpush.bf16.msrb.mxu3 %v4142_v44  ;;  %v4894_v44 = vld [vmem:[#allocation2 + $0x174] sm:$0xf0]  ;;  %v4463_v24 = vld [vmem:[#allocation2 + $0x298] sm:$0xf0]  ;;  %v4848_v16 = vld [vmem:[#allocation2 + $0xc] sm:$0xf] }
  0xe7   :  { %1615 = vmatpush.bf16.msra.mxu2 %v4446_v38  ;;  %v5643_v61 = vpack.c.bf16 %v559_v54, %v554_v53  ;;  %1628 = vmatpush.bf16.msra.mxu1 %v4590_v56  ;;  %v4525_v38 = vld [vmem:[#allocation2 + $0x308] sm:$0xf]  ;;  %v4318_v29 = vor.u32 %v4894_v44, %v4317_v43  ;;  %v4354_v53 = vor.u32 %v4900_v46, %v4351_v47  ;;  %v4890_v56 = vld [vmem:[#allocation2 + $0x154] sm:$0xf0]  ;;  %v4559_v28 = vld [vmem:[#allocation2 + $0x358] sm:$0xf0] }
  0xe8   :  { %v4526_v49 = vor.u32 %v4946_v39, %v4525_v38  ;;  %v4301_v54 = vld [vmem:[#allocation2 + $0x148] sm:$0xf]  ;;  %v4287_v35 = vld [vmem:[#allocation2 + $0x138] sm:$0xf0]  ;;  %v4872_v39 = vld [vmem:[#allocation2 + $0xcc] sm:$0xf] }
  0xe9   :  { %4707 = vmatmul.msk.bf16.vlgmr.msrb.gmra.mxu0 %vm1439_vm3, %v5643_v61  ;;  %1591 = vmatmul.bf16.vlgmr.msrb.gmra.mxu3 %v5626_v55  ;;  %v4302_v5 = vor.u32 %v4890_v56, %v4301_v54  ;;  %v4447_v38 = vld [vmem:[#allocation2 + $0x278] sm:$0xf0]  ;;  %v4948_v43 = vld [vmem:[#allocation2 + $0x32c] sm:$0xf] }
  0xea   :  { %1643 = vmatpush.bf16.msra.mxu3 %v4702_v48  ;;  %1597 = vmatpush.bf16.msrb.mxu0 %v4382_v62  ;;  %v4940_v48 = vld [vmem:[#allocation2 + $0x2ec] sm:$0xf]  ;;  %v4543_v44 = vld [vmem:[#allocation2 + $0x338] sm:$0xf0]  ;;  %v4450_v46 = vor.u32 %v4924_v36, %v4447_v38  ;;  %v1765_v36 = vld [vmem:[%s6663_s6 + $0x40] sm:$0xff] }
  0xeb   :  { %1616 = vmatpush.bf16.msra.mxu2 %v4430_v50  ;;  %4708 = vmatmul.msk.bf16.vlgmr.msrb.gmra.mxu1 %vm1439_vm3, %v5643_v61  ;;  %v4511_v50 = vld [vmem:[#allocation2 + $0x2f8] sm:$0xf0]  ;;  %v4936_v62 = vld [vmem:[#allocation2 + $0x2cc] sm:$0xf]  ;;  %v4546_v51 = vor.u32 %v4948_v43, %v4543_v44  ;;  %v1787_v43 = vld [vmem:[%s6663_s6 + $0xf0] sm:$0xff] }
  0xec   :  { %1629 = vmatpush.bf16.msra.mxu1 %v4574_v7  ;;  %v4514_v57 = vor.u32 %v4940_v48, %v4511_v50  ;;  %v4886_v7 = vld [vmem:[#allocation2 + $0x134] sm:$0xf0]  ;;  %v4880_v48 = vld [vmem:[#allocation2 + $0x10c] sm:$0xf]  ;;  %v4527_v56 = vld [vmem:[#allocation2 + $0x318] sm:$0xf0] }
  0xed   :  { %v4920_v50 = vld [vmem:[#allocation2 + $0x24c] sm:$0xf]  ;;  %v4207_v3 = vld [vmem:[#allocation2 + $0x98] sm:$0xf0] }
  0xee   :  { %1644 = vmatpush.bf16.msra.mxu3 %v4686_v63  ;;  %1598 = vmatpush.bf16.msrb.mxu0 %v4366_v1  ;;  %v4495_v63 = vld [vmem:[#allocation2 + $0x2d8] sm:$0xf0]  ;;  %v4932_v1 = vld [vmem:[#allocation2 + $0x2ac] sm:$0xf] }
  0xef   :  { %1617 = vmatpush.bf16.msra.mxu2 %v4414_v59  ;;  %v4285_v59 = vld [vmem:[#allocation2 + $0x128] sm:$0xf]  ;;  %v4498_v13 = vor.u32 %v4936_v62, %v4495_v63  ;;  %v4944_v54 = vld [vmem:[#allocation2 + $0x30c] sm:$0xf]  ;;  %v4415_v63 = vld [vmem:[#allocation2 + $0x238] sm:$0xf0] }
  0xf0   :  { %1630 = vmatpush.bf16.msra.mxu1 %v4558_v20  ;;  %v4286_v2 = vor.u32 %v4886_v7, %v4285_v59  ;;  %v4578_v20 = vor.u32 %v4956_v12, %v4575_v14  ;;  %v4530_v62 = vor.u32 %v4944_v54, %v4527_v56  ;;  %v4912_v59 = vld [vmem:[#allocation2 + $0x20c] sm:$0xf]  ;;  %v4399_v7 = vld [vmem:[#allocation2 + $0x218] sm:$0xf0]  ;;  %v1781_v54 = vld [vmem:[%s6663_s6 + $0xc0] sm:$0xff] }
  0xf1   :  { %v4402_v9 = vor.u32 %v4912_v59, %v4399_v7  ;;  %v4852_v14 = vld [vmem:[#allocation2 + $0x2c] sm:$0xf]  ;;  %v4143_v17 = vld [vmem:[#allocation2 + $0x18] sm:$0xf0] }
  0xf2   :  { %1645 = vmatpush.bf16.msra.mxu3 %v4670_v11  ;;  %1599 = vmatpush.bf16.msrb.mxu0 %v4350_v26  ;;  %v4479_v11 = vld [vmem:[#allocation2 + $0x2b8] sm:$0xf0]  ;;  %v1762_v38 = vld [vmem:[%s6663_s6 + $0x28] sm:$0xff] }
  0xf3   :  { %1618 = vmatpush.bf16.msra.mxu2 %v4398_v19  ;;  %v4482_v19 = vor.u32 %v4932_v1, %v4479_v11  ;;  %v4255_v26 = vld [vmem:[#allocation2 + $0xf8] sm:$0xf0]  ;;  %v4856_v1 = vld [vmem:[#allocation2 + $0x4c] sm:$0xf] }
  0xf4   :  { %1631 = vmatpush.bf16.msra.mxu1 %v4542_v34  ;;  %v4258_v33 = vor.u32 %v4876_v25, %v4255_v26  ;;  %v4884_v34 = vld [vmem:[#allocation2 + $0x12c] sm:$0xf]  ;;  %v4175_v11 = vld [vmem:[#allocation2 + $0x58] sm:$0xf0] }
  0xf5   :  { %v4178_v12 = vor.u32 %v4856_v1, %v4175_v11  ;;  %v4671_v25 = vld [vmem:[#allocation2 + $0x438] sm:$0xf0]  ;;  %v4976_v26 = vld [vmem:[#allocation2 + $0x40c] sm:$0xf] }
  0xf6   :  { %1646 = vmatpush.bf16.msra.mxu3 %v4654_v27  ;;  %1619 = vmatmul.bf16.vlgmr.msra.gmra.mxu2 %v5630_v4  ;;  %v4952_v27 = vld [vmem:[#allocation2 + $0x34c] sm:$0xf]  ;;  %v1760_v44 = vld [vmem:[%s6663_s6 + $0x18] sm:$0xff] }
  0xf7   :  { %1667 = vmatpush.bf16.msrb.mxu2 %v4386_v23  ;;  %1600 = vmatpush.bf16.msrb.mxu0 %v4334_v42  ;;  %v4928_v23 = vld [vmem:[#allocation2 + $0x28c] sm:$0xf]  ;;  %v4239_v42 = vld [vmem:[#allocation2 + $0xd8] sm:$0xf0] }
  0xf8   :  { %1632 = vmatpush.bf16.msra.mxu1 %v4526_v49  ;;  %v4466_v32 = vor.u32 %v4928_v23, %v4463_v24  ;;  %v4242_v47 = vor.u32 %v4872_v39, %v4239_v42  ;;  %v4271_v49 = vld [vmem:[#allocation2 + $0x118] sm:$0xf0]  ;;  %v4980_v24 = vld [vmem:[#allocation2 + $0x42c] sm:$0xf]  ;;  %v1761_v42 = vld [vmem:[%s6663_s6 + $0x20] sm:$0xff] }
  0xf9   :  { %1549 = vmatmul.bf16.vlgmr.msra.gmra.mxu0 %v5630_v4  ;;  %4709 = vmatmul.msk.bf16.vlgmr.msra.gmra.mxu3 %vm1439_vm3, %v5643_v61  ;;  %v1788_v39 = vld [vmem:[%s6663_s6 + $0xf8] sm:$0xff]  ;;  %v1802_v59 = vld [vmem:[%s6663_s6 + $0x168] sm:$0xff] }
  0xfa   :  { %1695 = vmatpush.bf16.msrb.mxu3 %v4642_v31  ;;  %v4306_v31 = vor.u32 %v4888_v21, %v4303_v22  ;;  %v4984_v22 = vld [vmem:[#allocation2 + $0x44c] sm:$0xf]  ;;  %v1780_v56 = vld [vmem:[%s6663_s6 + $0xb8] sm:$0xff] }
  0xfb   :  { %1668 = vmatpush.bf16.msrb.mxu2 %v4370_v37  ;;  %1601 = vmatpush.bf16.msrb.mxu0 %v4318_v29  ;;  %v4562_v37 = vor.u32 %v4952_v27, %v4559_v28  ;;  %v4868_v29 = vld [vmem:[#allocation2 + $0xac] sm:$0xf]  ;;  %v4655_v27 = vld [vmem:[#allocation2 + $0x418] sm:$0xf0] }
  0xfc   :  { %1681 = vmatpush.bf16.msrb.mxu1 %v4514_v57  ;;  %v4274_v57 = vor.u32 %v4880_v48, %v4271_v49  ;;  %v1772_v28 = vld [vmem:[%s6663_s6 + $0x78] sm:$0xff]  ;;  %v1758_v48 = vld [vmem:[%s6663_s6 + $0x8] sm:$0xff] }
  0xfd   :  { %1633 = vmatmul.bf16.vlgmr.msra.gmra.mxu1 %v5636_v45  ;;  %v1784_v49 = vld [vmem:[%s6663_s6 + $0xd8] sm:$0xff] }
  0xfe   :  { %1696 = vmatpush.bf16.msrb.mxu3 %v4626_v41  ;;  %v4290_v41 = vor.u32 %v4884_v34, %v4287_v35  ;;  %v1767_v34 = vld [vmem:[%s6663_s6 + $0x50] sm:$0xff]  ;;  %v1766_v35 = vld [vmem:[%s6663_s6 + $0x48] sm:$0xff]  ;;  %v1776_v7 = vld [vmem:[%s6663_s6 + $0x98] sm:$0xff] }
  0xff   :  { %1669 = vmatpush.bf16.msrb.mxu2 %v4354_v53  ;;  %1602 = vmatpush.bf16.msrb.mxu0 %v4302_v5  ;;  %v4223_v53 = vld [vmem:[#allocation2 + $0xb8] sm:$0xf0]  ;;  %v4418_v5 = vor.u32 %v4916_v40, %v4415_v63  ;;  %v5746_v40 = vld [vmem:[%s6661_s4] sm:$0xf]  ;;  %v1778_v63 = vld [vmem:[%s6663_s6 + $0xa8] sm:$0xff] }
 0x100   :  { %1682 = vmatpush.bf16.msrb.mxu1 %v4498_v13  ;;  %v4226_v60 = vor.u32 %v4868_v29, %v4223_v53  ;;  %v4860_v13 = vld [vmem:[#allocation2 + $0x6c] sm:$0xf] }
 0x101   :  { %v1782_v53 = vld [vmem:[%s6663_s6 + $0xc8] sm:$0xff] }
 0x102   :  { %1697 = vmatpush.bf16.msrb.mxu3 %v4610_v58  ;;  %v4434_v58 = vor.u32 %v4920_v50, %v4431_v52  ;;  %v1783_v52 = vld [vmem:[%s6663_s6 + $0xd0] sm:$0xff] }
 0x103   :  { %1670 = vmatpush.bf16.msrb.mxu2 %v4338_v6  ;;  %1603 = vmatpush.bf16.msrb.mxu0 %v4286_v2  ;;  %v4210_v6 = vor.u32 %v4864_v0, %v4207_v3  ;;  %v4159_v2 = vld [vmem:[#allocation2 + $0x38] sm:$0xf0]  ;;  %v1803_v0 = vld [vmem:[%s6663_s6 + $0x170] sm:$0xff] }
 0x104   :  { %1683 = vmatpush.bf16.msrb.mxu1 %v4482_v19  ;;  %v4703_v19 = vld [vmem:[#allocation2 + $0x478] sm:$0xf0] }
 0x106   :  { %1698 = vmatpush.bf16.msrb.mxu3 %v4594_v8  ;;  %v4191_v8 = vld [vmem:[#allocation2 + $0x78] sm:$0xf0] }
 0x107   :  { %1671 = vmatpush.bf16.msrb.mxu2 %v4322_v15  ;;  %1604 = vmatpush.bf16.msrb.mxu0 %v4270_v30  ;;  %v4194_v10 = vor.u32 %v4860_v13, %v4191_v8  ;;  %v4162_v15 = vor.u32 %v4852_v14, %v4159_v2  ;;  %v1771_v30 = vld [vmem:[%s6663_s6 + $0x70] sm:$0xff]  ;;  %v1801_v13 = vld [vmem:[%s6663_s6 + $0x160] sm:$0xff]  ;;  %v1774_v14 = vld [vmem:[%s6663_s6 + $0x88] sm:$0xff] }
 0x108   :  { %1684 = vmatpush.bf16.msrb.mxu1 %v4466_v32  ;;  %v1769_v32 = vld [vmem:[%s6663_s6 + $0x60] sm:$0xff]  ;;  %v1799_v2 = vld [vmem:[%s6663_s6 + $0x150] sm:$0xff] }
 0x10a   :  { %1699 = vmatpush.bf16.msrb.mxu3 %v4578_v20  ;;  %1605 = vmatmul.bf16.vlgmr.msrb.gmra.mxu0 %v5633_v18  ;;  %v4146_v20 = vor.u32 %v4848_v16, %v4143_v17  ;;  %v1773_v16 = vld [vmem:[%s6663_s6 + $0x80] sm:$0xff]  ;;  %v1798_v17 = vld [vmem:[%s6663_s6 + $0x148] sm:$0xff] }
 0x10b   :  { %1672 = vmatpush.bf16.msrb.mxu2 %v4306_v31  ;;  %1653 = vmatpush.bf16.msra.mxu0 %v4258_v33  ;;  %v4658_v31 = vor.u32 %v4976_v26, %v4655_v27  ;;  %v1768_v33 = vld [vmem:[%s6663_s6 + $0x58] sm:$0xff] }
 0x10c   :  { %1685 = vmatpush.bf16.msrb.mxu1 %v4450_v46  ;;  %v1759_v46 = vld [vmem:[%s6663_s6 + $0x10] sm:$0xff] }
 0x10e   :  { %1700 = vmatpush.bf16.msrb.mxu3 %v4562_v37  ;;  %v1764_v37 = vld [vmem:[%s6663_s6 + $0x38] sm:$0xff] }
 0x10f   :  { %1673 = vmatpush.bf16.msrb.mxu2 %v4290_v41  ;;  %1654 = vmatpush.bf16.msra.mxu0 %v4242_v47  ;;  %v1786_v41 = vld [vmem:[%s6663_s6 + $0xe8] sm:$0xff]  ;;  %v1785_v47 = vld [vmem:[%s6663_s6 + $0xe0] sm:$0xff] }
 0x110   :  { %1686 = vmatpush.bf16.msrb.mxu1 %v4434_v58  ;;  %v1779_v58 = vld [vmem:[%s6663_s6 + $0xb0] sm:$0xff] }
 0x112   :  { %1701 = vmatpush.bf16.msrb.mxu3 %v4546_v51  ;;  %v1757_v51 = vld [vmem:[%s6663_s6] sm:$0xff] }
 0x113   :  { %1674 = vmatpush.bf16.msrb.mxu2 %v4274_v57  ;;  %1655 = vmatpush.bf16.msra.mxu0 %v4226_v60  ;;  %v1804_v60 = vld [vmem:[%s6663_s6 + $0x178] sm:$0xff] }
 0x114   :  { %1687 = vmatpush.bf16.msrb.mxu1 %v4418_v5  ;;  %v711_v5 = vperm.slane %v5746_v40, 0 }
 0x116   :  { %1702 = vmatpush.bf16.msrb.mxu3 %v4530_v62  ;;  %1675 = vmatmul.bf16.vlgmr.msrb.gmra.mxu2 %v5633_v18  ;;  %v4988_v18 = vld [vmem:[#allocation2 + $0x46c] sm:$0xf] }
 0x117   :  { %1656 = vmatpush.bf16.msra.mxu0 %v4210_v6  ;;  %v4706_v21 = vor.u32 %v4988_v18, %v4703_v19  ;;  %1821 = vmatpush.msra.mxu2 %v1772_v28  ;;  %v1777_v6 = vld [vmem:[%s6663_s6 + $0xa0] sm:$0xff]  ;;  %v1794_v28 = vld [vmem:[%s6663_s6 + $0x128] sm:$0xff] }
 0x118   :  { %1688 = vmatpush.bf16.msrb.mxu1 %v4402_v9  ;;  %v1775_v9 = vld [vmem:[%s6663_s6 + $0x90] sm:$0xff]  ;;  %v1797_v18 = vld [vmem:[%s6663_s6 + $0x140] sm:$0xff] }
 0x119   :  { %1703 = vmatmul.bf16.vlgmr.msrb.gmra.mxu3 %v5636_v45  ;;  %v4687_v45 = vld [vmem:[#allocation2 + $0x458] sm:$0xf0]  ;;  %1822 = vmatpush.msra.mxu2 %v1771_v30 }
 0x11a   :  { %v4690_v23 = vor.u32 %v4984_v22, %v4687_v45  ;;  %1867 = vmatpush.msra.mxu3 %v1804_v60 }
 0x11b   :  { %1657 = vmatpush.bf16.msra.mxu0 %v4194_v10  ;;  %1689 = vmatmul.bf16.vlgmr.msrb.gmra.mxu1 %v5630_v4  ;;  %v4674_v4 = vor.u32 %v4980_v24, %v4671_v25  ;;  %v1800_v10 = vld [vmem:[%s6663_s6 + $0x158] sm:$0xff] }
 0x11c   :  { %1844 = vmatpush.msra.mxu1 %v1788_v39  ;;  %1868 = vmatpush.msra.mxu3 %v1803_v0 }
 0x11e   :  { %1845 = vmatpush.msra.mxu1 %v1787_v43  ;;  %1869 = vmatpush.msra.mxu3 %v1802_v59  ;;  %v1790_v43 = vld [vmem:[%s6663_s6 + $0x108] sm:$0xff] }
 0x11f   :  { %1658 = vmatpush.bf16.msra.mxu0 %v4178_v12 }
 0x120   :  { %1846 = vmatpush.msra.mxu1 %v1786_v41  ;;  %1870 = vmatpush.msra.mxu3 %v1801_v13  ;;  %v1818_v13 = vld [vmem:[%s6663_s6 + $0x1e8] sm:$0xff] }
 0x122   :  { %1847 = vmatpush.msra.mxu1 %v1785_v47  ;;  %1871 = vmatpush.msra.mxu3 %v1800_v10 }
 0x123   :  { %1659 = vmatpush.bf16.msra.mxu0 %v4162_v15 }
 0x124   :  { %1848 = vmatpush.msra.mxu1 %v1784_v49  ;;  %1872 = vmatpush.msra.mxu3 %v1799_v2  ;;  %v1816_v2 = vld [vmem:[%s6663_s6 + $0x1d8] sm:$0xff] }
 0x126   :  { %1849 = vmatpush.msra.mxu1 %v1783_v52  ;;  %1873 = vmatpush.msra.mxu3 %v1798_v17  ;;  %v1754_v52 = vld [vmem:[%s6662_s5 + $0x78] sm:$0xff] }
 0x127   :  { %1660 = vmatpush.bf16.msra.mxu0 %v4146_v20 }
 0x128   :  { %1850 = vmatpush.msra.mxu1 %v1782_v53  ;;  %1874 = vmatpush.msra.mxu3 %v1797_v18  ;;  %v1820_v53 = vld [vmem:[%s6663_s6 + $0x1f8] sm:$0xff]  ;;  %v1815_v18 = vld [vmem:[%s6663_s6 + $0x1d0] sm:$0xff] }
 0x12a   :  { %1661 = vmatmul.bf16.vlgmr.msra.gmra.mxu0 %v5626_v55  ;;  %v1770_v55 = vld [vmem:[%s6663_s6 + $0x68] sm:$0xff]  ;;  %1851 = vmatpush.msra.mxu1 %v1781_v54 }
 0x12b   :  { %1713 = vmatpush.bf16.msrb.mxu0 %v4706_v21  ;;  %1823 = vmatpush.msra.mxu2 %v1770_v55  ;;  %v1796_v21 = vld [vmem:[%s6663_s6 + $0x138] sm:$0xff] }
 0x12c   :  { %1852 = vmatpush.msra.mxu1 %v1780_v56  ;;  %1875 = vmatpush.msra.mxu3 %v1796_v21 }
 0x12d   :  { %1824 = vmatpush.msra.mxu2 %v1769_v32  ;;  %v1793_v32 = vld [vmem:[%s6663_s6 + $0x120] sm:$0xff] }
 0x12e   :  { %1853 = vmatpush.msra.mxu1 %v1779_v58 }
 0x12f   :  { %1714 = vmatpush.bf16.msrb.mxu0 %v4690_v23  ;;  %1825 = vmatpush.msra.mxu2 %v1768_v33 }
 0x130   :  { %1854 = vmatpush.msra.mxu1 %v1778_v63  ;;  %v1751_v63 = vld [vmem:[%s6662_s5 + $0x60] sm:$0xff] }
 0x131   :  { %1826 = vmatpush.msra.mxu2 %v1767_v34  ;;  %v712_v34 = vperm.slane %v5746_v40, 1 }
 0x132   :  { %1855 = vmatpush.msra.mxu1 %v1777_v6 }
 0x133   :  { %1715 = vmatpush.bf16.msrb.mxu0 %v4674_v4  ;;  %1827 = vmatpush.msra.mxu2 %v1766_v35  ;;  %v1795_v4 = vld [vmem:[%s6663_s6 + $0x130] sm:$0xff] }
 0x134   :  { %1856 = vmatpush.msra.mxu1 %v1776_v7  ;;  %1876 = vmatpush.msra.mxu3 %v1795_v4  ;;  %v1745_v4 = vld [vmem:[%s6662_s5 + $0x30] sm:$0xff] }
 0x135   :  { %1828 = vmatpush.msra.mxu2 %v1765_v36  ;;  %v1792_v36 = vld [vmem:[%s6663_s6 + $0x118] sm:$0xff] }
 0x136   :  { %1857 = vmatpush.msra.mxu1 %v1775_v9  ;;  %1877 = vmatpush.msra.mxu3 %v1794_v28  ;;  %v1817_v9 = vld [vmem:[%s6663_s6 + $0x1e0] sm:$0xff] }
 0x137   :  { %1716 = vmatpush.bf16.msrb.mxu0 %v4658_v31  ;;  %1829 = vmatpush.msra.mxu2 %v1764_v37 }
 0x138   :  { %1858 = vmatpush.msra.mxu1 %v1774_v14  ;;  %1878 = vmatpush.msra.mxu3 %v1793_v32 }
 0x13a   :  { %4710 = vmatmul.msk.bf16.vlgmr.msrb.gmra.mxu0 %vm1439_vm3, %v5643_v61  ;;  %v1763_v61 = vld [vmem:[%s6663_s6 + $0x30] sm:$0xff]  ;;  %1859 = vmatpush.msra.mxu1 %v1773_v16 }
 0x13b   :  { %1830 = vmatpush.msra.mxu2 %v1763_v61  ;;  %1879 = vmatpush.msra.mxu3 %v1792_v36 }
 0x13c   :  { %1890 = vmatpush.msra.mxu0 %v1820_v53  ;;  %v1807_v53 = vld [vmem:[%s6663_s6 + $0x190] sm:$0xff] }
 0x13d   :  { %1831 = vmatpush.msra.mxu2 %v1762_v38  ;;  %v1791_v38 = vld [vmem:[%s6663_s6 + $0x110] sm:$0xff] }
 0x13e   :  { %1880 = vmatpush.msra.mxu3 %v1791_v38  ;;  %v1742_v38 = vld [vmem:[%s6662_s5 + $0x18] sm:$0xff] }
 0x13f   :  { %1832 = vmatpush.msra.mxu2 %v1761_v42  ;;  %v1452_v57 = vpop.f32.mrf.mxu0 }
 0x140   :  { %v1453_v8 = vadd.f32 %v1452_v57, %v711_v5  ;;  %1881 = vmatpush.msra.mxu3 %v1790_v43  ;;  %v1752_v57 = vld [vmem:[%s6662_s5 + $0x68] sm:$0xff]  ;;  %v1809_v43 = vld [vmem:[%s6663_s6 + $0x1a0] sm:$0xff] }
 0x141   :  { %1833 = vmatpush.msra.mxu2 %v1760_v44 }
 0x143   :  { %1834 = vmatpush.msra.mxu2 %v1759_v46  ;;  %v1789_v46 = vld [vmem:[%s6663_s6 + $0x100] sm:$0xff] }
 0x144   :  { %1882 = vmatpush.msra.mxu3 %v1789_v46 }
 0x145   :  { %1835 = vmatpush.msra.mxu2 %v1758_v48 }
 0x146   :  { %v1466_v50 = vpop.f32.mrf.mxu1 }
 0x147   :  { %1836 = vmatpush.msra.mxu2 %v1757_v51  ;;  %v1454_v1 = vpop.f32.mrf.mxu0  ;;  %v1467_v12 = vadd.f32 %v1466_v50, %v1453_v8  ;;  %v1750_v8 = vld [vmem:[%s6662_s5 + $0x58] sm:$0xff] }
 0x148   :  { %v1455_v22 = vadd.f32 %v1454_v1, %v711_v5  ;;  %v1749_v1 = vld [vmem:[%s6662_s5 + $0x50] sm:$0xff] }
 0x149   :  { %1922 = vmatpush.msrb.mxu2 %v1754_v52 }
 0x14c   :  { %v1480_v29 = vpop.f32.mrf.mxu3 }
 0x14d   :  { %v1481_v20 = vadd.f32 %v1480_v29, %v1467_v12  ;;  %v1753_v29 = vld [vmem:[%s6662_s5 + $0x70] sm:$0xff] }
 0x14e   :  { %v1468_v62 = vpop.f32.mrf.mxu1  ;;  %1923 = vmatpush.msrb.mxu2 %v1753_v29 }
 0x14f   :  { %v1469_v24 = vadd.f32 %v1468_v62, %v1455_v22  ;;  %v1819_v62 = vld [vmem:[%s6663_s6 + $0x1f0] sm:$0xff]  ;;  %v1814_v22 = vld [vmem:[%s6663_s6 + $0x1c8] sm:$0xff] }
 0x150   :  { %1924 = vmatpush.msrb.mxu2 %v1752_v57  ;;  %1891 = vmatpush.msra.mxu0 %v1819_v62  ;;  %v5132_v57 = vld [vmem:[%s6682_s20] sm:$0xff] }
 0x151   :  { %v1805_v62 = vld [vmem:[%s6663_s6 + $0x180] sm:$0xff] }
 0x152   :  { %1925 = vmatpush.msrb.mxu2 %v1751_v63  ;;  %1892 = vmatpush.msra.mxu0 %v1818_v13 }
 0x154   :  { %v1482_v3 = vpop.f32.mrf.mxu3  ;;  %1926 = vmatpush.msrb.mxu2 %v1750_v8  ;;  %1893 = vmatpush.msra.mxu0 %v1817_v9 }
 0x155   :  { %v1483_v31 = vadd.f32 %v1482_v3, %v1469_v24 }
 0x156   :  { %v1522_v15 = vpop.f32.mrf.mxu1  ;;  %1927 = vmatpush.msrb.mxu2 %v1749_v1  ;;  %1894 = vmatpush.msra.mxu0 %v1816_v2 }
 0x157   :  { %v1523_v39 = vadd.f32 %v1522_v15, %v712_v34  ;;  %v1748_v15 = vld [vmem:[%s6662_s5 + $0x48] sm:$0xff] }
 0x158   :  { %1928 = vmatpush.msrb.mxu2 %v1748_v15  ;;  %1895 = vmatpush.msra.mxu0 %v1815_v18 }
 0x159   :  { %v1494_v11 = vpop.f32.mrf.mxu2 }
 0x15a   :  { %v1495_v45 = vadd.f32 %v1494_v11, %v1481_v20  ;;  %v713_v11 = vperm.slane %v5746_v40, 2  ;;  %1896 = vmatpush.msra.mxu0 %v1814_v22 }
 0x15c   :  { %v1536_v19 = vpop.f32.mrf.mxu3 }
 0x15d   :  { %v1537_v48 = vadd.f32 %v1536_v19, %v1523_v39  ;;  %v1747_v19 = vld [vmem:[%s6662_s5 + $0x40] sm:$0xff] }
 0x15e   :  { %v1524_v30 = vpop.f32.mrf.mxu1  ;;  %1929 = vmatpush.msrb.mxu2 %v1747_v19 }
 0x15f   :  { %v1525_v54 = vadd.f32 %v1524_v30, %v712_v34  ;;  %v1811_v34 = vld [vmem:[%s6663_s6 + $0x1b0] sm:$0xff] }
 0x161   :  { %v1496_v26 = vpop.f32.mrf.mxu2 }
 0x162   :  { %v1497_v35 = vadd.f32 %v1496_v26, %v1483_v31  ;;  %v1812_v31 = vld [vmem:[%s6663_s6 + $0x1b8] sm:$0xff] }
 0x164   :  { %v1538_v33 = vpop.f32.mrf.mxu3 }
 0x165   :  { %v1539_v0 = vadd.f32 %v1538_v33, %v1525_v54  ;;  %v1739_v54 = vld [vmem:[%s6662_s5] sm:$0xff] }
 0x166   :  { %v1508_v23 = vpop.f32.mrf.mxu0 }
 0x167   :  { %v1509_v25 = vadd.f32 %v1508_v23, %v1495_v45  ;;  %v1746_v45 = vld [vmem:[%s6662_s5 + $0x38] sm:$0xff] }
 0x168   :  { %v1578_v47 = vpop.f32.mrf.mxu1  ;;  %1930 = vmatpush.msrb.mxu2 %v1746_v45 }
 0x169   :  { %v1723_v27 = vmul.f32 0.01, %v1509_v25  ;;  %v1564_v44 = vpop.f32.mrf.mxu2 }
 0x16a   :  { %1931 = vmatpush.msrb.mxu2 %v1745_v4  ;;  %v1988_v4 = vld [vmem:[%s6665_s8 + $0x18] sm:$0xff] }
 0x16b   :  { %v1731_v55 = vmax.f32 %v1509_v25, %v1723_v27  ;;  %v1813_v25 = vld [vmem:[%s6663_s6 + $0x1c0] sm:$0xff]  ;;  %2016 = vmatpush.msrb.mxu3 %v1988_v4 }
 0x16c   :  { %v1592_v49 = vpop.f32.mrf.mxu3  ;;  %1897 = vmatpush.msra.mxu0 %v1813_v25 }
 0x16d   :  { %1837 = vmatmul.f32.vlgmr.msra.gmra.mxu2 %v1731_v55  ;;  %v1593_v16 = vadd.f32 %v1592_v49, %v713_v11  ;;  %v1744_v55 = vld [vmem:[%s6662_s5 + $0x28] sm:$0xff] }
 0x16e   :  { %v1510_v37 = vpop.f32.mrf.mxu0  ;;  %1898 = vmatpush.msra.mxu0 %v1812_v31  ;;  %1932 = vmatpush.msrb.mxu2 %v1744_v55  ;;  %v5952_v31 = vld [vmem:[%s6666_s9 + $0x10] sm:$0xff] }
 0x16f   :  { %v1511_v61 = vadd.f32 %v1510_v37, %v1497_v35  ;;  %v1743_v35 = vld [vmem:[%s6662_s5 + $0x20] sm:$0xff]  ;;  %v1756_v37 = vld [vmem:[%s6662_s5 + $0x88] sm:$0x7f] }
 0x170   :  { %v1580_v5 = vpop.f32.mrf.mxu1  ;;  %1899 = vmatpush.msra.mxu0 %v1811_v34  ;;  %1933 = vmatpush.msrb.mxu2 %v1743_v35  ;;  %v1989_v34 = vld [vmem:[%s6666_s9] sm:$0xff] }
 0x171   :  { %v1727_v42 = vmul.f32 0.01, %v1511_v61  ;;  %v1566_v60 = vpop.f32.mrf.mxu2  ;;  %4711 = vmatpush.msk.msrb.mxu1 %vm381_vm0, %v1756_v37 }
 0x172   :  { %1934 = vmatpush.msrb.mxu2 %v1742_v38 }
 0x173   :  { %v1735_v41 = vmax.f32 %v1511_v61, %v1727_v42  ;;  %v1810_v61 = vld [vmem:[%s6663_s6 + $0x1a8] sm:$0xff] }
 0x174   :  { %v1594_v10 = vpop.f32.mrf.mxu3  ;;  %1900 = vmatpush.msra.mxu0 %v1810_v61 }
 0x175   :  { %1840 = vmatmul.f32.gmra.mxu2 %v1735_v41  ;;  %v1595_v32 = vadd.f32 %v1594_v10, %v713_v11 }
 0x176   :  { %v1550_v50 = vpop.f32.mrf.mxu0  ;;  %1901 = vmatpush.msra.mxu0 %v1809_v43 }
 0x177   :  { %v1551_v51 = vadd.f32 %v1550_v50, %v1537_v48  ;;  %v1808_v50 = vld [vmem:[%s6663_s6 + $0x198] sm:$0xff] }
 0x178   :  { %1902 = vmatpush.msra.mxu0 %v1808_v50 }
 0x179   :  { %v1565_v56 = vadd.f32 %v1564_v44, %v1551_v51  ;;  %v1620_v20 = vpop.f32.mrf.mxu2  ;;  %v1741_v44 = vld [vmem:[%s6662_s5 + $0x10] sm:$0xff]  ;;  %v1740_v51 = vld [vmem:[%s6662_s5 + $0x8] sm:$0xff] }
 0x17a   :  { %v1634_v26 = vpop.f32.mrf.mxu1  ;;  %1935 = vmatpush.msrb.mxu2 %v1741_v44  ;;  %1903 = vmatpush.msra.mxu0 %v1807_v53 }
 0x17b   :  { %v1579_v58 = vadd.f32 %v1578_v47, %v1565_v56 }
 0x17c   :  { %v1648_v28 = vpop.f32.mrf.mxu3  ;;  %1936 = vmatpush.msrb.mxu2 %v1740_v51 }
 0x17d   :  { %v1724_v3 = vmul.f32 0.01, %v1579_v58 }
 0x17e   :  { %v1552_v6 = vpop.f32.mrf.mxu0  ;;  %1937 = vmatpush.msrb.mxu2 %v1739_v54 }
 0x17f   :  { %v1732_v59 = vmax.f32 %v1579_v58, %v1724_v3  ;;  %v1553_v7 = vadd.f32 %v1552_v6, %v1539_v0  ;;  %1938 = vmatmul.f32.vlgmr.msrb.gmra.mxu2 %v5132_v57  ;;  %v1806_v58 = vld [vmem:[%s6663_s6 + $0x188] sm:$0xff]  ;;  %v5134_v3 = vld [vmem:[%s6682_s20 + $0x10] sm:$0xff]  ;;  %v5135_v6 = vld [vmem:[%s6682_s20 + $0x18] sm:$0xff]  ;;  %s5194_s6 = smov 64  }
 0x180   :  { %1904 = vmatpush.msra.mxu0 %v1806_v58  ;;  %v5133_v0 = vld [vmem:[%s6682_s20 + $0x8] sm:$0xff]  ;;  %s5195_s20 = smov 32  }
 0x181   :  { %v1567_v12 = vadd.f32 %v1566_v60, %v1553_v7  ;;  %1860 = vmatmul.f32.vlgmr.msra.gmra.mxu1 %v1732_v59  ;;  %v1622_v41 = vpop.f32.mrf.mxu2  ;;  %v1755_v60 = vld [vmem:[%s6662_s5 + $0x80] sm:$0xff] }
 0x182   :  { %v1636_v48 = vpop.f32.mrf.mxu1  ;;  %1960 = vmatpush.msrb.mxu1 %v1755_v60  ;;  %1905 = vmatpush.msra.mxu0 %v1805_v62 }
 0x183   :  { %v1581_v14 = vadd.f32 %v1580_v5, %v1567_v12  ;;  %v714_v5 = vperm.slane %v5746_v40, 3 }
 0x184   :  { %v1650_v52 = vpop.f32.mrf.mxu3 }
 0x185   :  { %v1728_v17 = vmul.f32 0.01, %v1581_v14 }
 0x187   :  { %v1606_v21 = vpop.f32.mrf.mxu0  ;;  %v1736_v24 = vmax.f32 %v1581_v14, %v1728_v17  ;;  %1941 = vmatmul.f32.gmra.mxu2 %v5134_v3 }
 0x188   :  { %v1607_v23 = vadd.f32 %v1606_v21, %v1593_v16 }
 0x189   :  { %1863 = vmatmul.f32.gmra.mxu1 %v1736_v24 }
 0x18a   :  { %v1621_v27 = vadd.f32 %v1620_v20, %v1607_v23 }
 0x18c   :  { %v1635_v30 = vadd.f32 %v1634_v26, %v1621_v27  ;;  %v1987_v26 = vld [vmem:[%s6665_s8 + $0x10] sm:$0xff]  ;;  %v1986_v27 = vld [vmem:[%s6665_s8 + $0x8] sm:$0xff] }
 0x18d   :  { %2017 = vmatpush.msrb.mxu3 %v1987_v26 }
 0x18e   :  { %v1649_v33 = vadd.f32 %v1648_v28, %v1635_v30  ;;  %v5944_v28 = vld [vmem:[%s6666_s9 + $0x18] sm:$0xff]  ;;  %v1985_v30 = vld [vmem:[%s6665_s8] sm:$0xff] }
 0x18f   :  { %v1608_v36 = vpop.f32.mrf.mxu0  ;;  %2018 = vmatpush.msrb.mxu3 %v1986_v27  ;;  %2042 = vmatpush.msrb.mxu0 %v5944_v28 }
 0x190   :  { %v1725_v39 = vmul.f32 0.01, %v1649_v33  ;;  %v1609_v42 = vadd.f32 %v1608_v36, %v1595_v32  ;;  %2088 = vmatpush.msra.mxu1 %v5944_v28  ;;  %2402 = vmatpush.msra.mxu2 %v5944_v28  ;;  %v5192_v36 = vmov 0.0  }
 0x191   :  { %4712 = vmatmul.msk.f32.vlgmr.msrb.gmra.mxu1 %vm377_vm2, %v5133_v0  ;;  %2019 = vmatpush.msrb.mxu3 %v1985_v30 }
 0x192   :  { %v1623_v46 = vadd.f32 %v1622_v41, %v1609_v42  ;;  %v1733_v47 = vmax.f32 %v1649_v33, %v1725_v39  ;;  %2043 = vmatpush.msrb.mxu0 %v5952_v31  ;;  %2089 = vmatpush.msra.mxu1 %v5952_v31  ;;  %v1990_v33 = vld [vmem:[%s6666_s9 + $0x8] sm:$0xff] }
 0x193   :  { %2403 = vmatpush.msra.mxu2 %v5952_v31 }
 0x194   :  { %v1637_v49 = vadd.f32 %v1636_v48, %v1623_v46  ;;  %1883 = vmatmul.f32.vlgmr.msra.gmra.mxu3 %v1733_v47  ;;  %2044 = vmatpush.msrb.mxu0 %v1990_v33  ;;  %v5007_v47 = vld [vmem:[%s6664_s7] ss:$0 sm:$0xff] }
 0x195   :  { %2141 = vmatpush.msra.mxu3 %v5944_v28  ;;  %2090 = vmatpush.msra.mxu1 %v1990_v33 }
 0x196   :  { %v1651_v29 = vadd.f32 %v1650_v52, %v1637_v49  ;;  %2404 = vmatpush.msra.mxu2 %v1990_v33  ;;  %2045 = vmatpush.msrb.mxu0 %v1989_v34 }
 0x197   :  { %2142 = vmatpush.msra.mxu3 %v5952_v31  ;;  %2091 = vmatpush.msra.mxu1 %v1989_v34 }
 0x198   :  { %v1729_v56 = vmul.f32 0.01, %v1651_v29  ;;  %v1690_v9 = vpop.f32.mrf.mxu1  ;;  %2405 = vmatpush.msra.mxu2 %v1989_v34 }
 0x199   :  { %4713 = vmatmul.msk.f32.gmra.mxu1 %vm377_vm2, %v5135_v6  ;;  %v1676_v13 = vpop.f32.mrf.mxu2  ;;  %2143 = vmatpush.msra.mxu3 %v1990_v33  ;;  %v5985_v6 = vld [vmem:[%s6667_s10] ss:$0 sm:$0xff] }
 0x19a   :  { %v1737_v63 = vmax.f32 %v1651_v29, %v1729_v56  ;;  %2247 = vmatpush.msrb.mxu1 %v5944_v28 }
 0x19b   :  { %2144 = vmatpush.msra.mxu3 %v1989_v34 }
 0x19c   :  { %1886 = vmatmul.f32.gmra.mxu3 %v1737_v63  ;;  %v1704_v12 = vpop.f32.mrf.mxu3  ;;  %2248 = vmatpush.msrb.mxu1 %v5952_v31 }
 0x19e   :  { %2249 = vmatpush.msrb.mxu1 %v1990_v33 }
 0x1a0   :  { %v1692_v17 = vpop.f32.mrf.mxu1  ;;  %2250 = vmatpush.msrb.mxu1 %v1989_v34 }
 0x1a1   :  { %v1678_v14 = vpop.f32.mrf.mxu2 }
 0x1a4   :  { %v1706_v21 = vpop.f32.mrf.mxu3 }
 0x1a7   :  { %v1662_v59 = vpop.f32.mrf.mxu0 }
 0x1a8   :  { %v1663_v7 = vadd.f32 %v1662_v59, %v714_v5 }
 0x1aa   :  { %v1677_v8 = vadd.f32 %v1676_v13, %v1663_v7 }
 0x1ac   :  { %v1691_v11 = vadd.f32 %v1690_v9, %v1677_v8 }
 0x1ae   :  { %v1705_v15 = vadd.f32 %v1704_v12, %v1691_v11 }
 0x1af   :  { %v1664_v10 = vpop.f32.mrf.mxu0 }
 0x1b0   :  { %v1665_v1 = vadd.f32 %v1664_v10, %v714_v5  ;;  %v1978_v5 = vlaneseq  ;;  %v5193_v10 = vmov 0.5  }
 0x1b2   :  { %v1679_v2 = vadd.f32 %v1678_v14, %v1665_v1  ;;  %v1979_v59 = vand.u32 127, %v1978_v5 }
 0x1b4   :  { %v1693_v19 = vadd.f32 %v1692_v17, %v1679_v2  ;;  %vm1980_vm5 = vcmp.ge.s32.totalorder %v1979_v59, 64  ;;  %vm1981_vm6 = vcmp.lt.s32.totalorder %v1979_v59, 96 }
 0x1b5   :  { %vm1982_vm7 = vmand %vm1980_vm5, %vm1981_vm6 }
 0x1b6   :  { %v1707_v22 = vadd.f32 %v1706_v21, %v1693_v19  ;;  %v5991_v1 = vsel %vm1982_vm7, 1.0, %v5193_v10  ;;  %v5993_v12 = vsel %vm1982_vm7, 0.0, %v5193_v10  ;;  %vm3902_vm7 = vcmask 25600  }
 0x1b7   :  { %v1718_v16 = vpop.f32.mrf.mxu0 }
 0x1b8   :  { %v1719_v40 = vadd.f32 %v1718_v16, %v1705_v15 }
 0x1ba   :  { %v1726_v18 = vmul.f32 0.01, %v1719_v40 }
 0x1bc   :  { %v1734_v20 = vmax.f32 %v1719_v40, %v1726_v18 }
 0x1be   :  { %1906 = vmatmul.f32.vlgmr.msra.gmra.mxu0 %v1734_v20 }
 0x1bf   :  { %v1720_v45 = vpop.f32.mrf.mxu0  ;;  %2194 = vmatpush.msra.mxu0 %v5944_v28 }
 0x1c0   :  { %v1721_v23 = vadd.f32 %v1720_v45, %v1707_v22 }
 0x1c1   :  { %2195 = vmatpush.msra.mxu0 %v5952_v31 }
 0x1c2   :  { %v1730_v24 = vmul.f32 0.01, %v1721_v23 }
 0x1c3   :  { %2196 = vmatpush.msra.mxu0 %v1990_v33 }
 0x1c4   :  { %v1738_v25 = vmax.f32 %v1721_v23, %v1730_v24 }
 0x1c5   :  { %2197 = vmatpush.msra.mxu0 %v1989_v34 }
 0x1c6   :  { %1909 = vmatmul.f32.gmra.mxu0 %v1738_v25 }
 0x1ce   :  { %2046 = vmatmul.f32.vlgmr.msrb.gmra.mxu0 %v5192_v36 }
 0x1cf   :  { %2349 = vmatpush.msrb.mxu0 %v5944_v28 }
 0x1d1   :  { %2350 = vmatpush.msrb.mxu0 %v5952_v31 }
 0x1d3   :  { %2351 = vmatpush.msrb.mxu0 %v1990_v33 }
 0x1d5   :  { %2352 = vmatpush.msrb.mxu0 %v1989_v34 }
 0x1f0   :  { %v1838_v55 = vpop.f32.mrf.mxu2 }
 0x1f8   :  { %v1841_v35 = vpop.f32.mrf.mxu2 }
 0x1fe   :  { %v1861_v32 = vpop.f32.mrf.mxu1 }
 0x1ff   :  { %v1862_v38 = vadd.f32 %v1861_v32, %v1838_v55 }
 0x202   :  { %v1939_v39 = vpop.f32.mrf.mxu2 }
 0x206   :  { %v1864_v37 = vpop.f32.mrf.mxu1 }
 0x207   :  { %v1865_v49 = vadd.f32 %v1864_v37, %v1841_v35 }
 0x20a   :  { %v1942_v53 = vpop.f32.mrf.mxu2 }
 0x20e   :  { %v1962_v44 = vpop.f32.mrf.mxu1 }
 0x216   :  { %v1965_v57 = vpop.f32.mrf.mxu1 }
 0x217   :  { %v1884_v61 = vpop.f32.mrf.mxu3 }
 0x218   :  { %v1885_v42 = vadd.f32 %v1884_v61, %v1862_v38 }
 0x21f   :  { %v1887_v48 = vpop.f32.mrf.mxu3 }
 0x220   :  { %v1888_v51 = vadd.f32 %v1887_v48, %v1865_v49 }
 0x23b   :  { %v1907_v43 = vpop.f32.mrf.mxu0 }
 0x23c   :  { %v1908_v41 = vadd.f32 %v1907_v43, %v1885_v42 }
 0x23e   :  { %v1940_v46 = vadd.f32 %v1939_v39, %v1908_v41 }
 0x240   :  { %v1963_v50 = vadd.f32 %v1962_v44, %v1940_v46 }
 0x242   :  { %v1972_v52 = vadd.f32 %v5007_v47, %v1963_v50 }
 0x243   :  { %v1910_v29 = vpop.f32.mrf.mxu0 }
 0x244   :  { %v1974_v54 = vmul.f32 0.01, %v1972_v52  ;;  %v1911_v56 = vadd.f32 %v1910_v29, %v1888_v51 }
 0x246   :  { %v1976_v58 = vmax.f32 %v1972_v52, %v1974_v54  ;;  %v1943_v60 = vadd.f32 %v1942_v53, %v1911_v56 }
 0x248   :  { %v1966_v62 = vadd.f32 %v1965_v57, %v1943_v60  ;;  %4714 = vmatmul.msk.f32.vlgmr.msrb.gmra.mxu3 %vm1997_vm4, %v1976_v58 }
 0x249   :  { %2296 = vmatpush.msrb.mxu3 %v5944_v28 }
 0x24a   :  { %v1973_v63 = vadd.f32 %v5007_v47, %v1966_v62 }
 0x24b   :  { %2297 = vmatpush.msrb.mxu3 %v5952_v31  ;;  %v2047_v13 = vpop.f32.mrf.mxu0 }
 0x24c   :  { %v1975_v0 = vmul.f32 0.01, %v1973_v63 }
 0x24d   :  { %2298 = vmatpush.msrb.mxu3 %v1990_v33 }
 0x24e   :  { %v1977_v3 = vmax.f32 %v1973_v63, %v1975_v0 }
 0x24f   :  { %2299 = vmatpush.msrb.mxu3 %v1989_v34 }
 0x250   :  { %4715 = vmatmul.msk.f32.gmra.mxu3 %vm1997_vm4, %v1977_v3 }
 0x2cb   :  { %v2021_v7 = vpop.f32.mrf.mxu3 }
 0x2cc   :  { %v5988_v8 = vadd.f32 %v5985_v6, %v2021_v7 }
 0x2ce   :  { %v2050_v9 = vadd.f32 %v2047_v13, %v5988_v8 }
 0x2d0   :  { %5024 = vtanh.f32 %v2050_v9 }
 0x2d3   :  { %v6016_v38 = vpop.f32.mrf.mxu3 }
 0x2d6   :  { %v5025_v11 = vpop.eup %5024 }
 0x2d7   :  { %v2052_v14 = vmul.f32 %v5025_v11, %v5991_v1 }
 0x2d9   :  { %v2053_v2 = vadd.f32 %v2052_v14, %v5993_v12 }
 0x2db   :  { %2056 = vrot.lane.b32.xlu0 %v2053_v2, %s5194_s6  ;;  %v2054_v40 = vmul.f32 0.0, %v2053_v2 }
 0x34d   :  { %v2057_v15 = vpop.permute.xlu0 %2056 }
 0x34e   :  { %v2059_v16 = vmul.f32 %v2057_v15, %v2053_v2  ;;  %v6039_v15 = vld [vmem:[%s6665_s8 + $0x38] sm:$0xff] }
 0x34f   :  { %2536 = vmatpush.msrb.mxu2 %v6039_v15 }
 0x350   :  { %2061 = vrot.lane.b32.xlu0 %v2059_v16, %s5195_s20  ;;  %v6044_v16 = vld [vmem:[%s6665_s8 + $0x30] sm:$0xff] }
 0x351   :  { %2537 = vmatpush.msrb.mxu2 %v6044_v16 }
 0x3c2   :  { %v2062_v17 = vpop.permute.xlu0 %2061 }
 0x3c3   :  { %v2064_v18 = vadd.f32 %v2062_v17, %v2054_v40  ;;  %v6051_v40 = vld [vmem:[%s6665_s8 + $0x28] sm:$0xff]  ;;  %v6060_v17 = vld [vmem:[%s6665_s8 + $0x20] sm:$0xff] }
 0x3c4   :  { %2538 = vmatpush.msrb.mxu2 %v6051_v40 }
 0x3c5   :  { %5026 = vtanh.f32 %v2064_v18  ;;  %v2104_v30 = vrot.slane %v2064_v18, 6 }
 0x3c6   :  { %2539 = vmatpush.msrb.mxu2 %v6060_v17 }
 0x3cb   :  { %v5027_v19 = vpop.eup %5026 }
 0x3cc   :  { %2067 = vrot.lane.b32.xlu1 %v5027_v19, %s5194_s6  ;;  %v6084_v19 = vadd.f32 %v5985_v6, %v6016_v38 }
 0x43e   :  { %v2068_v20 = vpop.permute.xlu1 %2067 }
 0x43f   :  { %v2070_v21 = vmul.f32 %v2068_v20, %v2053_v2 }
 0x441   :  { %2072 = vrot.lane.b32.xlu1 %v2070_v21, %s5195_s20 }
 0x4b3   :  { %v6001_v22 = vpop.permute.xlu1 %2072 }
 0x4b4   :  { %4716 = vmatmul.msk.f32.vlgmr.msra.gmra.mxu1 %vm1997_vm4, %v6001_v22 }
 0x4b5   :  { %2476 = vmatpush.msra.mxu1 %v6039_v15 }
 0x4b7   :  { %2477 = vmatpush.msra.mxu1 %v6044_v16 }
 0x4b9   :  { %2478 = vmatpush.msra.mxu1 %v6051_v40 }
 0x4bb   :  { %2479 = vmatpush.msra.mxu1 %v6060_v17 }
 0x531   :  { %v2093_v45 = vpop.f32.mrf.mxu1 }
 0x532   :  { %v2097_v23 = vrot.slane %v2093_v45, 6 }
 0x534   :  { %v2099_v24 = vadd.f32 %v2097_v23, %v5988_v8 }
 0x536   :  { %5028 = vtanh.f32 %v2099_v24 }
 0x53c   :  { %v5029_v25 = vpop.eup %5028 }
 0x53d   :  { %v2101_v4 = vmul.f32 %v5029_v25, %v5991_v1 }
 0x53f   :  { %v2102_v26 = vadd.f32 %v2101_v4, %v5993_v12 }
 0x541   :  { %2108 = vrot.lane.b32.xlu2 %v2102_v26, %s5194_s6  ;;  %v2106_v31 = vmul.f32 %v2104_v30, %v2102_v26 }
 0x59b   :  { %v2109_v27 = vpop.permute.xlu2 %2108 }
 0x59c   :  { %v2111_v28 = vmul.f32 %v2109_v27, %v2102_v26 }
 0x59e   :  { %2113 = vrot.lane.b32.xlu2 %v2111_v28, %s5195_s20 }
 0x5f8   :  { %v2114_v55 = vpop.permute.xlu2 %2113 }
 0x5f9   :  { %v2116_v32 = vadd.f32 %v2114_v55, %v2106_v31  ;;  %v6096_v55 = vld [vmem:[%s6666_s9 + $0x38] sm:$0xff] }
 0x5fb   :  { %5030 = vtanh.f32 %v2116_v32  ;;  %v2157_v49 = vrot.slane %v2116_v32, 6  ;;  %v6101_v32 = vld [vmem:[%s6666_s9 + $0x30] sm:$0xff] }
 0x601   :  { %v5031_v33 = vpop.eup %5030 }
 0x602   :  { %2119 = vrot.lane.b32.xlu0 %v5031_v33, %s5194_s6  ;;  %v6107_v33 = vld [vmem:[%s6666_s9 + $0x28] sm:$0xff] }
 0x674   :  { %v2120_v34 = vpop.permute.xlu0 %2119 }
 0x675   :  { %v2122_v35 = vmul.f32 %v2120_v34, %v2102_v26  ;;  %v6113_v34 = vld [vmem:[%s6666_s9 + $0x20] sm:$0xff] }
 0x677   :  { %v2124_v37 = vrot.slane %v2122_v35, 2 }
 0x679   :  { %2125 = vrot.lane.b32.xlu1 %v2124_v37, %s5195_s20 }
 0x6eb   :  { %v6012_v61 = vpop.permute.xlu1 %2125 }
 0x6ec   :  { %4717 = vmatmul.msk.f32.vlgmr.msra.gmra.mxu3 %vm1997_vm4, %v6012_v61 }
 0x6ed   :  { %2496 = vmatpush.msra.mxu3 %v6039_v15 }
 0x6ef   :  { %2497 = vmatpush.msra.mxu3 %v6044_v16 }
 0x6f1   :  { %2498 = vmatpush.msra.mxu3 %v6051_v40 }
 0x6f3   :  { %2499 = vmatpush.msra.mxu3 %v6060_v17 }
 0x76f   :  { %v2146_v39 = vpop.f32.mrf.mxu3 }
 0x770   :  { %v2150_v42 = vrot.slane %v2146_v39, 4  ;;  %v6139_v39 = vld [vmem:[%s6667_s10 + $0x1] ss:$0 sm:$0xff] }
 0x772   :  { %v2152_v43 = vadd.f32 %v2150_v42, %v5988_v8 }
 0x774   :  { %5032 = vtanh.f32 %v2152_v43 }
 0x77a   :  { %v5033_v44 = vpop.eup %5032 }
 0x77b   :  { %v2154_v41 = vmul.f32 %v5033_v44, %v5991_v1 }
 0x77d   :  { %v2155_v46 = vadd.f32 %v2154_v41, %v5993_v12 }
 0x77f   :  { %2161 = vrot.lane.b32.xlu2 %v2155_v46, %s5194_s6  ;;  %v2159_v50 = vmul.f32 %v2157_v49, %v2155_v46 }
 0x7d9   :  { %v2162_v47 = vpop.permute.xlu2 %2161 }
 0x7da   :  { %v2164_v48 = vmul.f32 %v2162_v47, %v2155_v46 }
 0x7dc   :  { %2166 = vrot.lane.b32.xlu0 %v2164_v48, %s5195_s20 }
 0x84e   :  { %v2167_v51 = vpop.permute.xlu0 %2166 }
 0x84f   :  { %v2169_v52 = vadd.f32 %v2167_v51, %v2159_v50 }
 0x851   :  { %5034 = vtanh.f32 %v2169_v52  ;;  %v2210_v7 = vrot.slane %v2169_v52, 6 }
 0x857   :  { %v5035_v29 = vpop.eup %5034 }
 0x858   :  { %2172 = vrot.lane.b32.xlu1 %v5035_v29, %s5194_s6 }
 0x8ca   :  { %v2173_v53 = vpop.permute.xlu1 %2172 }
 0x8cb   :  { %v2175_v54 = vmul.f32 %v2173_v53, %v2155_v46 }
 0x8cd   :  { %v2177_v56 = vrot.slane %v2175_v54, 4 }
 0x8cf   :  { %2178 = vrot.lane.b32.xlu2 %v2177_v56, %s5195_s20 }
 0x929   :  { %v6025_v57 = vpop.permute.xlu2 %2178 }
 0x92a   :  { %4718 = vmatmul.msk.f32.vlgmr.msra.gmra.mxu0 %vm1997_vm4, %v6025_v57 }
 0x92b   :  { %2516 = vmatpush.msra.mxu0 %v6039_v15 }
 0x92d   :  { %2517 = vmatpush.msra.mxu0 %v6044_v16 }
 0x92f   :  { %2518 = vmatpush.msra.mxu0 %v6051_v40 }
 0x931   :  { %2519 = vmatpush.msra.mxu0 %v6060_v17 }
 0x9a7   :  { %v2199_v58 = vpop.f32.mrf.mxu0 }
 0x9a8   :  { %v2203_v60 = vrot.slane %v2199_v58, 2 }
 0x9aa   :  { %v2205_v62 = vadd.f32 %v2203_v60, %v5988_v8 }
 0x9ac   :  { %5036 = vtanh.f32 %v2205_v62 }
 0x9b2   :  { %v5037_v63 = vpop.eup %5036 }
 0x9b3   :  { %v2207_v0 = vmul.f32 %v5037_v63, %v5991_v1 }
 0x9b5   :  { %v2208_v3 = vadd.f32 %v2207_v0, %v5993_v12 }
 0x9b7   :  { %2214 = vrot.lane.b32.xlu0 %v2208_v3, %s5194_s6  ;;  %v2212_v13 = vmul.f32 %v2210_v7, %v2208_v3 }
 0xa29   :  { %v2215_v5 = vpop.permute.xlu0 %2214 }
 0xa2a   :  { %v2217_v59 = vmul.f32 %v2215_v5, %v2208_v3 }
 0xa2c   :  { %2219 = vrot.lane.b32.xlu1 %v2217_v59, %s5195_s20 }
 0xa9e   :  { %v2220_v9 = vpop.permute.xlu1 %2219 }
 0xa9f   :  { %v2222_v10 = vadd.f32 %v2220_v9, %v2212_v13 }
 0xaa1   :  { %5038 = vtanh.f32 %v2222_v10 }
 0xaa7   :  { %v5039_v11 = vpop.eup %5038 }
 0xaa8   :  { %2225 = vrot.lane.b32.xlu2 %v5039_v11, %s5194_s6 }
 0xb02   :  { %v2226_v8 = vpop.permute.xlu2 %2225 }
 0xb03   :  { %v2228_v14 = vmul.f32 %v2226_v8, %v2208_v3 }
 0xb05   :  { %v2230_v2 = vrot.slane %v2228_v14, 6 }
 0xb07   :  { %2231 = vrot.lane.b32.xlu0 %v2230_v2, %s5195_s20 }
 0xb79   :  { %v6072_v18 = vpop.permute.xlu0 %2231 }
 0xb7a   :  { %4719 = vmatmul.msk.f32.vlgmr.msrb.gmra.mxu1 %vm1997_vm4, %v6072_v18 }
 0xb7b   :  { %2556 = vmatpush.msrb.mxu1 %v6039_v15 }
 0xb7d   :  { %2557 = vmatpush.msrb.mxu1 %v6044_v16 }
 0xb7f   :  { %2558 = vmatpush.msrb.mxu1 %v6051_v40 }
 0xb81   :  { %2559 = vmatpush.msrb.mxu1 %v6060_v17 }
 0xb82   :  { %4733 = vmatmul.msk.f32.vlgmr.msra.gmra.mxu1 %vm1997_vm4, %v6001_v22  ;;  %v2260_v22 = vrot.slane %v2222_v10, 6 }
 0xb83   :  { %2641 = vmatpush.msra.mxu1 %v6096_v55 }
 0xb85   :  { %2642 = vmatpush.msra.mxu1 %v6101_v32 }
 0xb87   :  { %2643 = vmatpush.msra.mxu1 %v6107_v33 }
 0xb89   :  { %2644 = vmatpush.msra.mxu1 %v6113_v34 }
 0xbf7   :  { %v2252_v20 = vpop.f32.mrf.mxu1 }
 0xbf8   :  { %v2255_v21 = vadd.f32 %v2252_v20, %v6084_v19 }
 0xbfa   :  { %5040 = vtanh.f32 %v2255_v21 }
 0xbff   :  { %v2481_v37 = vpop.f32.mrf.mxu1 }
 0xc00   :  { %v5041_v45 = vpop.eup %5040 }
 0xc01   :  { %v2257_v23 = vmul.f32 %v5041_v45, %v5991_v1 }
 0xc03   :  { %v2258_v24 = vadd.f32 %v2257_v23, %v5993_v12 }
 0xc05   :  { %2264 = vrot.lane.b32.xlu1 %v2258_v24, %s5194_s6  ;;  %v2262_v26 = vmul.f32 %v2260_v22, %v2258_v24 }
 0xc77   :  { %v2265_v25 = vpop.permute.xlu1 %2264 }
 0xc78   :  { %v2267_v4 = vmul.f32 %v2265_v25, %v2258_v24 }
 0xc7a   :  { %2269 = vrot.lane.b32.xlu2 %v2267_v4, %s5195_s20 }
 0xcd4   :  { %v2270_v27 = vpop.permute.xlu2 %2269 }
 0xcd5   :  { %v2272_v6 = vadd.f32 %v2270_v27, %v2262_v26 }
 0xcd7   :  { %5042 = vtanh.f32 %v2272_v6  ;;  %v2312_v58 = vrot.slane %v2272_v6, 6 }
 0xcdd   :  { %v5043_v28 = vpop.eup %5042 }
 0xcde   :  { %2275 = vrot.lane.b32.xlu0 %v5043_v28, %s5194_s6 }
 0xd50   :  { %v2276_v30 = vpop.permute.xlu0 %2275 }
 0xd51   :  { %v2278_v31 = vmul.f32 %v2276_v30, %v2258_v24 }
 0xd53   :  { %2280 = vrot.lane.b32.xlu1 %v2278_v31, %s5195_s20 }
 0xdc5   :  { %v2281_v35 = vpop.permute.xlu1 %2280 }
 0xdc6   :  { %4720 = vmatmul.msk.f32.vlgmr.msrb.gmra.mxu3 %vm1997_vm4, %v2281_v35  ;;  %4737 = vmatmul.msk.f32.vlgmr.msrb.gmra.mxu1 %vm1997_vm4, %v2281_v35 }
 0xdc7   :  { %2576 = vmatpush.msrb.mxu3 %v6039_v15  ;;  %2825 = vmatpush.msrb.mxu1 %v6096_v55 }
 0xdc9   :  { %2577 = vmatpush.msrb.mxu3 %v6044_v16  ;;  %2826 = vmatpush.msrb.mxu1 %v6101_v32 }
 0xdcb   :  { %2578 = vmatpush.msrb.mxu3 %v6051_v40  ;;  %2827 = vmatpush.msrb.mxu1 %v6107_v33 }
 0xdcd   :  { %2579 = vmatpush.msrb.mxu3 %v6060_v17  ;;  %2828 = vmatpush.msrb.mxu1 %v6113_v34 }
 0xdce   :  { %4734 = vmatmul.msk.f32.vlgmr.msra.gmra.mxu3 %vm1997_vm4, %v6012_v61  ;;  %2645 = vmatmul.f32.vlgmr.msra.gmra.mxu1 %v5192_v36  ;;  %v2482_v61 = vadd.f32 %v6139_v39, %v2481_v37 }
 0xdcf   :  { %2687 = vmatpush.msra.mxu3 %v6096_v55 }
 0xdd1   :  { %2688 = vmatpush.msra.mxu3 %v6101_v32 }
 0xdd3   :  { %2689 = vmatpush.msra.mxu3 %v6107_v33 }
 0xdd5   :  { %2690 = vmatpush.msra.mxu3 %v6113_v34 }
 0xe43   :  { %v6134_v38 = vpop.f32.mrf.mxu1 }
 0xe49   :  { %v2301_v42 = vpop.f32.mrf.mxu3 }
 0xe4a   :  { %v2305_v43 = vrot.slane %v2301_v42, 6 }
 0xe4b   :  { %v2646_v44 = vpop.f32.mrf.mxu1 }
 0xe4c   :  { %v2307_v41 = vadd.f32 %v2305_v43, %v6084_v19  ;;  %v2649_v46 = vadd.f32 %v2646_v44, %v2482_v61 }
 0xe4e   :  { %5044 = vtanh.f32 %v2307_v41 }
 0xe4f   :  { %5046 = vtanh.f32 %v2649_v46 }
 0xe51   :  { %v2501_v24 = vpop.f32.mrf.mxu3 }
 0xe52   :  { %v2502_v22 = vadd.f32 %v6139_v39, %v2501_v24 }
 0xe54   :  { %v5045_v47 = vpop.eup %5044 }
 0xe55   :  { %v5047_v48 = vpop.eup %5046  ;;  %v2309_v49 = vmul.f32 %v5045_v47, %v5991_v1 }
 0xe56   :  { %v2651_v50 = vmul.f32 %v5047_v48, %v5991_v1 }
 0xe57   :  { %v2310_v51 = vadd.f32 %v2309_v49, %v5993_v12 }
 0xe58   :  { %v2652_v52 = vadd.f32 %v2651_v50, %v5993_v12 }
 0xe59   :  { %2316 = vrot.lane.b32.xlu2 %v2310_v51, %s5194_s6  ;;  %v2314_v60 = vmul.f32 %v2312_v58, %v2310_v51 }
 0xe5a   :  { %2655 = vrot.lane.b32.xlu0 %v2652_v52, %s5194_s6  ;;  %v2653_v63 = vmul.f32 0.0, %v2652_v52 }
 0xeb3   :  { %v2317_v29 = vpop.permute.xlu2 %2316 }
 0xeb4   :  { %v2319_v53 = vmul.f32 %v2317_v29, %v2310_v51 }
 0xeb6   :  { %2321 = vrot.lane.b32.xlu1 %v2319_v53, %s5195_s20 }
 0xecc   :  { %v2656_v54 = vpop.permute.xlu0 %2655 }
 0xecd   :  { %v2658_v56 = vmul.f32 %v2656_v54, %v2652_v52 }
 0xecf   :  { %2660 = vrot.lane.b32.xlu2 %v2658_v56, %s5195_s20 }
 0xf28   :  { %v2322_v62 = vpop.permute.xlu1 %2321 }
 0xf29   :  { %v2324_v0 = vadd.f32 %v2322_v62, %v2314_v60  ;;  %v2661_v3 = vpop.permute.xlu2 %2660 }
 0xf2a   :  { %v2663_v5 = vadd.f32 %v2661_v3, %v2653_v63 }
 0xf2b   :  { %5048 = vtanh.f32 %v2324_v0  ;;  %v2365_v61 = vrot.slane %v2324_v0, 6 }
 0xf2c   :  { %5050 = vtanh.f32 %v2663_v5 }
 0xf31   :  { %v5049_v59 = vpop.eup %5048 }
 0xf32   :  { %v5051_v7 = vpop.eup %5050  ;;  %2327 = vrot.lane.b32.xlu0 %v5049_v59, %s5194_s6 }
 0xf33   :  { %2666 = vrot.lane.b32.xlu1 %v5051_v7, %s5194_s6 }
 0xfa4   :  { %v2328_v13 = vpop.permute.xlu0 %2327 }
 0xfa5   :  { %v2667_v9 = vpop.permute.xlu1 %2666  ;;  %v2330_v10 = vmul.f32 %v2328_v13, %v2310_v51 }
 0xfa6   :  { %v2669_v11 = vmul.f32 %v2667_v9, %v2652_v52 }
 0xfa7   :  { %v2332_v8 = vrot.slane %v2330_v10, 2 }
 0xfa8   :  { %2671 = vrot.lane.b32.xlu0 %v2669_v11, %s5195_s20 }
 0xfa9   :  { %2333 = vrot.lane.b32.xlu2 %v2332_v8, %s5195_s20 }
0x1003   :  { %v2334_v14 = vpop.permute.xlu2 %2333 }
0x1004   :  { %4721 = vmatmul.msk.f32.vlgmr.msrb.gmra.mxu0 %vm1997_vm4, %v2334_v14  ;;  %4738 = vmatmul.msk.f32.vlgmr.msrb.gmra.mxu3 %vm1997_vm4, %v2334_v14 }
0x1005   :  { %2596 = vmatpush.msrb.mxu0 %v6039_v15  ;;  %2871 = vmatpush.msrb.mxu3 %v6096_v55 }
0x1007   :  { %2597 = vmatpush.msrb.mxu0 %v6044_v16  ;;  %2872 = vmatpush.msrb.mxu3 %v6101_v32 }
0x1009   :  { %2598 = vmatpush.msrb.mxu0 %v6051_v40  ;;  %2873 = vmatpush.msrb.mxu3 %v6107_v33 }
0x100b   :  { %2599 = vmatpush.msrb.mxu0 %v6060_v17  ;;  %2874 = vmatpush.msrb.mxu3 %v6113_v34 }
0x100c   :  { %4735 = vmatmul.msk.f32.vlgmr.msra.gmra.mxu0 %vm1997_vm4, %v6025_v57 }
0x100d   :  { %2733 = vmatpush.msra.mxu0 %v6096_v55 }
0x100f   :  { %2734 = vmatpush.msra.mxu0 %v6101_v32 }
0x1011   :  { %2735 = vmatpush.msra.mxu0 %v6107_v33 }
0x1013   :  { %2736 = vmatpush.msra.mxu0 %v6113_v34 }
0x101a   :  { %v6171_v2 = vpop.permute.xlu0 %2671 }
0x101b   :  { %4741 = vmatmul.msk.f32.vlgmr.msra.gmra.mxu3 %vm1997_vm4, %v6171_v2 }
0x1081   :  { %v2354_v20 = vpop.f32.mrf.mxu0 }
0x1082   :  { %v2358_v21 = vrot.slane %v2354_v20, 4 }
0x1084   :  { %v2360_v45 = vadd.f32 %v2358_v21, %v6084_v19 }
0x1086   :  { %5052 = vtanh.f32 %v2360_v45 }
0x1087   :  { %v6179_v4 = vpop.f32.mrf.mxu3 }
0x108c   :  { %v5053_v23 = vpop.eup %5052 }
0x108d   :  { %v2362_v57 = vmul.f32 %v5053_v23, %v5991_v1 }
0x108f   :  { %v2363_v25 = vadd.f32 %v2362_v57, %v5993_v12 }
0x1091   :  { %2369 = vrot.lane.b32.xlu1 %v2363_v25, %s5194_s6  ;;  %v2367_v43 = vmul.f32 %v2365_v61, %v2363_v25 }
0x109e   :  { %v2692_v26 = vpop.f32.mrf.mxu3 }
0x109f   :  { %v2695_v27 = vadd.f32 %v2692_v26, %v2502_v22 }
0x10a1   :  { %5054 = vtanh.f32 %v2695_v27 }
0x10a7   :  { %v5055_v6 = vpop.eup %5054 }
0x10a8   :  { %v2697_v28 = vmul.f32 %v5055_v6, %v5991_v1 }
0x10aa   :  { %v2698_v30 = vadd.f32 %v2697_v28, %v5993_v12 }
0x10ac   :  { %2701 = vrot.lane.b32.xlu2 %v2698_v30, %s5194_s6  ;;  %v2699_v46 = vmul.f32 %v2698_v30, %v2663_v5 }
0x1103   :  { %v2370_v31 = vpop.permute.xlu1 %2369 }
0x1104   :  { %v2372_v35 = vmul.f32 %v2370_v31, %v2363_v25 }
0x1106   :  { %v2702_v37 = vpop.permute.xlu2 %2701  ;;  %2374 = vrot.lane.b32.xlu0 %v2372_v35, %s5195_s20 }
0x1107   :  { %v2704_v42 = vmul.f32 %v2702_v37, %v2698_v30 }
0x1109   :  { %2706 = vrot.lane.b32.xlu1 %v2704_v42, %s5195_s20 }
0x1178   :  { %v2375_v44 = vpop.permute.xlu0 %2374 }
0x1179   :  { %v2377_v41 = vadd.f32 %v2375_v44, %v2367_v43 }
0x117b   :  { %5056 = vtanh.f32 %v2377_v41  ;;  %v2707_v47 = vpop.permute.xlu1 %2706  ;;  %v2418_v8 = vrot.slane %v2377_v41, 6 }
0x117c   :  { %v2709_v48 = vadd.f32 %v2707_v47, %v2699_v46 }
0x117e   :  { %5058 = vtanh.f32 %v2709_v48 }
0x1181   :  { %v5057_v49 = vpop.eup %5056 }
0x1182   :  { %2380 = vrot.lane.b32.xlu2 %v5057_v49, %s5194_s6 }
0x1184   :  { %v5059_v50 = vpop.eup %5058 }
0x1185   :  { %2712 = vrot.lane.b32.xlu0 %v5059_v50, %s5194_s6 }
0x11dc   :  { %v2381_v51 = vpop.permute.xlu2 %2380 }
0x11dd   :  { %v2383_v52 = vmul.f32 %v2381_v51, %v2363_v25  ;;  %v6254_v51 = vld [vmem:[%s6665_s8 + $0x58] sm:$0xff] }
0x11de   :  { %3032 = vmatpush.msra.mxu1 %v6254_v51  ;;  %3052 = vmatpush.msra.mxu3 %v6254_v51 }
0x11df   :  { %v2385_v29 = vrot.slane %v2383_v52, 4  ;;  %v6259_v52 = vld [vmem:[%s6665_s8 + $0x50] sm:$0xff] }
0x11e0   :  { %3033 = vmatpush.msra.mxu1 %v6259_v52  ;;  %3053 = vmatpush.msra.mxu3 %v6259_v52 }
0x11e1   :  { %2386 = vrot.lane.b32.xlu1 %v2385_v29, %s5195_s20  ;;  %v6266_v29 = vld [vmem:[%s6665_s8 + $0x48] sm:$0xff] }
0x11e2   :  { %3034 = vmatpush.msra.mxu1 %v6266_v29  ;;  %3054 = vmatpush.msra.mxu3 %v6266_v29 }
0x11f7   :  { %v2713_v53 = vpop.permute.xlu0 %2712 }
0x11f8   :  { %v2715_v54 = vmul.f32 %v2713_v53, %v2698_v30  ;;  %v6275_v53 = vld [vmem:[%s6665_s8 + $0x40] sm:$0xff] }
0x11f9   :  { %3035 = vmatpush.msra.mxu1 %v6275_v53  ;;  %3055 = vmatpush.msra.mxu3 %v6275_v53 }
0x11fa   :  { %2717 = vrot.lane.b32.xlu2 %v2715_v54, %s5195_s20 }
0x1253   :  { %v2387_v56 = vpop.permute.xlu1 %2386 }
0x1254   :  { %4722 = vmatmul.msk.f32.vlgmr.msra.gmra.mxu2 %vm1997_vm4, %v2387_v56  ;;  %4739 = vmatmul.msk.f32.vlgmr.msrb.gmra.mxu0 %vm1997_vm4, %v2387_v56  ;;  %v6199_v58 = vpop.permute.xlu2 %2717  ;;  %v2562_v56 = vadd.f32 %v6139_v39, %v6134_v38 }
0x1255   :  { %2621 = vmatpush.msra.mxu2 %v6039_v15  ;;  %2917 = vmatpush.msrb.mxu0 %v6096_v55  ;;  %v2521_v15 = vpop.f32.mrf.mxu0 }
0x1257   :  { %2622 = vmatpush.msra.mxu2 %v6044_v16  ;;  %2918 = vmatpush.msrb.mxu0 %v6101_v32 }
0x1259   :  { %2623 = vmatpush.msra.mxu2 %v6051_v40  ;;  %2919 = vmatpush.msrb.mxu0 %v6107_v33 }
0x125b   :  { %2624 = vmatpush.msra.mxu2 %v6060_v17  ;;  %2920 = vmatpush.msrb.mxu0 %v6113_v34  ;;  %v2522_v17 = vadd.f32 %v6139_v39, %v2521_v15 }
0x125c   :  { %4736 = vmatmul.msk.f32.vlgmr.msrb.gmra.mxu2 %vm1997_vm4, %v6072_v18  ;;  %4742 = vmatmul.msk.f32.vlgmr.msra.gmra.mxu0 %vm1997_vm4, %v6199_v58 }
0x125d   :  { %2779 = vmatpush.msrb.mxu2 %v6096_v55  ;;  %3072 = vmatpush.msra.mxu0 %v6254_v51 }
0x125f   :  { %2780 = vmatpush.msrb.mxu2 %v6101_v32  ;;  %3073 = vmatpush.msra.mxu0 %v6259_v52 }
0x1261   :  { %2781 = vmatpush.msrb.mxu2 %v6107_v33  ;;  %3074 = vmatpush.msra.mxu0 %v6266_v29 }
0x1263   :  { %2782 = vmatpush.msrb.mxu2 %v6113_v34  ;;  %3075 = vmatpush.msra.mxu0 %v6275_v53 }
0x12d1   :  { %v6211_v16 = vpop.f32.mrf.mxu0 }
0x12d7   :  { %v2407_v40 = vpop.f32.mrf.mxu2 }
0x12d8   :  { %v2411_v60 = vrot.slane %v2407_v40, 2 }
0x12d9   :  { %v2738_v62 = vpop.f32.mrf.mxu0 }
0x12da   :  { %v2413_v18 = vadd.f32 %v2411_v60, %v6084_v19  ;;  %v2741_v63 = vadd.f32 %v2738_v62, %v2522_v17 }
0x12dc   :  { %5060 = vtanh.f32 %v2413_v18 }
0x12dd   :  { %5062 = vtanh.f32 %v2741_v63 }
0x12df   :  { %v2541_v35 = vpop.f32.mrf.mxu2 }
0x12e0   :  { %v2542_v42 = vadd.f32 %v6139_v39, %v2541_v35 }
0x12e2   :  { %v5061_v0 = vpop.eup %5060 }
0x12e3   :  { %v5063_v3 = vpop.eup %5062  ;;  %v2415_v5 = vmul.f32 %v5061_v0, %v5991_v1 }
0x12e4   :  { %v2743_v59 = vmul.f32 %v5063_v3, %v5991_v1 }
0x12e5   :  { %v2416_v7 = vadd.f32 %v2415_v5, %v5993_v12 }
0x12e6   :  { %v2744_v13 = vadd.f32 %v2743_v59, %v5993_v12 }
0x12e7   :  { %2422 = vrot.lane.b32.xlu0 %v2416_v7, %s5194_s6  ;;  %v2420_v14 = vmul.f32 %v2418_v8, %v2416_v7 }
0x12e8   :  { %2747 = vrot.lane.b32.xlu1 %v2744_v13, %s5194_s6  ;;  %v2745_v23 = vmul.f32 %v2744_v13, %v2709_v48 }
0x1359   :  { %v2423_v9 = vpop.permute.xlu0 %2422 }
0x135a   :  { %v2748_v10 = vpop.permute.xlu1 %2747  ;;  %v2425_v19 = vmul.f32 %v2423_v9, %v2416_v7  ;;  %v6322_v9 = vld [vmem:[%s6666_s9 + $0x48] sm:$0xff] }
0x135b   :  { %v2750_v11 = vmul.f32 %v2748_v10, %v2744_v13  ;;  %v6328_v10 = vld [vmem:[%s6666_s9 + $0x40] sm:$0xff] }
0x135c   :  { %2427 = vrot.lane.b32.xlu2 %v2425_v19, %s5195_s20 }
0x135d   :  { %2752 = vrot.lane.b32.xlu0 %v2750_v11, %s5195_s20 }
0x13b6   :  { %v2428_v20 = vpop.permute.xlu2 %2427 }
0x13b7   :  { %v6223_v21 = vadd.f32 %v2428_v20, %v2420_v14  ;;  %v6354_v14 = vld [vmem:[%s6667_s10 + $0x2] ss:$0 sm:$0xff] }
0x13b9   :  { %5064 = vtanh.f32 %v6223_v21 }
0x13bf   :  { %v5065_v45 = vpop.eup %5064 }
0x13c0   :  { %2433 = vrot.lane.b32.xlu1 %v5065_v45, %s5194_s6 }
0x13cf   :  { %v2753_v57 = vpop.permute.xlu0 %2752 }
0x13d0   :  { %v2755_v24 = vadd.f32 %v2753_v57, %v2745_v23 }
0x13d2   :  { %5066 = vtanh.f32 %v2755_v24 }
0x13d8   :  { %v5067_v25 = vpop.eup %5066 }
0x13d9   :  { %2758 = vrot.lane.b32.xlu2 %v5067_v25, %s5194_s6 }
0x1432   :  { %v2434_v22 = vpop.permute.xlu1 %2433 }
0x1433   :  { %v6228_v26 = vmul.f32 %v2434_v22, %v2416_v7  ;;  %v2759_v27 = vpop.permute.xlu2 %2758  ;;  %v6311_v7 = vld [vmem:[%s6666_s9 + $0x58] sm:$0xff] }
0x1434   :  { %v2761_v6 = vmul.f32 %v2759_v27, %v2744_v13  ;;  %v6316_v13 = vld [vmem:[%s6666_s9 + $0x50] sm:$0xff] }
0x1435   :  { %v2604_v28 = vrot.slane %v6228_v26, 6 }
0x1436   :  { %2763 = vrot.lane.b32.xlu1 %v2761_v6, %s5195_s20 }
0x1437   :  { %2605 = vrot.lane.b32.xlu0 %v2604_v28, %s5195_s20 }
0x14a8   :  { %v6237_v31 = vpop.permute.xlu1 %2763 }
0x14a9   :  { %v2606_v30 = vpop.permute.xlu0 %2605 }
0x14aa   :  { %4740 = vmatmul.msk.f32.vlgmr.msra.gmra.mxu2 %vm1997_vm4, %v2606_v30 }
0x14ab   :  { %2963 = vmatpush.msra.mxu2 %v6096_v55 }
0x14ad   :  { %2964 = vmatpush.msra.mxu2 %v6101_v32 }
0x14af   :  { %2965 = vmatpush.msra.mxu2 %v6107_v33 }
0x14b1   :  { %2966 = vmatpush.msra.mxu2 %v6113_v34 }
0x14b2   :  { %4743 = vmatmul.msk.f32.vlgmr.msrb.gmra.mxu2 %vm1997_vm4, %v6237_v31 }
0x14b3   :  { %3092 = vmatpush.msrb.mxu2 %v6254_v51 }
0x14b5   :  { %3093 = vmatpush.msrb.mxu2 %v6259_v52 }
0x14b7   :  { %3094 = vmatpush.msrb.mxu2 %v6266_v29 }
0x14b9   :  { %3095 = vmatpush.msrb.mxu2 %v6275_v53 }
0x152d   :  { %v6242_v37 = vpop.f32.mrf.mxu2 }
0x1535   :  { %v2784_v61 = vpop.f32.mrf.mxu2 }
0x1536   :  { %v2787_v43 = vadd.f32 %v2784_v61, %v2542_v42 }
0x1538   :  { %5068 = vtanh.f32 %v2787_v43 }
0x153e   :  { %v5069_v55 = vpop.eup %5068 }
0x153f   :  { %v2789_v32 = vmul.f32 %v5069_v55, %v5991_v1 }
0x1541   :  { %v2790_v33 = vadd.f32 %v2789_v32, %v5993_v12 }
0x1543   :  { %2793 = vrot.lane.b32.xlu2 %v2790_v33, %s5194_s6  ;;  %v2791_v41 = vmul.f32 %v2790_v33, %v2755_v24 }
0x159d   :  { %v2794_v44 = vpop.permute.xlu2 %2793 }
0x159e   :  { %v2796_v34 = vmul.f32 %v2794_v44, %v2790_v33 }
0x15a0   :  { %2798 = vrot.lane.b32.xlu0 %v2796_v34, %s5195_s20 }
0x1612   :  { %v2799_v46 = vpop.permute.xlu0 %2798 }
0x1613   :  { %v2801_v47 = vadd.f32 %v2799_v46, %v2791_v41 }
0x1615   :  { %5070 = vtanh.f32 %v2801_v47 }
0x161b   :  { %v5071_v48 = vpop.eup %5070 }
0x161c   :  { %2804 = vrot.lane.b32.xlu1 %v5071_v48, %s5194_s6 }
0x168e   :  { %v2805_v49 = vpop.permute.xlu1 %2804 }
0x168f   :  { %v2807_v50 = vmul.f32 %v2805_v49, %v2790_v33 }
0x1691   :  { %2809 = vrot.lane.b32.xlu2 %v2807_v50, %s5195_s20 }
0x16eb   :  { %v6287_v54 = vpop.permute.xlu2 %2809 }
0x16ec   :  { %4744 = vmatmul.msk.f32.vlgmr.msrb.gmra.mxu1 %vm1997_vm4, %v6287_v54 }
0x16ed   :  { %3112 = vmatpush.msrb.mxu1 %v6254_v51 }
0x16ef   :  { %3113 = vmatpush.msrb.mxu1 %v6259_v52 }
0x16f1   :  { %3114 = vmatpush.msrb.mxu1 %v6266_v29 }
0x16f3   :  { %3115 = vmatpush.msrb.mxu1 %v6275_v53 }
0x16f4   :  { %4759 = vmatmul.msk.f32.vlgmr.msra.gmra.mxu1 %vm1997_vm4, %v6171_v2 }
0x16f5   :  { %3194 = vmatpush.msra.mxu1 %v6311_v7 }
0x16f7   :  { %3195 = vmatpush.msra.mxu1 %v6316_v13 }
0x16f9   :  { %3196 = vmatpush.msra.mxu1 %v6322_v9 }
0x16fb   :  { %3197 = vmatpush.msra.mxu1 %v6328_v10 }
0x1769   :  { %v2830_v15 = vpop.f32.mrf.mxu1 }
0x176a   :  { %v2833_v40 = vadd.f32 %v2830_v15, %v2562_v56 }
0x176c   :  { %5072 = vtanh.f32 %v2833_v40  ;;  %v2602_v40 = vadd.f32 %v6139_v39, %v6211_v16 }
0x1771   :  { %v3037_v11 = vpop.f32.mrf.mxu1 }
0x1772   :  { %v5073_v17 = vpop.eup %5072  ;;  %v3038_v20 = vadd.f32 %v6354_v14, %v3037_v11 }
0x1773   :  { %v2835_v60 = vmul.f32 %v5073_v17, %v5991_v1 }
0x1775   :  { %v2836_v62 = vadd.f32 %v2835_v60, %v5993_v12 }
0x1777   :  { %2839 = vrot.lane.b32.xlu0 %v2836_v62, %s5194_s6  ;;  %v2837_v0 = vmul.f32 %v2836_v62, %v2801_v47 }
0x17e9   :  { %v2840_v18 = vpop.permute.xlu0 %2839 }
0x17ea   :  { %v2842_v63 = vmul.f32 %v2840_v18, %v2836_v62 }
0x17ec   :  { %2844 = vrot.lane.b32.xlu1 %v2842_v63, %s5195_s20 }
0x185e   :  { %v2845_v3 = vpop.permute.xlu1 %2844 }
0x185f   :  { %v6303_v2 = vadd.f32 %v2845_v3, %v2837_v0 }
0x1861   :  { %5074 = vtanh.f32 %v6303_v2 }
0x1867   :  { %v5075_v38 = vpop.eup %5074 }
0x1868   :  { %2850 = vrot.lane.b32.xlu2 %v5075_v38, %s5194_s6 }
0x18c2   :  { %v2851_v5 = vpop.permute.xlu2 %2850 }
0x18c3   :  { %v2853_v59 = vmul.f32 %v2851_v5, %v2836_v62 }
0x18c5   :  { %2855 = vrot.lane.b32.xlu0 %v2853_v59, %s5195_s20 }
0x1937   :  { %v2856_v19 = vpop.permute.xlu0 %2855 }
0x1938   :  { %4745 = vmatmul.msk.f32.vlgmr.msrb.gmra.mxu3 %vm1997_vm4, %v2856_v19  ;;  %4763 = vmatmul.msk.f32.vlgmr.msrb.gmra.mxu1 %vm1997_vm4, %v2856_v19 }
0x1939   :  { %3132 = vmatpush.msrb.mxu3 %v6254_v51  ;;  %3378 = vmatpush.msrb.mxu1 %v6311_v7 }
0x193b   :  { %3133 = vmatpush.msrb.mxu3 %v6259_v52  ;;  %3379 = vmatpush.msrb.mxu1 %v6316_v13 }
0x193d   :  { %3134 = vmatpush.msrb.mxu3 %v6266_v29  ;;  %3380 = vmatpush.msrb.mxu1 %v6322_v9 }
0x193f   :  { %3135 = vmatpush.msrb.mxu3 %v6275_v53  ;;  %3381 = vmatpush.msrb.mxu1 %v6328_v10 }
0x1940   :  { %4760 = vmatmul.msk.f32.vlgmr.msra.gmra.mxu3 %vm1997_vm4, %v6199_v58  ;;  %3198 = vmatmul.f32.vlgmr.msra.gmra.mxu1 %v5192_v36  ;;  %v2582_v58 = vadd.f32 %v6139_v39, %v6179_v4 }
0x1941   :  { %3240 = vmatpush.msra.mxu3 %v6311_v7 }
0x1943   :  { %3241 = vmatpush.msra.mxu3 %v6316_v13 }
0x1945   :  { %3242 = vmatpush.msra.mxu3 %v6322_v9 }
0x1947   :  { %3243 = vmatpush.msra.mxu3 %v6328_v10 }
0x19b5   :  { %v6349_v8 = vpop.f32.mrf.mxu1 }
0x19bb   :  { %v2876_v36 = vpop.f32.mrf.mxu3 }
0x19bc   :  { %v2879_v45 = vadd.f32 %v2876_v36, %v2582_v58 }
0x19bd   :  { %v3199_v23 = vpop.f32.mrf.mxu1 }
0x19be   :  { %5076 = vtanh.f32 %v2879_v45  ;;  %v3202_v57 = vadd.f32 %v3199_v23, %v3038_v20 }
0x19c0   :  { %5078 = vtanh.f32 %v3202_v57 }
0x19c3   :  { %v3057_v15 = vpop.f32.mrf.mxu3 }
0x19c4   :  { %v5077_v24 = vpop.eup %5076  ;;  %v3058_v0 = vadd.f32 %v6354_v14, %v3057_v15 }
0x19c5   :  { %v2881_v25 = vmul.f32 %v5077_v24, %v5991_v1 }
0x19c6   :  { %v5079_v22 = vpop.eup %5078 }
0x19c7   :  { %v3204_v27 = vmul.f32 %v5079_v22, %v5991_v1  ;;  %v2882_v6 = vadd.f32 %v2881_v25, %v5993_v12 }
0x19c9   :  { %2885 = vrot.lane.b32.xlu1 %v2882_v6, %s5194_s6  ;;  %v3205_v4 = vadd.f32 %v3204_v27, %v5993_v12  ;;  %v2883_v33 = vmul.f32 %v2882_v6, %v6303_v2 }
0x19cb   :  { %3208 = vrot.lane.b32.xlu2 %v3205_v4, %s5194_s6  ;;  %v3206_v61 = vmul.f32 0.0, %v3205_v4 }
0x1a25   :  { %v3209_v28 = vpop.permute.xlu2 %3208 }
0x1a26   :  { %v3211_v30 = vmul.f32 %v3209_v28, %v3205_v4 }
0x1a28   :  { %3213 = vrot.lane.b32.xlu1 %v3211_v30, %s5195_s20 }
0x1a3b   :  { %v2886_v35 = vpop.permute.xlu1 %2885 }
0x1a3c   :  { %v2888_v42 = vmul.f32 %v2886_v35, %v2882_v6 }
0x1a3e   :  { %2890 = vrot.lane.b32.xlu0 %v2888_v42, %s5195_s20 }
0x1a9a   :  { %v3214_v43 = vpop.permute.xlu1 %3213 }
0x1a9b   :  { %v6367_v55 = vadd.f32 %v3214_v43, %v3206_v61 }
0x1a9d   :  { %5080 = vtanh.f32 %v6367_v55 }
0x1aa3   :  { %v5081_v32 = vpop.eup %5080 }
0x1aa4   :  { %3219 = vrot.lane.b32.xlu0 %v5081_v32, %s5194_s6 }
0x1ab0   :  { %v2891_v44 = vpop.permute.xlu0 %2890 }
0x1ab1   :  { %v2893_v34 = vadd.f32 %v2891_v44, %v2883_v33 }
0x1ab3   :  { %5082 = vtanh.f32 %v2893_v34 }
0x1ab9   :  { %v5083_v41 = vpop.eup %5082 }
0x1aba   :  { %2896 = vrot.lane.b32.xlu2 %v5083_v41, %s5194_s6 }
0x1b14   :  { %v2897_v46 = vpop.permute.xlu2 %2896 }
0x1b15   :  { %v2899_v47 = vmul.f32 %v2897_v46, %v2882_v6 }
0x1b16   :  { %v3220_v48 = vpop.permute.xlu0 %3219 }
0x1b17   :  { %v3222_v49 = vmul.f32 %v3220_v48, %v3205_v4  ;;  %2901 = vrot.lane.b32.xlu1 %v2899_v47, %s5195_s20 }
0x1b19   :  { %3224 = vrot.lane.b32.xlu2 %v3222_v49, %s5195_s20 }
0x1b73   :  { %v3225_v56 = vpop.permute.xlu2 %3224 }
0x1b89   :  { %v2902_v50 = vpop.permute.xlu1 %2901 }
0x1b8a   :  { %4746 = vmatmul.msk.f32.vlgmr.msrb.gmra.mxu0 %vm1997_vm4, %v2902_v50  ;;  %4764 = vmatmul.msk.f32.vlgmr.msrb.gmra.mxu3 %vm1997_vm4, %v2902_v50 }
0x1b8b   :  { %3152 = vmatpush.msrb.mxu0 %v6254_v51  ;;  %3424 = vmatpush.msrb.mxu3 %v6311_v7 }
0x1b8d   :  { %3153 = vmatpush.msrb.mxu0 %v6259_v52  ;;  %3425 = vmatpush.msrb.mxu3 %v6316_v13 }
0x1b8f   :  { %3154 = vmatpush.msrb.mxu0 %v6266_v29  ;;  %3426 = vmatpush.msrb.mxu3 %v6322_v9 }
0x1b91   :  { %3155 = vmatpush.msrb.mxu0 %v6275_v53  ;;  %3427 = vmatpush.msrb.mxu3 %v6328_v10 }
0x1b92   :  { %4761 = vmatmul.msk.f32.vlgmr.msra.gmra.mxu0 %vm1997_vm4, %v6237_v31  ;;  %4767 = vmatmul.msk.f32.vlgmr.msra.gmra.mxu3 %vm1997_vm4, %v3225_v56 }
0x1b93   :  { %3286 = vmatpush.msra.mxu0 %v6311_v7 }
0x1b95   :  { %3287 = vmatpush.msra.mxu0 %v6316_v13 }
0x1b97   :  { %3288 = vmatpush.msra.mxu0 %v6322_v9 }
0x1b99   :  { %3289 = vmatpush.msra.mxu0 %v6328_v10 }
0x1c07   :  { %v2922_v17 = vpop.f32.mrf.mxu0 }
0x1c08   :  { %v2925_v60 = vadd.f32 %v2922_v17, %v2602_v40 }
0x1c0a   :  { %5084 = vtanh.f32 %v2925_v60 }
0x1c0d   :  { %v6394_v62 = vpop.f32.mrf.mxu3 }
0x1c10   :  { %v5085_v31 = vpop.eup %5084 }
0x1c11   :  { %v2927_v18 = vmul.f32 %v5085_v31, %v5991_v1 }
0x1c13   :  { %v2928_v63 = vadd.f32 %v2927_v18, %v5993_v12 }
0x1c15   :  { %2931 = vrot.lane.b32.xlu0 %v2928_v63, %s5194_s6  ;;  %v3245_v3 = vpop.f32.mrf.mxu3  ;;  %v2929_v36 = vmul.f32 %v2928_v63, %v2893_v34 }
0x1c16   :  { %v3248_v2 = vadd.f32 %v3245_v3, %v3058_v0 }
0x1c18   :  { %5086 = vtanh.f32 %v3248_v2 }
0x1c1e   :  { %v5087_v38 = vpop.eup %5086 }
0x1c1f   :  { %v3250_v16 = vmul.f32 %v5087_v38, %v5991_v1 }
0x1c21   :  { %v3251_v5 = vadd.f32 %v3250_v16, %v5993_v12 }
0x1c23   :  { %3254 = vrot.lane.b32.xlu1 %v3251_v5, %s5194_s6  ;;  %v3252_v57 = vmul.f32 %v3251_v5, %v6367_v55 }
0x1c87   :  { %v2932_v59 = vpop.permute.xlu0 %2931 }
0x1c88   :  { %v2934_v19 = vmul.f32 %v2932_v59, %v2928_v63 }
0x1c8a   :  { %2936 = vrot.lane.b32.xlu2 %v2934_v19, %s5195_s20 }
0x1c95   :  { %v3255_v11 = vpop.permute.xlu1 %3254 }
0x1c96   :  { %v3257_v58 = vmul.f32 %v3255_v11, %v3251_v5 }
0x1c98   :  { %3259 = vrot.lane.b32.xlu0 %v3257_v58, %s5195_s20 }
0x1ce4   :  { %v2937_v20 = vpop.permute.xlu2 %2936 }
0x1ce5   :  { %v2939_v45 = vadd.f32 %v2937_v20, %v2929_v36 }
0x1ce7   :  { %5088 = vtanh.f32 %v2939_v45 }
0x1ced   :  { %v5089_v23 = vpop.eup %5088 }
0x1cee   :  { %2942 = vrot.lane.b32.xlu1 %v5089_v23, %s5194_s6 }
0x1d0a   :  { %v3260_v24 = vpop.permute.xlu0 %3259 }
0x1d0b   :  { %v3262_v25 = vadd.f32 %v3260_v24, %v3252_v57 }
0x1d0d   :  { %5090 = vtanh.f32 %v3262_v25 }
0x1d13   :  { %v5091_v22 = vpop.eup %5090 }
0x1d14   :  { %3265 = vrot.lane.b32.xlu2 %v5091_v22, %s5194_s6 }
0x1d60   :  { %v2943_v27 = vpop.permute.xlu1 %2942 }
0x1d61   :  { %v2945_v6 = vmul.f32 %v2943_v27, %v2928_v63 }
0x1d63   :  { %2947 = vrot.lane.b32.xlu0 %v2945_v6, %s5195_s20 }
0x1d6e   :  { %v3266_v4 = vpop.permute.xlu2 %3265 }
0x1d6f   :  { %v3268_v28 = vmul.f32 %v3266_v4, %v3251_v5 }
0x1d71   :  { %3270 = vrot.lane.b32.xlu1 %v3268_v28, %s5195_s20 }
0x1dd5   :  { %v2948_v30 = vpop.permute.xlu0 %2947 }
0x1dd6   :  { %4747 = vmatmul.msk.f32.vlgmr.msra.gmra.mxu2 %vm1997_vm4, %v2948_v30  ;;  %4765 = vmatmul.msk.f32.vlgmr.msrb.gmra.mxu0 %vm1997_vm4, %v2948_v30 }
0x1dd7   :  { %3174 = vmatpush.msra.mxu2 %v6254_v51  ;;  %3470 = vmatpush.msrb.mxu0 %v6311_v7 }
0x1dd9   :  { %3175 = vmatpush.msra.mxu2 %v6259_v52  ;;  %3471 = vmatpush.msrb.mxu0 %v6316_v13  ;;  %v3077_v52 = vpop.f32.mrf.mxu0 }
0x1ddb   :  { %3176 = vmatpush.msra.mxu2 %v6266_v29  ;;  %3472 = vmatpush.msrb.mxu0 %v6322_v9  ;;  %v2627_v29 = vadd.f32 %v6139_v39, %v6242_v37 }
0x1ddd   :  { %3177 = vmatpush.msra.mxu2 %v6275_v53  ;;  %3473 = vmatpush.msrb.mxu0 %v6328_v10 }
0x1dde   :  { %4762 = vmatmul.msk.f32.vlgmr.msrb.gmra.mxu2 %vm1997_vm4, %v6287_v54  ;;  %v3078_v54 = vadd.f32 %v6354_v14, %v3077_v52 }
0x1ddf   :  { %3332 = vmatpush.msrb.mxu2 %v6311_v7 }
0x1de1   :  { %3333 = vmatpush.msrb.mxu2 %v6316_v13 }
0x1de3   :  { %v3271_v51 = vpop.permute.xlu1 %3270  ;;  %3334 = vmatpush.msrb.mxu2 %v6322_v9 }
0x1de4   :  { %4768 = vmatmul.msk.f32.vlgmr.msra.gmra.mxu0 %vm1997_vm4, %v3271_v51 }
0x1de5   :  { %3335 = vmatpush.msrb.mxu2 %v6328_v10 }
0x1e53   :  { %v6429_v53 = vpop.f32.mrf.mxu0 }
0x1e59   :  { %v2968_v35 = vpop.f32.mrf.mxu2 }
0x1e5a   :  { %v2971_v42 = vadd.f32 %v2968_v35, %v2627_v29 }
0x1e5c   :  { %5092 = vtanh.f32 %v2971_v42 }
0x1e61   :  { %v3291_v61 = vpop.f32.mrf.mxu0  ;;  %v3097_v38 = vpop.f32.mrf.mxu2 }
0x1e62   :  { %v5093_v43 = vpop.eup %5092  ;;  %v3294_v55 = vadd.f32 %v3291_v61, %v3078_v54  ;;  %v3098_v5 = vadd.f32 %v6354_v14, %v3097_v38 }
0x1e63   :  { %v2973_v32 = vmul.f32 %v5093_v43, %v5991_v1  ;;  %v3138_v43 = vadd.f32 %v6354_v14, %v6394_v62 }
0x1e64   :  { %5094 = vtanh.f32 %v3294_v55 }
0x1e65   :  { %v2974_v33 = vadd.f32 %v2973_v32, %v5993_v12 }
0x1e67   :  { %2977 = vrot.lane.b32.xlu2 %v2974_v33, %s5194_s6  ;;  %v2975_v48 = vmul.f32 %v2974_v33, %v2939_v45 }
0x1e6a   :  { %v5095_v44 = vpop.eup %5094 }
0x1e6b   :  { %v3296_v39 = vmul.f32 %v5095_v44, %v5991_v1 }
0x1e6d   :  { %v3297_v37 = vadd.f32 %v3296_v39, %v5993_v12 }
0x1e6f   :  { %3300 = vrot.lane.b32.xlu0 %v3297_v37, %s5194_s6  ;;  %v3298_v56 = vmul.f32 %v3297_v37, %v3262_v25  ;;  %v3118_v25 = vadd.f32 %v6354_v14, %v6349_v8 }
0x1ec1   :  { %v2978_v34 = vpop.permute.xlu2 %2977 }
0x1ec2   :  { %v2980_v41 = vmul.f32 %v2978_v34, %v2974_v33 }
0x1ec4   :  { %2982 = vrot.lane.b32.xlu1 %v2980_v41, %s5195_s20 }
0x1ee1   :  { %v3301_v46 = vpop.permute.xlu0 %3300 }
0x1ee2   :  { %v3303_v47 = vmul.f32 %v3301_v46, %v3297_v37 }
0x1ee4   :  { %3305 = vrot.lane.b32.xlu2 %v3303_v47, %s5195_s20 }
0x1f36   :  { %v2983_v49 = vpop.permute.xlu1 %2982 }
0x1f37   :  { %v6440_v50 = vadd.f32 %v2983_v49, %v2975_v48 }
0x1f39   :  { %5096 = vtanh.f32 %v6440_v50 }
0x1f3e   :  { %v3306_v15 = vpop.permute.xlu2 %3305 }
0x1f3f   :  { %v5097_v40 = vpop.eup %5096  ;;  %v3308_v17 = vadd.f32 %v3306_v15, %v3298_v56  ;;  %v3158_v15 = vadd.f32 %v6354_v14, %v6429_v53 }
0x1f40   :  { %2988 = vrot.lane.b32.xlu0 %v5097_v40, %s5194_s6 }
0x1f41   :  { %5098 = vtanh.f32 %v3308_v17 }
0x1f47   :  { %v5099_v60 = vpop.eup %5098 }
0x1f48   :  { %3311 = vrot.lane.b32.xlu1 %v5099_v60, %s5194_s6 }
0x1fb2   :  { %v2989_v31 = vpop.permute.xlu0 %2988 }
0x1fb3   :  { %v2991_v18 = vmul.f32 %v2989_v31, %v2974_v33 }
0x1fb5   :  { %2993 = vrot.lane.b32.xlu2 %v2991_v18, %s5195_s20 }
0x1fba   :  { %v3312_v63 = vpop.permute.xlu1 %3311 }
0x1fbb   :  { %v3314_v0 = vmul.f32 %v3312_v63, %v3297_v37 }
0x1fbd   :  { %3316 = vrot.lane.b32.xlu0 %v3314_v0, %s5195_s20 }
0x200f   :  { %v2994_v3 = vpop.permute.xlu2 %2993 }
0x2010   :  { %4748 = vst.msk [vmem:[%s6675_s18 + $0x2] sm:$0x3] %vm2997_vm8, %v2994_v3  ;;  %4766 = vmatmul.msk.f32.vlgmr.msra.gmra.mxu2 %vm1997_vm4, %v2994_v3 }
0x2011   :  { %3516 = vmatpush.msra.mxu2 %v6311_v7 }
0x2013   :  { %3517 = vmatpush.msra.mxu2 %v6316_v13 }
0x2015   :  { %3518 = vmatpush.msra.mxu2 %v6322_v9 }
0x2017   :  { %3519 = vmatpush.msra.mxu2 %v6328_v10 }
0x202f   :  { %v3317_v2 = vpop.permute.xlu0 %3316 }
0x2030   :  { %4769 = vmatmul.msk.f32.vlgmr.msrb.gmra.mxu2 %vm1997_vm4, %v3317_v2 }
0x2093   :  { %v6457_v16 = vpop.f32.mrf.mxu2 }
0x20b3   :  { %v3337_v59 = vpop.f32.mrf.mxu2 }
0x20b4   :  { %v3340_v19 = vadd.f32 %v3337_v59, %v3098_v5 }
0x20b6   :  { %5100 = vtanh.f32 %v3340_v19 }
0x20bc   :  { %v5101_v11 = vpop.eup %5100 }
0x20bd   :  { %v3342_v7 = vmul.f32 %v5101_v11, %v5991_v1  ;;  %v3180_v11 = vadd.f32 %v6354_v14, %v6457_v16  ;;  %v3558_v16 = vld [vmem:[%s6668_s11 + $0x8] sm:$0xff] }
0x20bf   :  { %v3343_v13 = vadd.f32 %v3342_v7, %v5993_v12 }
0x20c1   :  { %3346 = vrot.lane.b32.xlu1 %v3343_v13, %s5194_s6  ;;  %v3344_v58 = vmul.f32 %v3343_v13, %v3308_v17 }
0x2133   :  { %v3347_v9 = vpop.permute.xlu1 %3346 }
0x2134   :  { %v3349_v10 = vmul.f32 %v3347_v9, %v3343_v13 }
0x2136   :  { %3351 = vrot.lane.b32.xlu2 %v3349_v10, %s5195_s20 }
0x2190   :  { %v3352_v36 = vpop.permute.xlu2 %3351 }
0x2191   :  { %v3354_v20 = vadd.f32 %v3352_v36, %v3344_v58 }
0x2193   :  { %5102 = vtanh.f32 %v3354_v20 }
0x2199   :  { %v5103_v45 = vpop.eup %5102 }
0x219a   :  { %3357 = vrot.lane.b32.xlu0 %v5103_v45, %s5194_s6 }
0x220c   :  { %v3358_v23 = vpop.permute.xlu0 %3357 }
0x220d   :  { %v3360_v57 = vmul.f32 %v3358_v23, %v3343_v13 }
0x220f   :  { %3362 = vrot.lane.b32.xlu1 %v3360_v57, %s5195_s20 }
0x2281   :  { %v3363_v24 = vpop.permute.xlu1 %3362 }
0x2282   :  { %4770 = vmatmul.msk.f32.vlgmr.msrb.gmra.mxu1 %vm1997_vm4, %v3363_v24  ;;  %v3557_v24 = vld [vmem:[%s6668_s11] sm:$0xff] }
0x22ff   :  { %v3383_v22 = vpop.f32.mrf.mxu1 }
0x2300   :  { %v3386_v27 = vadd.f32 %v3383_v22, %v3118_v25 }
0x2302   :  { %5104 = vtanh.f32 %v3386_v27 }
0x2308   :  { %v5105_v6 = vpop.eup %5104 }
0x2309   :  { %v3388_v4 = vmul.f32 %v5105_v6, %v5991_v1  ;;  %v5196_v6 = vmov 2.0  }
0x230b   :  { %v3389_v28 = vadd.f32 %v3388_v4, %v5993_v12  ;;  %v5011_v4 = vld [vmem:[%s6669_s12] ss:$0 sm:$0xff] }
0x230d   :  { %3392 = vrot.lane.b32.xlu2 %v3389_v28, %s5194_s6  ;;  %v3390_v52 = vmul.f32 %v3389_v28, %v3354_v20 }
0x2367   :  { %v3393_v30 = vpop.permute.xlu2 %3392 }
0x2368   :  { %v3395_v51 = vmul.f32 %v3393_v30, %v3389_v28 }
0x236a   :  { %3397 = vrot.lane.b32.xlu0 %v3395_v51, %s5195_s20 }
0x23dc   :  { %v3398_v29 = vpop.permute.xlu0 %3397 }
0x23dd   :  { %v3400_v35 = vadd.f32 %v3398_v29, %v3390_v52 }
0x23df   :  { %5106 = vtanh.f32 %v3400_v35 }
0x23e5   :  { %v5107_v42 = vpop.eup %5106 }
0x23e6   :  { %3403 = vrot.lane.b32.xlu1 %v5107_v42, %s5194_s6 }
0x2458   :  { %v3404_v8 = vpop.permute.xlu1 %3403 }
0x2459   :  { %v3406_v54 = vmul.f32 %v3404_v8, %v3389_v28 }
0x245b   :  { %3408 = vrot.lane.b32.xlu2 %v3406_v54, %s5195_s20 }
0x24b5   :  { %v3409_v61 = vpop.permute.xlu2 %3408 }
0x24b6   :  { %4771 = vmatmul.msk.f32.vlgmr.msrb.gmra.mxu3 %vm1997_vm4, %v3409_v61 }
0x2539   :  { %v3429_v55 = vpop.f32.mrf.mxu3 }
0x253a   :  { %v3432_v32 = vadd.f32 %v3429_v55, %v3138_v43 }
0x253c   :  { %5108 = vtanh.f32 %v3432_v32 }
0x2542   :  { %v5109_v33 = vpop.eup %5108 }
0x2543   :  { %v3434_v44 = vmul.f32 %v5109_v33, %v5991_v1 }
0x2545   :  { %v3435_v39 = vadd.f32 %v3434_v44, %v5993_v12 }
0x2547   :  { %3438 = vrot.lane.b32.xlu0 %v3435_v39, %s5194_s6  ;;  %v3436_v41 = vmul.f32 %v3435_v39, %v3400_v35 }
0x25b9   :  { %v3439_v37 = vpop.permute.xlu0 %3438 }
0x25ba   :  { %v3441_v34 = vmul.f32 %v3439_v37, %v3435_v39 }
0x25bc   :  { %3443 = vrot.lane.b32.xlu1 %v3441_v34, %s5195_s20 }
0x262e   :  { %v3444_v46 = vpop.permute.xlu1 %3443 }
0x262f   :  { %v3446_v47 = vadd.f32 %v3444_v46, %v3436_v41 }
0x2631   :  { %5110 = vtanh.f32 %v3446_v47 }
0x2637   :  { %v5111_v48 = vpop.eup %5110 }
0x2638   :  { %3449 = vrot.lane.b32.xlu2 %v5111_v48, %s5194_s6 }
0x2692   :  { %v3450_v62 = vpop.permute.xlu2 %3449 }
0x2693   :  { %v3452_v49 = vmul.f32 %v3450_v62, %v3435_v39  ;;  %v4780_v62 = vld [vmem:[%s6668_s11 + $0x38] sm:$0xff] }
0x2694   :  { %3661 = vmatpush.msra.mxu3 %v4780_v62 }
0x2695   :  { %3454 = vrot.lane.b32.xlu0 %v3452_v49, %s5195_s20 }
0x2707   :  { %v3455_v56 = vpop.permute.xlu0 %3454 }
0x2708   :  { %4772 = vmatmul.msk.f32.vlgmr.msrb.gmra.mxu0 %vm1997_vm4, %v3455_v56  ;;  %v4779_v56 = vld [vmem:[%s6668_s11 + $0x30] sm:$0xff] }
0x2709   :  { %3662 = vmatpush.msra.mxu3 %v4779_v56 }
0x2785   :  { %v3475_v40 = vpop.f32.mrf.mxu0 }
0x2786   :  { %v3478_v17 = vadd.f32 %v3475_v40, %v3158_v15  ;;  %v4778_v40 = vld [vmem:[%s6668_s11 + $0x28] sm:$0xff] }
0x2787   :  { %3663 = vmatpush.msra.mxu3 %v4778_v40  ;;  %v5017_v40 = vld [vmem:[%s6669_s12 + $0x2] ss:$0 sm:$0xff] }
0x2788   :  { %5112 = vtanh.f32 %v3478_v17 }
0x278e   :  { %v5113_v60 = vpop.eup %5112 }
0x278f   :  { %v3480_v31 = vmul.f32 %v5113_v60, %v5991_v1  ;;  %v4777_v60 = vld [vmem:[%s6668_s11 + $0x20] sm:$0xff] }
0x2790   :  { %3664 = vmatpush.msra.mxu3 %v4777_v60 }
0x2791   :  { %v3481_v18 = vadd.f32 %v3480_v31, %v5993_v12 }
0x2793   :  { %3484 = vrot.lane.b32.xlu1 %v3481_v18, %s5194_s6  ;;  %v3482_v3 = vmul.f32 %v3481_v18, %v3446_v47 }
0x2805   :  { %v3485_v63 = vpop.permute.xlu1 %3484 }
0x2806   :  { %v3487_v0 = vmul.f32 %v3485_v63, %v3481_v18 }
0x2808   :  { %3489 = vrot.lane.b32.xlu2 %v3487_v0, %s5195_s20 }
0x2862   :  { %v3490_v2 = vpop.permute.xlu2 %3489 }
0x2863   :  { %v3492_v38 = vadd.f32 %v3490_v2, %v3482_v3 }
0x2865   :  { %5114 = vtanh.f32 %v3492_v38 }
0x286b   :  { %v5115_v5 = vpop.eup %5114 }
0x286c   :  { %3495 = vrot.lane.b32.xlu0 %v5115_v5, %s5194_s6 }
0x28de   :  { %v3496_v53 = vpop.permute.xlu0 %3495 }
0x28df   :  { %v3498_v59 = vmul.f32 %v3496_v53, %v3481_v18 }
0x28e1   :  { %3500 = vrot.lane.b32.xlu1 %v3498_v59, %s5195_s20 }
0x2953   :  { %v3501_v19 = vpop.permute.xlu1 %3500 }
0x2954   :  { %4773 = vmatmul.msk.f32.vlgmr.msra.gmra.mxu2 %vm1997_vm4, %v3501_v19  ;;  %v5012_v19 = vld [vmem:[%s6670_s13] ss:$0 sm:$0xff] }
0x29d7   :  { %v3521_v7 = vpop.f32.mrf.mxu2 }
0x29d8   :  { %v3524_v13 = vadd.f32 %v3521_v7, %v3180_v11 }
0x29da   :  { %5116 = vtanh.f32 %v3524_v13  ;;  %v5013_v13 = vld [vmem:[%s6671_s14] ss:$0 sm:$0xff] }
0x29e0   :  { %v5117_v9 = vpop.eup %5116 }
0x29e1   :  { %v3526_v10 = vmul.f32 %v5117_v9, %v5991_v1  ;;  %v3560_v1 = vld [vmem:[%s6668_s11 + $0x18] sm:$0xff] }
0x29e2   :  { %3579 = vmatpush.msra.mxu1 %v3560_v1 }
0x29e3   :  { %v3527_v58 = vadd.f32 %v3526_v10, %v5993_v12  ;;  %v3559_v12 = vld [vmem:[%s6668_s11 + $0x10] sm:$0xff] }
0x29e4   :  { %3580 = vmatpush.msra.mxu1 %v3559_v12 }
0x29e5   :  { %3530 = vrot.lane.b32.xlu2 %v3527_v58, %s5194_s6  ;;  %v3528_v45 = vmul.f32 %v3527_v58, %v3492_v38 }
0x29e6   :  { %3581 = vmatpush.msra.mxu1 %v3558_v16 }
0x29e8   :  { %3582 = vmatpush.msra.mxu1 %v3557_v24 }
0x2a3f   :  { %v3531_v36 = vpop.permute.xlu2 %3530 }
0x2a40   :  { %v3533_v20 = vmul.f32 %v3531_v36, %v3527_v58 }
0x2a42   :  { %3535 = vrot.lane.b32.xlu0 %v3533_v20, %s5195_s20 }
0x2ab4   :  { %v3536_v23 = vpop.permute.xlu0 %3535 }
0x2ab5   :  { %v6500_v57 = vadd.f32 %v3536_v23, %v3528_v45 }
0x2ab7   :  { %5118 = vtanh.f32 %v6500_v57 }
0x2ab8   :  { %5120 = vrcp.f32 %v5196_v6 }
0x2abd   :  { %v5119_v14 = vpop.eup %5118 }
0x2abe   :  { %3541 = vrot.lane.b32.xlu1 %v5119_v14, %s5194_s6  ;;  %v5121_v28 = vpop.eup %5120 }
0x2abf   :  { %v3597_v52 = vmul.f32 2.0, %v5121_v28  ;;  %vm3601_vm9 = vweird.f32 %v5121_v28 }
0x2ac1   :  { %v3598_v42 = vsub.f32 1.0, %v3597_v52 }
0x2ac3   :  { %v3599_v61 = vmul.f32 %v5121_v28, %v3598_v42  ;;  %v4786_v42 = vld [vmem:[%s6668_s11 + $0x48] sm:$0xff] }
0x2ac5   :  { %v3600_v32 = vadd.f32 %v5121_v28, %v3599_v61 }
0x2ac7   :  { %v6526_v39 = vsel %vm3601_vm9, %v5121_v28, %v3600_v32 }
0x2b30   :  { %v3542_v25 = vpop.permute.xlu1 %3541 }
0x2b31   :  { %v3544_v22 = vmul.f32 %v3542_v25, %v3527_v58  ;;  %v5014_v58 = vld [vmem:[%s6669_s12 + $0x1] ss:$0 sm:$0xff] }
0x2b33   :  { %3546 = vrot.lane.b32.xlu2 %v3544_v22, %s5195_s20 }
0x2b8d   :  { %v3547_v27 = vpop.permute.xlu2 %3546 }
0x2b8e   :  { %4774 = vst.msk [vmem:[%s6675_s18 + $0x4] sm:$0x3] %vm2997_vm8, %v3547_v27  ;;  %4776 = vmatmul.msk.f32.vlgmr.msra.gmra.mxu1 %vm1997_vm4, %v3547_v27 }
0x2c0b   :  { %v3584_v30 = vpop.f32.mrf.mxu1 }
0x2c0c   :  { %v3585_v51 = vadd.f32 %v5011_v4, %v3584_v30 }
0x2c0e   :  { %v3587_v29 = vmul.f32 0.01, %v3585_v51 }
0x2c10   :  { %v3588_v35 = vmax.f32 %v3585_v51, %v3587_v29  ;;  %v4788_v51 = vld [vmem:[%s6668_s11 + $0x58] sm:$0xff]  ;;  %v4787_v29 = vld [vmem:[%s6668_s11 + $0x50] sm:$0xff] }
0x2c11   :  { %3738 = vmatpush.msra.mxu0 %v4788_v51 }
0x2c12   :  { %v3589_v8 = vsel %vm2997_vm8, %v3588_v35, 0.0 }
0x2c13   :  { %v3590_v54 = vrot.slane %v3589_v8, 4  ;;  %3739 = vmatpush.msra.mxu0 %v4787_v29 }
0x2c15   :  { %v3591_v43 = vadd.f32 %v3590_v54, %v3589_v8  ;;  %3740 = vmatpush.msra.mxu0 %v4786_v42  ;;  %v4785_v54 = vld [vmem:[%s6668_s11 + $0x40] sm:$0xff] }
0x2c16   :  { %v5020_v42 = vld [vmem:[%s6669_s12 + $0x3] ss:$0 sm:$0xff] }
0x2c17   :  { %v3592_v55 = vrot.slane %v3591_v43, 2  ;;  %3741 = vmatpush.msra.mxu0 %v4785_v54 }
0x2c19   :  { %v3593_v33 = vadd.f32 %v3592_v55, %v3591_v43 }
0x2c1b   :  { %v3594_v44 = vrot.slane %v3593_v33, 1 }
0x2c1d   :  { %v3595_v37 = vadd.f32 %v3594_v44, %v3593_v33 }
0x2c1f   :  { %v3603_v34 = vmul.f32 %v6526_v39, %v3595_v37 }
0x2c21   :  { %v3604_v41 = vsub.f32 %v3588_v35, %v3603_v34 }
0x2c23   :  { %v3605_v46 = vmul.f32 %v3604_v41, %v3604_v41 }
0x2c25   :  { %v3606_v47 = vsel %vm2997_vm8, %v3605_v46, 0.0 }
0x2c26   :  { %v3607_v48 = vrot.slane %v3606_v47, 4 }
0x2c28   :  { %v3608_v49 = vadd.f32 %v3607_v48, %v3606_v47  ;;  %v5015_v47 = vld [vmem:[%s6670_s13 + $0x1] ss:$0 sm:$0xff] }
0x2c2a   :  { %v3609_v15 = vrot.slane %v3608_v49, 2 }
0x2c2c   :  { %v3610_v17 = vadd.f32 %v3609_v15, %v3608_v49  ;;  %v5016_v49 = vld [vmem:[%s6671_s14 + $0x1] ss:$0 sm:$0xff] }
0x2c2e   :  { %v3611_v31 = vrot.slane %v3610_v17, 1 }
0x2c30   :  { %v3612_v18 = vadd.f32 %v3611_v31, %v3610_v17 }
0x2c32   :  { %v3613_v63 = vmul.f32 %v3612_v18, %v6526_v39 }
0x2c34   :  { %v3614_v0 = vadd.f32 1e-05, %v3613_v63 }
0x2c36   :  { %5122 = vrsqrt.f32 %v3614_v0  ;;  %vm3621_vm11 = vweird.f32 %v3614_v0 }
0x2c3c   :  { %v5123_v3 = vpop.eup %5122 }
0x2c3d   :  { %v3616_v2 = vmul.f32 %v5123_v3, %v3614_v0  ;;  %vm3622_vm10 = vweird.f32 %v5123_v3 }
0x2c3e   :  { %vm3623_vm12 = vmor %vm3621_vm11, %vm3622_vm10 }
0x2c3f   :  { %v3617_v38 = vmul.f32 %v5123_v3, %v3616_v2 }
0x2c41   :  { %v3618_v5 = vmul.f32 0.5, %v3617_v38 }
0x2c43   :  { %v3619_v53 = vsub.f32 1.5, %v3618_v5 }
0x2c45   :  { %v3620_v59 = vmul.f32 %v5123_v3, %v3619_v53 }
0x2c47   :  { %v3624_v11 = vsel %vm3623_vm12, %v5123_v3, %v3620_v59 }
0x2c48   :  { %v3625_v7 = vmul.f32 %v3624_v11, %v3604_v41 }
0x2c4a   :  { %v3630_v9 = vmul.f32 %v5012_v19, %v3625_v7 }
0x2c4c   :  { %v3635_v10 = vadd.f32 %v5013_v13, %v3630_v9  ;;  %v4796_v9 = vld [vmem:[%s6668_s11 + $0x78] sm:$0xff] }
0x2c4d   :  { %3815 = vmatpush.msrb.mxu2 %v4796_v9 }
0x2c4e   :  { %4782 = vmatmul.msk.f32.vlgmr.msra.gmra.mxu3 %vm1997_vm4, %v3635_v10 }
0x2cd1   :  { %v3666_v36 = vpop.f32.mrf.mxu3 }
0x2cd2   :  { %v3667_v20 = vadd.f32 %v5014_v58, %v3666_v36  ;;  %v4795_v58 = vld [vmem:[%s6668_s11 + $0x70] sm:$0xff] }
0x2cd3   :  { %3816 = vmatpush.msrb.mxu2 %v4795_v58 }
0x2cd4   :  { %v3669_v45 = vmul.f32 0.01, %v3667_v20 }
0x2cd6   :  { %v3670_v23 = vmax.f32 %v3667_v20, %v3669_v45  ;;  %v4794_v20 = vld [vmem:[%s6668_s11 + $0x68] sm:$0xff] }
0x2cd7   :  { %3817 = vmatpush.msrb.mxu2 %v4794_v20  ;;  %v5023_v20 = vld [vmem:[%s6673_s16] ss:$0 sm:$0xff] }
0x2cd8   :  { %v3671_v14 = vsel %vm2997_vm8, %v3670_v23, 0.0 }
0x2cd9   :  { %v3672_v1 = vrot.slane %v3671_v14, 4 }
0x2cdb   :  { %v3673_v12 = vadd.f32 %v3672_v1, %v3671_v14 }
0x2cdd   :  { %v3674_v16 = vrot.slane %v3673_v12, 2 }
0x2cdf   :  { %v3675_v24 = vadd.f32 %v3674_v16, %v3673_v12 }
0x2ce1   :  { %v3676_v25 = vrot.slane %v3675_v24, 1 }
0x2ce3   :  { %v3677_v22 = vadd.f32 %v3676_v25, %v3675_v24 }
0x2ce5   :  { %v3678_v27 = vmul.f32 %v3677_v22, %v6526_v39 }
0x2ce7   :  { %v3679_v6 = vsub.f32 %v3670_v23, %v3678_v27  ;;  %v4793_v23 = vld [vmem:[%s6668_s11 + $0x60] sm:$0xff] }
0x2ce8   :  { %3818 = vmatpush.msrb.mxu2 %v4793_v23 }
0x2ce9   :  { %v3680_v4 = vmul.f32 %v3679_v6, %v3679_v6 }
0x2ceb   :  { %v3681_v28 = vsel %vm2997_vm8, %v3680_v4, 0.0 }
0x2cec   :  { %v3682_v30 = vrot.slane %v3681_v28, 4 }
0x2cee   :  { %v3683_v52 = vadd.f32 %v3682_v30, %v3681_v28  ;;  %v5018_v28 = vld [vmem:[%s6670_s13 + $0x2] ss:$0 sm:$0xff] }
0x2cf0   :  { %v3684_v35 = vrot.slane %v3683_v52, 2 }
0x2cf2   :  { %v3685_v8 = vadd.f32 %v3684_v35, %v3683_v52  ;;  %v5019_v52 = vld [vmem:[%s6671_s14 + $0x2] ss:$0 sm:$0xff] }
0x2cf4   :  { %v3686_v61 = vrot.slane %v3685_v8, 1 }
0x2cf6   :  { %v3687_v43 = vadd.f32 %v3686_v61, %v3685_v8 }
0x2cf8   :  { %v3688_v55 = vmul.f32 %v3687_v43, %v6526_v39 }
0x2cfa   :  { %v3689_v32 = vadd.f32 1e-05, %v3688_v55 }
0x2cfc   :  { %5124 = vrsqrt.f32 %v3689_v32  ;;  %vm3696_vm14 = vweird.f32 %v3689_v32 }
0x2d02   :  { %v5125_v33 = vpop.eup %5124 }
0x2d03   :  { %v3691_v44 = vmul.f32 %v5125_v33, %v3689_v32  ;;  %vm3697_vm13 = vweird.f32 %v5125_v33 }
0x2d04   :  { %vm3698_vm15 = vmor %vm3696_vm14, %vm3697_vm13 }
0x2d05   :  { %v3692_v37 = vmul.f32 %v5125_v33, %v3691_v44 }
0x2d07   :  { %v3693_v34 = vmul.f32 0.5, %v3692_v37 }
0x2d09   :  { %v3694_v41 = vsub.f32 1.5, %v3693_v34 }
0x2d0b   :  { %v3695_v46 = vmul.f32 %v5125_v33, %v3694_v41 }
0x2d0d   :  { %v3699_v48 = vsel %vm3698_vm15, %v5125_v33, %v3695_v46 }
0x2d0e   :  { %v3700_v62 = vmul.f32 %v3699_v48, %v3679_v6 }
0x2d10   :  { %v3706_v56 = vmul.f32 %v5015_v47, %v3700_v62 }
0x2d12   :  { %v3712_v15 = vadd.f32 %v5016_v49, %v3706_v56  ;;  %v3870_v56 = vld [vmem:[%s6672_s15 + $0x18] sm:$0xff] }
0x2d13   :  { %3890 = vmatpush.msrb.mxu1 %v3870_v56 }
0x2d14   :  { %4790 = vmatmul.msk.f32.vlgmr.msra.gmra.mxu0 %vm1997_vm4, %v3712_v15 }
0x2d91   :  { %v3743_v17 = vpop.f32.mrf.mxu0 }
0x2d92   :  { %v3744_v60 = vadd.f32 %v5017_v40, %v3743_v17  ;;  %v3869_v40 = vld [vmem:[%s6672_s15 + $0x10] sm:$0xff] }
0x2d93   :  { %3891 = vmatpush.msrb.mxu1 %v3869_v40 }
0x2d94   :  { %v3746_v31 = vmul.f32 0.01, %v3744_v60 }
0x2d96   :  { %v3747_v18 = vmax.f32 %v3744_v60, %v3746_v31  ;;  %v3868_v60 = vld [vmem:[%s6672_s15 + $0x8] sm:$0xff] }
0x2d97   :  { %3892 = vmatpush.msrb.mxu1 %v3868_v60 }
0x2d98   :  { %v3748_v63 = vsel %vm2997_vm8, %v3747_v18, 0.0 }
0x2d99   :  { %v3749_v0 = vrot.slane %v3748_v63, 4 }
0x2d9b   :  { %v3750_v3 = vadd.f32 %v3749_v0, %v3748_v63 }
0x2d9d   :  { %v3751_v2 = vrot.slane %v3750_v3, 2 }
0x2d9f   :  { %v3752_v38 = vadd.f32 %v3751_v2, %v3750_v3 }
0x2da1   :  { %v3753_v5 = vrot.slane %v3752_v38, 1 }
0x2da3   :  { %v3754_v53 = vadd.f32 %v3753_v5, %v3752_v38 }
0x2da5   :  { %v3755_v59 = vmul.f32 %v3754_v53, %v6526_v39 }
0x2da7   :  { %v3756_v19 = vsub.f32 %v3747_v18, %v3755_v59  ;;  %v3867_v18 = vld [vmem:[%s6672_s15] sm:$0xff] }
0x2da8   :  { %3893 = vmatpush.msrb.mxu1 %v3867_v18 }
0x2da9   :  { %v3757_v11 = vmul.f32 %v3756_v19, %v3756_v19 }
0x2dab   :  { %v3758_v7 = vsel %vm2997_vm8, %v3757_v11, 0.0 }
0x2dac   :  { %v3759_v13 = vrot.slane %v3758_v7, 4 }
0x2dae   :  { %v3760_v10 = vadd.f32 %v3759_v13, %v3758_v7  ;;  %v5021_v7 = vld [vmem:[%s6670_s13 + $0x3] ss:$0 sm:$0xff]  ;;  %s5198_s13 = smov 127  }
0x2db0   :  { %v3761_v36 = vrot.slane %v3760_v10, 2 }
0x2db2   :  { %v3762_v45 = vadd.f32 %v3761_v36, %v3760_v10  ;;  %v5197_v36 = vmov 0  }
0x2db3   :  { %5005 = vset.pattern.permute.xlu2 %v5197_v36  ;;  %5006 = vset.pattern.permute.xlu0 %v5197_v36 }
0x2db4   :  { %v3763_v14 = vrot.slane %v3762_v45, 1 }
0x2db6   :  { %v3764_v1 = vadd.f32 %v3763_v14, %v3762_v45 }
0x2db8   :  { %v3765_v12 = vmul.f32 %v3764_v1, %v6526_v39 }
0x2dba   :  { %v3766_v16 = vadd.f32 1e-05, %v3765_v12 }
0x2dbc   :  { %5126 = vrsqrt.f32 %v3766_v16  ;;  %vm3773_vm1 = vweird.f32 %v3766_v16 }
0x2dc2   :  { %v5127_v24 = vpop.eup %5126 }
0x2dc3   :  { %v3768_v25 = vmul.f32 %v5127_v24, %v3766_v16  ;;  %vm3774_vm0 = vweird.f32 %v5127_v24 }
0x2dc4   :  { %vm3775_vm2 = vmor %vm3773_vm1, %vm3774_vm0 }
0x2dc5   :  { %v3769_v22 = vmul.f32 %v5127_v24, %v3768_v25 }
0x2dc7   :  { %v3770_v27 = vmul.f32 0.5, %v3769_v22 }
0x2dc9   :  { %v3771_v6 = vsub.f32 1.5, %v3770_v27 }
0x2dcb   :  { %v3772_v4 = vmul.f32 %v5127_v24, %v3771_v6 }
0x2dcd   :  { %v3776_v30 = vsel %vm3775_vm2, %v5127_v24, %v3772_v4 }
0x2dce   :  { %v3777_v51 = vmul.f32 %v3776_v30, %v3756_v19 }
0x2dd0   :  { %v3783_v29 = vmul.f32 %v5018_v28, %v3777_v51 }
0x2dd2   :  { %v3789_v35 = vadd.f32 %v5019_v52, %v3783_v29 }
0x2dd4   :  { %4798 = vmatmul.msk.f32.vlgmr.msrb.gmra.mxu2 %vm1997_vm4, %v3789_v35 }
0x2e57   :  { %v3820_v8 = vpop.f32.mrf.mxu2 }
0x2e58   :  { %v3821_v54 = vadd.f32 %v5020_v42, %v3820_v8 }
0x2e5a   :  { %v3823_v61 = vmul.f32 0.01, %v3821_v54 }
0x2e5c   :  { %v3824_v43 = vmax.f32 %v3821_v54, %v3823_v61 }
0x2e5e   :  { %v3825_v55 = vsel %vm2997_vm8, %v3824_v43, 0.0 }
0x2e5f   :  { %v3826_v32 = vrot.slane %v3825_v55, 4 }
0x2e61   :  { %v3827_v33 = vadd.f32 %v3826_v32, %v3825_v55 }
0x2e63   :  { %v3828_v44 = vrot.slane %v3827_v33, 2 }
0x2e65   :  { %v3829_v37 = vadd.f32 %v3828_v44, %v3827_v33 }
0x2e67   :  { %v3830_v34 = vrot.slane %v3829_v37, 1 }
0x2e69   :  { %v3831_v41 = vadd.f32 %v3830_v34, %v3829_v37 }
0x2e6b   :  { %v3832_v46 = vmul.f32 %v3831_v41, %v6526_v39 }
0x2e6d   :  { %v3833_v47 = vsub.f32 %v3824_v43, %v3832_v46 }
0x2e6f   :  { %v3834_v48 = vmul.f32 %v3833_v47, %v3833_v47 }
0x2e71   :  { %v3835_v62 = vsel %vm2997_vm8, %v3834_v48, 0.0 }
0x2e72   :  { %v3836_v49 = vrot.slane %v3835_v62, 4 }
0x2e74   :  { %v3837_v15 = vadd.f32 %v3836_v49, %v3835_v62 }
0x2e76   :  { %v3838_v17 = vrot.slane %v3837_v15, 2 }
0x2e78   :  { %v3839_v31 = vadd.f32 %v3838_v17, %v3837_v15 }
0x2e7a   :  { %v3840_v63 = vrot.slane %v3839_v31, 1 }
0x2e7c   :  { %v3841_v0 = vadd.f32 %v3840_v63, %v3839_v31 }
0x2e7e   :  { %v3842_v3 = vmul.f32 %v3841_v0, %v6526_v39  ;;  %v5022_v39 = vld [vmem:[%s6671_s14 + $0x3] ss:$0 sm:$0xff]  ;;  %s5199_s14 = smov 96  }
0x2e80   :  { %v3843_v2 = vadd.f32 1e-05, %v3842_v3 }
0x2e82   :  { %5128 = vrsqrt.f32 %v3843_v2  ;;  %vm3850_vm5 = vweird.f32 %v3843_v2 }
0x2e88   :  { %v5129_v38 = vpop.eup %5128 }
0x2e89   :  { %v3845_v5 = vmul.f32 %v5129_v38, %v3843_v2  ;;  %vm3851_vm3 = vweird.f32 %v5129_v38 }
0x2e8a   :  { %vm3852_vm6 = vmor %vm3850_vm5, %vm3851_vm3 }
0x2e8b   :  { %v3846_v53 = vmul.f32 %v5129_v38, %v3845_v5 }
0x2e8d   :  { %v3847_v59 = vmul.f32 0.5, %v3846_v53 }
0x2e8f   :  { %v3848_v19 = vsub.f32 1.5, %v3847_v59 }
0x2e91   :  { %v3849_v11 = vmul.f32 %v5129_v38, %v3848_v19 }
0x2e93   :  { %v3853_v13 = vsel %vm3852_vm6, %v5129_v38, %v3849_v11 }
0x2e94   :  { %v3854_v9 = vmul.f32 %v3853_v13, %v3833_v47 }
0x2e96   :  { %v3860_v10 = vmul.f32 %v5021_v7, %v3854_v9 }
0x2e98   :  { %v3866_v58 = vadd.f32 %v5022_v39, %v3860_v10 }
0x2e9a   :  { %4801 = vmatmul.msk.f32.vlgmr.msrb.gmra.mxu1 %vm1997_vm4, %v3866_v58  ;;  %vm2441_vm4 = vcmask 261126  }
0x2f17   :  { %v3895_v45 = vpop.f32.mrf.mxu1 }
0x2f18   :  { %v3896_v23 = vadd.f32 %v5023_v20, %v3895_v45 }
0x2f1a   :  { %3916 = vperm.xlu2 %5005, %v3896_v23   ;;  %3899 = vrot.lane.b32.xlu0 %v3896_v23, %s5198_s13 }
0x2f22   :  { %2438 = vrot.lane.b32.xlu2 %v6228_v26, %s5195_s20  ;;  %2444 = vrot.lane.b32.xlu0 %v6223_v21, %s5199_s14 }
0x2f2a   :  { %3000 = vrot.lane.b32.xlu2 %v6440_v50, %s5199_s14  ;;  %v5200_v50 = vmov 4.0  }
0x2f2b   :  { %5130 = vrcp.f32 %v5200_v50 }
0x2f31   :  { %v5131_v24 = vpop.eup %5130 }
0x2f32   :  { %v3907_v25 = vmul.f32 4.0, %v5131_v24  ;;  %vm3911_vm9 = vweird.f32 %v5131_v24 }
0x2f34   :  { %v3908_v22 = vsub.f32 1.0, %v3907_v25 }
0x2f36   :  { %v3909_v27 = vmul.f32 %v5131_v24, %v3908_v22 }
0x2f38   :  { %v3910_v6 = vadd.f32 %v5131_v24, %v3909_v27 }
0x2f3a   :  { %v3912_v4 = vsel %vm3911_vm9, %v5131_v24, %v3910_v6 }
0x2f74   :  { %v3917_v14 = vpop.permute.xlu2 %3916 }
0x2f7c   :  { %v2439_v1 = vpop.permute.xlu2 %2438 }
0x2f7d   :  { %2442 = vst.msk [vmem:[%s6675_s18 - $0x6] sm:$0xc0] %vm2441_vm4, %v2439_v1 }
0x2f84   :  { %v3001_v12 = vpop.permute.xlu2 %3000 }
0x2f85   :  { %4749 = vst.msk [vmem:[%s6675_s18 + $0x8] sm:$0x3] %vm2997_vm8, %v3001_v12 }
0x2f8c   :  { %v3900_v26 = vpop.permute.xlu0 %3899 }
0x2f8d   :  { %v3903_v16 = vsel %vm3902_vm7, %v3900_v26, 0.0 }
0x2f8e   :  { %3904 = vadd.xlane.f32.xlu1 %v3903_v16 }
0x2f94   :  { %v2445_v21 = vpop.permute.xlu0 %2444 }
0x2f95   :  { %4723 = vst.msk [vmem:[%s6675_s18] sm:$0xc0] %vm2441_vm4, %v2445_v21 }
0x3001   :  { %v3905_v28 = vpop.xlane.xlu1 %3904 }
0x3002   :  { %v3913_v30 = vmul.f32 %v3912_v4, %v3905_v28 }
0x3004   :  { %v3914_v51 = vsub.f32 %v3896_v23, %v3913_v30 }
0x3006   :  { %v3919_v52 = vadd.f32 %v3917_v14, %v3914_v51 }
0x3008   :  { %3921 = vrot.lane.b32.xlu0 %v3919_v52, %s5198_s13 }
0x3010   :  { %3552 = vrot.lane.b32.xlu0 %v6500_v57, %s5199_s14 }
0x307a   :  { %v3922_v29 = vpop.permute.xlu0 %3921 }
0x307b   :  { %3924 = vst.msk [vmem:[#allocation5] sm:$0x3] %vm3902_vm7, %v3922_v29 }
0x307c   :  { %3935 = dma.vmem_to_hbm [thread:$0]  %s3931_s29, 32, %s3933_s0, [#allocation4]  }
0x3082   :  { %v3553_v35 = vpop.permute.xlu0 %3552 }
0x3083   :  { %4775 = vst.msk [vmem:[%s6675_s18 + $0xa] sm:$0x3] %vm2997_vm8, %v3553_v35 }
0x3084   :  { %5186 = dma.done.wait [#allocation4], 32  }
0x3085   :  { %5187 = vsyncadd [#allocation4], 4294967264 }
0x3086   :  { %3944 = vsyncpa [#allocation3], 1 }
0x3087   :  { %3945 = vsyncpa [#allocation4], 1 }

</bundles_post_ra>
